<compile_context>
chip_gen: v6e
topology: v6e:2x2x1
jax: 0.10.0
libtpu: 0.0.40
codegen_flags: <defaults>
</compile_context>

<pallas_src>
import jax
import jax.numpy as jnp
from jax import lax
from jax.experimental import pallas as pl
from jax.experimental.pallas import tpu as pltpu

TAU = 12
BETA = 0.5
GATE_PAD = 128   # 3 * hidden (= 96) padded to a full 128-lane vreg


def _encode_kernel(x_ref, wdr_ref, bdr_ref, wih_ref, bih_ref, gx_ref):
    # x_ref: (1, T, D)   wdr_ref: (D, R)   bdr_ref: (1, R)
    # wih_ref: (R, GP)   bih_ref: (1, GP)  gx_ref: (1, T, GP)
    x = x_ref[0]                                                       # (T, D)
    red = jnp.dot(x, wdr_ref[...], preferred_element_type=jnp.float32)
    red = red + bdr_ref[...]                                           # (T, R)
    gx = jnp.dot(red, wih_ref[...], preferred_element_type=jnp.float32)
    gx = gx + bih_ref[...]                                             # (T, GP)
    gx_ref[0] = gx.astype(gx_ref.dtype)


def _gru_head_kernel(gx_ref, whh_ref, bhh_ref, wreg_ref, breg_ref, nlm_ref,
                     rel_ref, map_ref):
    B, T, GP = gx_ref.shape
    H = whh_ref.shape[0]

    whh = whh_ref[...]              # (H, GP)  hoisted out of the loop
    bhh = bhh_ref[...]              # (1, GP)
    wreg = wreg_ref[...]            # (1, H)
    breg = breg_ref[0]

    # ---- GRU recurrence (PyTorch gate order r, z, n), statically unrolled ----
    h = jnp.zeros((B, H), jnp.float32)
    h0_rows = []
    for t in range(T):
        gxt = gx_ref[:, t, :]                                          # (B, GP)
        gh = jnp.dot(h, whh, preferred_element_type=jnp.float32) + bhh
        r = jax.nn.sigmoid(gxt[:, 0:H] + gh[:, 0:H])
        z = jax.nn.sigmoid(gxt[:, H:2 * H] + gh[:, H:2 * H])
        n = jnp.tanh(gxt[:, 2 * H:3 * H] + r * gh[:, 2 * H:3 * H])
        h = (1.0 - z) * n + z * h
        h0_rows.append(h[0:1, :])   # only batch 0 feeds the score head
    hs0 = jnp.concatenate(h0_rows, axis=0)                             # (T, H)

    # ---- regression head: q0[t] = hs0[t] . wreg + breg ----
    q0 = jnp.sum(hs0 * wreg, axis=1, keepdims=True) + breg             # (T, 1)

    # ---- _sitp temporal pooling, vectorised with iota masks ----
    k_idx = lax.broadcasted_iota(jnp.int32, (T, T), 0)   # source frame k
    i_idx = lax.broadcasted_iota(jnp.int32, (T, T), 1)   # output frame i

    wcol = jnp.exp(-q0)                                                # (T, 1)
    qk = jnp.broadcast_to(q0, (T, T))
    wk = jnp.broadcast_to(wcol, (T, T))
    qwk = jnp.broadcast_to(q0 * wcol, (T, T))

    # memory term l[i]: min over trailing window [i-tau+1, i]
    past = (k_idx <= i_idx) & (k_idx >= i_idx - (TAU - 1))
    l = jnp.min(jnp.where(past, qk, jnp.inf), axis=0, keepdims=True)   # (1, T)

    # current term m[i]: exp(-q)-weighted mean over forward window [i, i+tau-1]
    fut = (k_idx >= i_idx) & (k_idx <= i_idx + (TAU - 1))
    num = jnp.sum(jnp.where(fut, qwk, 0.0), axis=0, keepdims=True)     # (1, T)
    den = jnp.sum(jnp.where(fut, wk, 0.0), axis=0, keepdims=True)      # (1, T)
    m = num / den                                                      # tiny vector

    q_hat = BETA * m + (1.0 - BETA) * l                                # (1, T)
    rel = jnp.sum(q_hat, axis=1, keepdims=True) * (1.0 / T)            # (1, 1)
    rel_s = jax.nn.sigmoid(rel)                                        # bound

    w1 = nlm_ref[0]
    b1 = nlm_ref[1]
    w2 = nlm_ref[2]
    b2 = nlm_ref[3]
    mapped = w2 * jax.nn.sigmoid(w1 * rel_s + b1) + b2                 # (1, 1)

    rel_ref[...] = rel_s.astype(rel_ref.dtype)
    map_ref[...] = mapped.astype(map_ref.dtype)


def vqa_forward(x, params):
    """x: (B, T, input_size) f32. Returns (relative_score, mapped_score), each shape (1,)."""
    (wdr_t, bdr, wih_t, bih, whh_t, bhh, wreg_row, breg, nlm_p) = params
    B, T, D = x.shape
    R = wdr_t.shape[1]
    H = whh_t.shape[0]
    G = 3 * H
    GP = GATE_PAD

    # pad the gate dim (3H = 96) to a lane-dense 128 so kernel-1 stores are
    # full, unmasked vst's and kernel-2 slices come out of a full vreg.
    wih_p = jnp.zeros((R, GP), jnp.float32).at[:, :G].set(wih_t)
    bih_p = jnp.zeros((1, GP), jnp.float32).at[0, :G].set(bih)
    whh_p = jnp.zeros((H, GP), jnp.float32).at[:, :G].set(whh_t)
    bhh_p = jnp.zeros((1, GP), jnp.float32).at[0, :G].set(bhh)
    bdr_2d = bdr.reshape(1, R)

    # Kernel 1: fused dimension-reduction + GRU input projection, parallel over B.
    gx = pl.pallas_call(
        _encode_kernel,
        out_shape=jax.ShapeDtypeStruct((B, T, GP), jnp.float32),
        grid=(B,),
        in_specs=[
            pl.BlockSpec((1, T, D), lambda b: (b, 0, 0)),
            pl.BlockSpec((D, R), lambda b: (0, 0)),
            pl.BlockSpec((1, R), lambda b: (0, 0)),
            pl.BlockSpec((R, GP), lambda b: (0, 0)),
            pl.BlockSpec((1, GP), lambda b: (0, 0)),
        ],
        out_specs=pl.BlockSpec((1, T, GP), lambda b: (b, 0, 0)),
        compiler_params=pltpu.CompilerParams(
            dimension_semantics=("parallel",)),
    )(x, wdr_t, bdr_2d, wih_p, bih_p)

    # Kernel 2: GRU recurrence + regression + temporal pooling + score heads.
    rel, mapped = pl.pallas_call(
        _gru_head_kernel,
        out_shape=(jax.ShapeDtypeStruct((1, 1), jnp.float32),
                   jax.ShapeDtypeStruct((1, 1), jnp.float32)),
        in_specs=[
            pl.BlockSpec(memory_space=pltpu.MemorySpace.VMEM),   # gx
            pl.BlockSpec(memory_space=pltpu.MemorySpace.VMEM),   # whh_p
            pl.BlockSpec(memory_space=pltpu.MemorySpace.VMEM),   # bhh_p
            pl.BlockSpec(memory_space=pltpu.MemorySpace.VMEM),   # wreg_row
            pl.BlockSpec(memory_space=pltpu.MemorySpace.SMEM),   # breg
            pl.BlockSpec(memory_space=pltpu.MemorySpace.SMEM),   # nlm params
        ],
        out_specs=(pl.BlockSpec(memory_space=pltpu.MemorySpace.VMEM),
                   pl.BlockSpec(memory_space=pltpu.MemorySpace.VMEM)),
    )(gx, whh_p, bhh_p, wreg_row, breg, nlm_p)

    return rel.reshape(1), mapped.reshape(1)


def _reference_forward(x, params, tau=TAU, beta=BETA):
    """Pure-JAX mirror of the PyTorch forward (for correctness checking)."""
    (wdr_t, bdr, wih_t, bih, whh_t, bhh, wreg_row, breg, nlm_p) = params
    hp = lax.Precision.HIGHEST
    B, T, _ = x.shape
    H = whh_t.shape[0]

    red = jnp.einsum("btd,dr->btr", x, wdr_t, precision=hp) + bdr
    h = jnp.zeros((B, H), jnp.float32)
    hs = []
    for t in range(T):
        gxt = jnp.dot(red[:, t, :], wih_t, precision=hp) + bih
        gh = jnp.dot(h, whh_t, precision=hp) + bhh
        r = jax.nn.sigmoid(gxt[:, :H] + gh[:, :H])
        z = jax.nn.sigmoid(gxt[:, H:2 * H] + gh[:, H:2 * H])
        n = jnp.tanh(gxt[:, 2 * H:] + r * gh[:, 2 * H:])
        h = (1.0 - z) * n + z * h
        hs.append(h)
    hs = jnp.stack(hs, axis=1)                                          # (B, T, H)
    q = jnp.einsum("bth,h->bt", hs, wreg_row[0], precision=hp) + breg[0]
    q0 = q[0]                                                           # (T,)

    # _sitp written exactly as the PyTorch max/avg-pool formulation
    qm = jnp.full((tau - 1,), -jnp.inf, jnp.float32)
    qp = jnp.full((tau - 1,), 1e4, jnp.float32)
    cat_l = jnp.concatenate([qm, -q0])
    cat_m = jnp.concatenate([q0 * jnp.exp(-q0), qp * jnp.exp(-qp)])
    cat_n = jnp.concatenate([jnp.exp(-q0), jnp.exp(-qp)])
    l = -jnp.stack([jnp.max(cat_l[i:i + tau]) for i in range(T)])
    m = jnp.stack([jnp.mean(cat_m[i:i + tau]) for i in range(T)])
    n = jnp.stack([jnp.mean(cat_n[i:i + tau]) for i in range(T)])
    m = m / n
    q_hat = beta * m + (1.0 - beta) * l
    rel = jax.nn.sigmoid(jnp.mean(q_hat))
    mapped = nlm_p[2] * jax.nn.sigmoid(nlm_p[0] * rel + nlm_p[1]) + nlm_p[3]
    return jnp.reshape(rel, (1,)), jnp.reshape(mapped, (1,))


if __name__ == "__main__":
    key = jax.random.PRNGKey(0)
    B, T = 2, 16
    D_IN, R, H = 512, 128, 32   # small config: input 512 -> reduced 128 -> GRU(32)

    ks = jax.random.split(key, 8)
    x = jax.random.normal(ks[0], (B, T, D_IN), dtype=jnp.float32)

    s = 0.05
    wdr_t = s * jax.random.normal(ks[1], (D_IN, R), dtype=jnp.float32)   # Linear.weight.T
    bdr = s * jax.random.normal(ks[2], (R,), dtype=jnp.float32)
    wih_t = s * jax.random.normal(ks[3], (R, 3 * H), dtype=jnp.float32)  # GRU weight_ih.T (r|z|n)
    bih = s * jax.random.normal(ks[4], (3 * H,), dtype=jnp.float32)
    whh_t = s * jax.random.normal(ks[5], (H, 3 * H), dtype=jnp.float32)  # GRU weight_hh.T (r|z|n)
    bhh = s * jax.random.normal(ks[6], (3 * H,), dtype=jnp.float32)
    wreg_row = s * jax.random.normal(ks[7], (1, H), dtype=jnp.float32)   # regression weight
    breg = jnp.full((1,), 0.1, dtype=jnp.float32)
    # nlm init from the module: Linear(1,1) w=2*sqrt(3), b=-sqrt(3); Sigmoid; Linear(1,1) w=1, b=0
    sqrt3 = 3.0 ** 0.5
    nlm_p = jnp.array([2.0 * sqrt3, -sqrt3, 1.0, 0.0], dtype=jnp.float32)

    params = (wdr_t, bdr, wih_t, bih, whh_t, bhh, wreg_row, breg, nlm_p)

    rel, mapped = jax.jit(vqa_forward)(x, params)
    rel, mapped = jax.block_until_ready((rel, mapped))

    rel_ref, mapped_ref = _reference_forward(x, params)

    assert rel.shape == (1,) and mapped.shape == (1,)
    assert rel.dtype == jnp.float32 and mapped.dtype == jnp.float32
    assert jnp.allclose(rel, rel_ref, atol=1e-3, rtol=1e-3)
    assert jnp.allclose(mapped, mapped_ref, atol=1e-3, rtol=1e-3)

    print("KERNEL_OK")
</pallas_src>

<mosaic_0001>
module attributes {stable_mosaic.version = 11 : i64} {
  func.func @_encode_kernel(%arg0: i32, %arg1: memref<1x16x512xf32, #tpu.memory_space<vmem>>, %arg2: memref<512x128xf32, #tpu.memory_space<vmem>>, %arg3: memref<1x128xf32, #tpu.memory_space<vmem>>, %arg4: memref<128x128xf32, #tpu.memory_space<vmem>>, %arg5: memref<1x128xf32, #tpu.memory_space<vmem>>, %arg6: memref<1x16x128xf32, #tpu.memory_space<vmem>>) attributes {dimension_semantics = [#tpu.dimension_semantics<parallel>], iteration_bounds = array<i64: 2>, scalar_prefetch = 0 : i64, scratch_operands = 0 : i64, tpu.core_type = #tpu.core_type<tc>, window_params = [{transform_indices = @transform_0, window_bounds = array<i64: 1, 16, 512>}, {pipeline_mode = #tpu.pipeline_mode<synchronous>, transform_indices = @transform_1, window_bounds = array<i64: 512, 128>}, {pipeline_mode = #tpu.pipeline_mode<synchronous>, transform_indices = @transform_2, window_bounds = array<i64: 1, 128>}, {pipeline_mode = #tpu.pipeline_mode<synchronous>, transform_indices = @transform_3, window_bounds = array<i64: 128, 128>}, {pipeline_mode = #tpu.pipeline_mode<synchronous>, transform_indices = @transform_4, window_bounds = array<i64: 1, 128>}, {transform_indices = @transform_5, window_bounds = array<i64: 1, 16, 128>}]} {
    %c0 = arith.constant 0 : index
    %c0_0 = arith.constant 0 : index
    %c0_1 = arith.constant 0 : index
    %0 = vector.load %arg1[%c0, %c0_0, %c0_1] : memref<1x16x512xf32, #tpu.memory_space<vmem>>, vector<1x16x512xf32>
    %1 = vector.shape_cast %0 : vector<1x16x512xf32> to vector<16x512xf32>
    %c0_2 = arith.constant 0 : index
    %c0_3 = arith.constant 0 : index
    %2 = vector.load %arg2[%c0_2, %c0_3] : memref<512x128xf32, #tpu.memory_space<vmem>>, vector<512x128xf32>
    %cst = arith.constant dense<0.000000e+00> : vector<16x128xf32>
    %3 = tpu.matmul %1, %2, %cst {dimension_numbers = #tpu.dot_dimension_numbers<[1], [0], [0], [1], [0, 0, 1, 1], [], []>} : vector<16x512xf32>, vector<512x128xf32>, vector<16x128xf32> -> vector<16x128xf32>
    %c0_4 = arith.constant 0 : index
    %c0_5 = arith.constant 0 : index
    %4 = vector.load %arg3[%c0_4, %c0_5] : memref<1x128xf32, #tpu.memory_space<vmem>>, vector<1x128xf32>
    %5 = vector.broadcast %4 : vector<1x128xf32> to vector<16x128xf32>
    %6 = arith.addf %3, %5 : vector<16x128xf32>
    %c0_6 = arith.constant 0 : index
    %c0_7 = arith.constant 0 : index
    %7 = vector.load %arg4[%c0_6, %c0_7] : memref<128x128xf32, #tpu.memory_space<vmem>>, vector<128x128xf32>
    %cst_8 = arith.constant dense<0.000000e+00> : vector<16x128xf32>
    %8 = tpu.matmul %6, %7, %cst_8 {dimension_numbers = #tpu.dot_dimension_numbers<[1], [0], [0], [1], [0, 0, 1, 1], [], []>} : vector<16x128xf32>, vector<128x128xf32>, vector<16x128xf32> -> vector<16x128xf32>
    %c0_9 = arith.constant 0 : index
    %c0_10 = arith.constant 0 : index
    %9 = vector.load %arg5[%c0_9, %c0_10] : memref<1x128xf32, #tpu.memory_space<vmem>>, vector<1x128xf32>
    %10 = vector.broadcast %9 : vector<1x128xf32> to vector<16x128xf32>
    %11 = arith.addf %8, %10 : vector<16x128xf32>
    %c0_11 = arith.constant 0 : index
    %c0_12 = arith.constant 0 : index
    %c0_13 = arith.constant 0 : index
    %12 = vector.load %arg6[%c0_11, %c0_12, %c0_13] : memref<1x16x128xf32, #tpu.memory_space<vmem>>, vector<1x16x128xf32>
    %13 = vector.shape_cast %12 : vector<1x16x128xf32> to vector<16x128xf32>
    %14 = vector.shape_cast %11 : vector<16x128xf32> to vector<1x16x128xf32>
    tpu.vector_store %arg6[%c0_11, %c0_12, %c0_13], %14 {strides = array<i32>} : memref<1x16x128xf32, #tpu.memory_space<vmem>>, vector<1x16x128xf32>,
    return
  }
  func.func @transform_0(%arg0: i32) -> (i32, i32, i32) {
    %c0_i32 = arith.constant 0 : i32
    %c0_i32_0 = arith.constant 0 : i32
    %c0_i32_1 = arith.constant 0 : i32
    return %arg0, %c0_i32, %c0_i32_0 : i32, i32, i32
  }
  func.func @transform_1(%arg0: i32) -> (i32, i32) {
    %c0_i32 = arith.constant 0 : i32
    %c0_i32_0 = arith.constant 0 : i32
    %c0_i32_1 = arith.constant 0 : i32
    return %c0_i32, %c0_i32_0 : i32, i32
  }
  func.func @transform_2(%arg0: i32) -> (i32, i32) {
    %c0_i32 = arith.constant 0 : i32
    %c0_i32_0 = arith.constant 0 : i32
    %c0_i32_1 = arith.constant 0 : i32
    return %c0_i32, %c0_i32_0 : i32, i32
  }
  func.func @transform_3(%arg0: i32) -> (i32, i32) {
    %c0_i32 = arith.constant 0 : i32
    %c0_i32_0 = arith.constant 0 : i32
    %c0_i32_1 = arith.constant 0 : i32
    return %c0_i32, %c0_i32_0 : i32, i32
  }
  func.func @transform_4(%arg0: i32) -> (i32, i32) {
    %c0_i32 = arith.constant 0 : i32
    %c0_i32_0 = arith.constant 0 : i32
    %c0_i32_1 = arith.constant 0 : i32
    return %c0_i32, %c0_i32_0 : i32, i32
  }
  func.func @transform_5(%arg0: i32) -> (i32, i32, i32) {
    %c0_i32 = arith.constant 0 : i32
    %c0_i32_0 = arith.constant 0 : i32
    %c0_i32_1 = arith.constant 0 : i32
    return %arg0, %c0_i32, %c0_i32_0 : i32, i32, i32
  }
}

module attributes {stable_mosaic.version = 11 : i64} {
  func.func @_gru_head_kernel(%arg0: memref<2x16x128xf32, #tpu.memory_space<vmem>>, %arg1: memref<32x128xf32, #tpu.memory_space<vmem>>, %arg2: memref<1x128xf32, #tpu.memory_space<vmem>>, %arg3: memref<1x32xf32, #tpu.memory_space<vmem>>, %arg4: memref<1xf32, #tpu.memory_space<smem>>, %arg5: memref<4xf32, #tpu.memory_space<smem>>, %arg6: memref<1x1xf32, #tpu.memory_space<vmem>>, %arg7: memref<1x1xf32, #tpu.memory_space<vmem>>) attributes {dimension_semantics = [], scalar_prefetch = 0 : i64, scratch_operands = 0 : i64, tpu.core_type = #tpu.core_type<tc>} {
    %c0 = arith.constant 0 : index
    %c0_0 = arith.constant 0 : index
    %0 = vector.load %arg1[%c0, %c0_0] : memref<32x128xf32, #tpu.memory_space<vmem>>, vector<32x128xf32>
    %c0_1 = arith.constant 0 : index
    %c0_2 = arith.constant 0 : index
    %1 = vector.load %arg2[%c0_1, %c0_2] : memref<1x128xf32, #tpu.memory_space<vmem>>, vector<1x128xf32>
    %c0_3 = arith.constant 0 : index
    %c0_4 = arith.constant 0 : index
    %2 = vector.load %arg3[%c0_3, %c0_4] : memref<1x32xf32, #tpu.memory_space<vmem>>, vector<1x32xf32>
    %c0_5 = arith.constant 0 : index
    %3 = memref.load %arg4[%c0_5] : memref<1xf32, #tpu.memory_space<smem>>
    %cst = arith.constant 0.000000e+00 : f32
    %4 = vector.broadcast %cst : f32 to vector<2x32xf32>
    %c0_6 = arith.constant 0 : index
    %c0_7 = arith.constant 0 : index
    %c0_8 = arith.constant 0 : index
    %5 = vector.load %arg0[%c0_6, %c0_7, %c0_8] : memref<2x16x128xf32, #tpu.memory_space<vmem>>, vector<2x1x128xf32>
    %6 = vector.shape_cast %5 : vector<2x1x128xf32> to vector<2x128xf32>
    %cst_9 = arith.constant dense<0.000000e+00> : vector<2x128xf32>
    %7 = tpu.matmul %4, %0, %cst_9 {dimension_numbers = #tpu.dot_dimension_numbers<[1], [0], [0], [1], [0, 0, 1, 1], [], []>} : vector<2x32xf32>, vector<32x128xf32>, vector<2x128xf32> -> vector<2x128xf32>
    %8 = vector.broadcast %1 : vector<1x128xf32> to vector<2x128xf32>
    %9 = arith.addf %7, %8 : vector<2x128xf32>
    %10 = vector.extract_strided_slice %6 {offsets = [0, 0], sizes = [2, 32], strides = [1, 1]} : vector<2x128xf32> to vector<2x32xf32>
    %11 = vector.extract_strided_slice %9 {offsets = [0, 0], sizes = [2, 32], strides = [1, 1]} : vector<2x128xf32> to vector<2x32xf32>
    %12 = arith.addf %10, %11 : vector<2x32xf32>
    %13 = arith.negf %12 : vector<2x32xf32>
    %14 = math.exp %13 : vector<2x32xf32>
    %cst_10 = arith.constant 1.000000e+00 : f32
    %15 = vector.broadcast %cst_10 : f32 to vector<2x32xf32>
    %16 = arith.addf %15, %14 : vector<2x32xf32>
    %17 = arith.divf %15, %16 : vector<2x32xf32>
    %18 = vector.extract_strided_slice %6 {offsets = [0, 32], sizes = [2, 32], strides = [1, 1]} : vector<2x128xf32> to vector<2x32xf32>
    %19 = vector.extract_strided_slice %9 {offsets = [0, 32], sizes = [2, 32], strides = [1, 1]} : vector<2x128xf32> to vector<2x32xf32>
    %20 = arith.addf %18, %19 : vector<2x32xf32>
    %21 = arith.negf %20 : vector<2x32xf32>
    %22 = math.exp %21 : vector<2x32xf32>
    %cst_11 = arith.constant 1.000000e+00 : f32
    %23 = vector.broadcast %cst_11 : f32 to vector<2x32xf32>
    %24 = arith.addf %23, %22 : vector<2x32xf32>
    %25 = arith.divf %23, %24 : vector<2x32xf32>
    %26 = vector.extract_strided_slice %6 {offsets = [0, 64], sizes = [2, 32], strides = [1, 1]} : vector<2x128xf32> to vector<2x32xf32>
    %27 = vector.extract_strided_slice %9 {offsets = [0, 64], sizes = [2, 32], strides = [1, 1]} : vector<2x128xf32> to vector<2x32xf32>
    %28 = arith.mulf %17, %27 : vector<2x32xf32>
    %29 = arith.addf %26, %28 : vector<2x32xf32>
    %30 = math.tanh %29 : vector<2x32xf32>
    %cst_12 = arith.constant 1.000000e+00 : f32
    %31 = vector.broadcast %cst_12 : f32 to vector<2x32xf32>
    %32 = arith.subf %31, %25 : vector<2x32xf32>
    %33 = arith.mulf %32, %30 : vector<2x32xf32>
    %34 = arith.mulf %25, %4 : vector<2x32xf32>
    %35 = arith.addf %33, %34 : vector<2x32xf32>
    %36 = vector.extract_strided_slice %35 {offsets = [0, 0], sizes = [1, 32], strides = [1, 1]} : vector<2x32xf32> to vector<1x32xf32>
    %c0_13 = arith.constant 0 : index
    %c1 = arith.constant 1 : index
    %c0_14 = arith.constant 0 : index
    %37 = vector.load %arg0[%c0_13, %c1, %c0_14] : memref<2x16x128xf32, #tpu.memory_space<vmem>>, vector<2x1x128xf32>
    %38 = vector.shape_cast %37 : vector<2x1x128xf32> to vector<2x128xf32>
    %cst_15 = arith.constant dense<0.000000e+00> : vector<2x128xf32>
    %39 = tpu.matmul %35, %0, %cst_15 {dimension_numbers = #tpu.dot_dimension_numbers<[1], [0], [0], [1], [0, 0, 1, 1], [], []>} : vector<2x32xf32>, vector<32x128xf32>, vector<2x128xf32> -> vector<2x128xf32>
    %40 = vector.broadcast %1 : vector<1x128xf32> to vector<2x128xf32>
    %41 = arith.addf %39, %40 : vector<2x128xf32>
    %42 = vector.extract_strided_slice %38 {offsets = [0, 0], sizes = [2, 32], strides = [1, 1]} : vector<2x128xf32> to vector<2x32xf32>
    %43 = vector.extract_strided_slice %41 {offsets = [0, 0], sizes = [2, 32], strides = [1, 1]} : vector<2x128xf32> to vector<2x32xf32>
    %44 = arith.addf %42, %43 : vector<2x32xf32>
    %45 = arith.negf %44 : vector<2x32xf32>
    %46 = math.exp %45 : vector<2x32xf32>
    %cst_16 = arith.constant 1.000000e+00 : f32
    %47 = vector.broadcast %cst_16 : f32 to vector<2x32xf32>
    %48 = arith.addf %47, %46 : vector<2x32xf32>
    %49 = arith.divf %47, %48 : vector<2x32xf32>
    %50 = vector.extract_strided_slice %38 {offsets = [0, 32], sizes = [2, 32], strides = [1, 1]} : vector<2x128xf32> to vector<2x32xf32>
    %51 = vector.extract_strided_slice %41 {offsets = [0, 32], sizes = [2, 32], strides = [1, 1]} : vector<2x128xf32> to vector<2x32xf32>
    %52 = arith.addf %50, %51 : vector<2x32xf32>
    %53 = arith.negf %52 : vector<2x32xf32>
    %54 = math.exp %53 : vector<2x32xf32>
    %cst_17 = arith.constant 1.000000e+00 : f32
    %55 = vector.broadcast %cst_17 : f32 to vector<2x32xf32>
    %56 = arith.addf %55, %54 : vector<2x32xf32>
    %57 = arith.divf %55, %56 : vector<2x32xf32>
    %58 = vector.extract_strided_slice %38 {offsets = [0, 64], sizes = [2, 32], strides = [1, 1]} : vector<2x128xf32> to vector<2x32xf32>
    %59 = vector.extract_strided_slice %41 {offsets = [0, 64], sizes = [2, 32], strides = [1, 1]} : vector<2x128xf32> to vector<2x32xf32>
    %60 = arith.mulf %49, %59 : vector<2x32xf32>
    %61 = arith.addf %58, %60 : vector<2x32xf32>
    %62 = math.tanh %61 : vector<2x32xf32>
    %cst_18 = arith.constant 1.000000e+00 : f32
    %63 = vector.broadcast %cst_18 : f32 to vector<2x32xf32>
    %64 = arith.subf %63, %57 : vector<2x32xf32>
    %65 = arith.mulf %64, %62 : vector<2x32xf32>
    %66 = arith.mulf %57, %35 : vector<2x32xf32>
    %67 = arith.addf %65, %66 : vector<2x32xf32>
    %68 = vector.extract_strided_slice %67 {offsets = [0, 0], sizes = [1, 32], strides = [1, 1]} : vector<2x32xf32> to vector<1x32xf32>
    %c0_19 = arith.constant 0 : index
    %c2 = arith.constant 2 : index
    %c0_20 = arith.constant 0 : index
    %69 = vector.load %arg0[%c0_19, %c2, %c0_20] : memref<2x16x128xf32, #tpu.memory_space<vmem>>, vector<2x1x128xf32>
    %70 = vector.shape_cast %69 : vector<2x1x128xf32> to vector<2x128xf32>
    %cst_21 = arith.constant dense<0.000000e+00> : vector<2x128xf32>
    %71 = tpu.matmul %67, %0, %cst_21 {dimension_numbers = #tpu.dot_dimension_numbers<[1], [0], [0], [1], [0, 0, 1, 1], [], []>} : vector<2x32xf32>, vector<32x128xf32>, vector<2x128xf32> -> vector<2x128xf32>
    %72 = vector.broadcast %1 : vector<1x128xf32> to vector<2x128xf32>
    %73 = arith.addf %71, %72 : vector<2x128xf32>
    %74 = vector.extract_strided_slice %70 {offsets = [0, 0], sizes = [2, 32], strides = [1, 1]} : vector<2x128xf32> to vector<2x32xf32>
    %75 = vector.extract_strided_slice %73 {offsets = [0, 0], sizes = [2, 32], strides = [1, 1]} : vector<2x128xf32> to vector<2x32xf32>
    %76 = arith.addf %74, %75 : vector<2x32xf32>
    %77 = arith.negf %76 : vector<2x32xf32>
    %78 = math.exp %77 : vector<2x32xf32>
    %cst_22 = arith.constant 1.000000e+00 : f32
    %79 = vector.broadcast %cst_22 : f32 to vector<2x32xf32>
    %80 = arith.addf %79, %78 : vector<2x32xf32>
    %81 = arith.divf %79, %80 : vector<2x32xf32>
    %82 = vector.extract_strided_slice %70 {offsets = [0, 32], sizes = [2, 32], strides = [1, 1]} : vector<2x128xf32> to vector<2x32xf32>
    %83 = vector.extract_strided_slice %73 {offsets = [0, 32], sizes = [2, 32], strides = [1, 1]} : vector<2x128xf32> to vector<2x32xf32>
    %84 = arith.addf %82, %83 : vector<2x32xf32>
    %85 = arith.negf %84 : vector<2x32xf32>
    %86 = math.exp %85 : vector<2x32xf32>
    %cst_23 = arith.constant 1.000000e+00 : f32
    %87 = vector.broadcast %cst_23 : f32 to vector<2x32xf32>
    %88 = arith.addf %87, %86 : vector<2x32xf32>
    %89 = arith.divf %87, %88 : vector<2x32xf32>
    %90 = vector.extract_strided_slice %70 {offsets = [0, 64], sizes = [2, 32], strides = [1, 1]} : vector<2x128xf32> to vector<2x32xf32>
    %91 = vector.extract_strided_slice %73 {offsets = [0, 64], sizes = [2, 32], strides = [1, 1]} : vector<2x128xf32> to vector<2x32xf32>
    %92 = arith.mulf %81, %91 : vector<2x32xf32>
    %93 = arith.addf %90, %92 : vector<2x32xf32>
    %94 = math.tanh %93 : vector<2x32xf32>
    %cst_24 = arith.constant 1.000000e+00 : f32
    %95 = vector.broadcast %cst_24 : f32 to vector<2x32xf32>
    %96 = arith.subf %95, %89 : vector<2x32xf32>
    %97 = arith.mulf %96, %94 : vector<2x32xf32>
    %98 = arith.mulf %89, %67 : vector<2x32xf32>
    %99 = arith.addf %97, %98 : vector<2x32xf32>
    %100 = vector.extract_strided_slice %99 {offsets = [0, 0], sizes = [1, 32], strides = [1, 1]} : vector<2x32xf32> to vector<1x32xf32>
    %c0_25 = arith.constant 0 : index
    %c3 = arith.constant 3 : index
    %c0_26 = arith.constant 0 : index
    %101 = vector.load %arg0[%c0_25, %c3, %c0_26] : memref<2x16x128xf32, #tpu.memory_space<vmem>>, vector<2x1x128xf32>
    %102 = vector.shape_cast %101 : vector<2x1x128xf32> to vector<2x128xf32>
    %cst_27 = arith.constant dense<0.000000e+00> : vector<2x128xf32>
    %103 = tpu.matmul %99, %0, %cst_27 {dimension_numbers = #tpu.dot_dimension_numbers<[1], [0], [0], [1], [0, 0, 1, 1], [], []>} : vector<2x32xf32>, vector<32x128xf32>, vector<2x128xf32> -> vector<2x128xf32>
    %104 = vector.broadcast %1 : vector<1x128xf32> to vector<2x128xf32>
    %105 = arith.addf %103, %104 : vector<2x128xf32>
    %106 = vector.extract_strided_slice %102 {offsets = [0, 0], sizes = [2, 32], strides = [1, 1]} : vector<2x128xf32> to vector<2x32xf32>
    %107 = vector.extract_strided_slice %105 {offsets = [0, 0], sizes = [2, 32], strides = [1, 1]} : vector<2x128xf32> to vector<2x32xf32>
    %108 = arith.addf %106, %107 : vector<2x32xf32>
    %109 = arith.negf %108 : vector<2x32xf32>
    %110 = math.exp %109 : vector<2x32xf32>
    %cst_28 = arith.constant 1.000000e+00 : f32
    %111 = vector.broadcast %cst_28 : f32 to vector<2x32xf32>
    %112 = arith.addf %111, %110 : vector<2x32xf32>
    %113 = arith.divf %111, %112 : vector<2x32xf32>
    %114 = vector.extract_strided_slice %102 {offsets = [0, 32], sizes = [2, 32], strides = [1, 1]} : vector<2x128xf32> to vector<2x32xf32>
    %115 = vector.extract_strided_slice %105 {offsets = [0, 32], sizes = [2, 32], strides = [1, 1]} : vector<2x128xf32> to vector<2x32xf32>
    %116 = arith.addf %114, %115 : vector<2x32xf32>
    %117 = arith.negf %116 : vector<2x32xf32>
    %118 = math.exp %117 : vector<2x32xf32>
    %cst_29 = arith.constant 1.000000e+00 : f32
    %119 = vector.broadcast %cst_29 : f32 to vector<2x32xf32>
    %120 = arith.addf %119, %118 : vector<2x32xf32>
    %121 = arith.divf %119, %120 : vector<2x32xf32>
    %122 = vector.extract_strided_slice %102 {offsets = [0, 64], sizes = [2, 32], strides = [1, 1]} : vector<2x128xf32> to vector<2x32xf32>
    %123 = vector.extract_strided_slice %105 {offsets = [0, 64], sizes = [2, 32], strides = [1, 1]} : vector<2x128xf32> to vector<2x32xf32>
    %124 = arith.mulf %113, %123 : vector<2x32xf32>
    %125 = arith.addf %122, %124 : vector<2x32xf32>
    %126 = math.tanh %125 : vector<2x32xf32>
    %cst_30 = arith.constant 1.000000e+00 : f32
    %127 = vector.broadcast %cst_30 : f32 to vector<2x32xf32>
    %128 = arith.subf %127, %121 : vector<2x32xf32>
    %129 = arith.mulf %128, %126 : vector<2x32xf32>
    %130 = arith.mulf %121, %99 : vector<2x32xf32>
    %131 = arith.addf %129, %130 : vector<2x32xf32>
    %132 = vector.extract_strided_slice %131 {offsets = [0, 0], sizes = [1, 32], strides = [1, 1]} : vector<2x32xf32> to vector<1x32xf32>
    %c0_31 = arith.constant 0 : index
    %c4 = arith.constant 4 : index
    %c0_32 = arith.constant 0 : index
    %133 = vector.load %arg0[%c0_31, %c4, %c0_32] : memref<2x16x128xf32, #tpu.memory_space<vmem>>, vector<2x1x128xf32>
    %134 = vector.shape_cast %133 : vector<2x1x128xf32> to vector<2x128xf32>
    %cst_33 = arith.constant dense<0.000000e+00> : vector<2x128xf32>
    %135 = tpu.matmul %131, %0, %cst_33 {dimension_numbers = #tpu.dot_dimension_numbers<[1], [0], [0], [1], [0, 0, 1, 1], [], []>} : vector<2x32xf32>, vector<32x128xf32>, vector<2x128xf32> -> vector<2x128xf32>
    %136 = vector.broadcast %1 : vector<1x128xf32> to vector<2x128xf32>
    %137 = arith.addf %135, %136 : vector<2x128xf32>
    %138 = vector.extract_strided_slice %134 {offsets = [0, 0], sizes = [2, 32], strides = [1, 1]} : vector<2x128xf32> to vector<2x32xf32>
    %139 = vector.extract_strided_slice %137 {offsets = [0, 0], sizes = [2, 32], strides = [1, 1]} : vector<2x128xf32> to vector<2x32xf32>
    %140 = arith.addf %138, %139 : vector<2x32xf32>
    %141 = arith.negf %140 : vector<2x32xf32>
    %142 = math.exp %141 : vector<2x32xf32>
    %cst_34 = arith.constant 1.000000e+00 : f32
    %143 = vector.broadcast %cst_34 : f32 to vector<2x32xf32>
    %144 = arith.addf %143, %142 : vector<2x32xf32>
    %145 = arith.divf %143, %144 : vector<2x32xf32>
    %146 = vector.extract_strided_slice %134 {offsets = [0, 32], sizes = [2, 32], strides = [1, 1]} : vector<2x128xf32> to vector<2x32xf32>
    %147 = vector.extract_strided_slice %137 {offsets = [0, 32], sizes = [2, 32], strides = [1, 1]} : vector<2x128xf32> to vector<2x32xf32>
    %148 = arith.addf %146, %147 : vector<2x32xf32>
    %149 = arith.negf %148 : vector<2x32xf32>
    %150 = math.exp %149 : vector<2x32xf32>
    %cst_35 = arith.constant 1.000000e+00 : f32
    %151 = vector.broadcast %cst_35 : f32 to vector<2x32xf32>
    %152 = arith.addf %151, %150 : vector<2x32xf32>
    %153 = arith.divf %151, %152 : vector<2x32xf32>
    %154 = vector.extract_strided_slice %134 {offsets = [0, 64], sizes = [2, 32], strides = [1, 1]} : vector<2x128xf32> to vector<2x32xf32>
    %155 = vector.extract_strided_slice %137 {offsets = [0, 64], sizes = [2, 32], strides = [1, 1]} : vector<2x128xf32> to vector<2x32xf32>
    %156 = arith.mulf %145, %155 : vector<2x32xf32>
    %157 = arith.addf %154, %156 : vector<2x32xf32>
    %158 = math.tanh %157 : vector<2x32xf32>
    %cst_36 = arith.constant 1.000000e+00 : f32
    %159 = vector.broadcast %cst_36 : f32 to vector<2x32xf32>
    %160 = arith.subf %159, %153 : vector<2x32xf32>
    %161 = arith.mulf %160, %158 : vector<2x32xf32>
    %162 = arith.mulf %153, %131 : vector<2x32xf32>
    %163 = arith.addf %161, %162 : vector<2x32xf32>
    %164 = vector.extract_strided_slice %163 {offsets = [0, 0], sizes = [1, 32], strides = [1, 1]} : vector<2x32xf32> to vector<1x32xf32>
    %c0_37 = arith.constant 0 : index
    %c5 = arith.constant 5 : index
    %c0_38 = arith.constant 0 : index
    %165 = vector.load %arg0[%c0_37, %c5, %c0_38] : memref<2x16x128xf32, #tpu.memory_space<vmem>>, vector<2x1x128xf32>
    %166 = vector.shape_cast %165 : vector<2x1x128xf32> to vector<2x128xf32>
    %cst_39 = arith.constant dense<0.000000e+00> : vector<2x128xf32>
    %167 = tpu.matmul %163, %0, %cst_39 {dimension_numbers = #tpu.dot_dimension_numbers<[1], [0], [0], [1], [0, 0, 1, 1], [], []>} : vector<2x32xf32>, vector<32x128xf32>, vector<2x128xf32> -> vector<2x128xf32>
    %168 = vector.broadcast %1 : vector<1x128xf32> to vector<2x128xf32>
    %169 = arith.addf %167, %168 : vector<2x128xf32>
    %170 = vector.extract_strided_slice %166 {offsets = [0, 0], sizes = [2, 32], strides = [1, 1]} : vector<2x128xf32> to vector<2x32xf32>
    %171 = vector.extract_strided_slice %169 {offsets = [0, 0], sizes = [2, 32], strides = [1, 1]} : vector<2x128xf32> to vector<2x32xf32>
    %172 = arith.addf %170, %171 : vector<2x32xf32>
    %173 = arith.negf %172 : vector<2x32xf32>
    %174 = math.exp %173 : vector<2x32xf32>
    %cst_40 = arith.constant 1.000000e+00 : f32
    %175 = vector.broadcast %cst_40 : f32 to vector<2x32xf32>
    %176 = arith.addf %175, %174 : vector<2x32xf32>
    %177 = arith.divf %175, %176 : vector<2x32xf32>
    %178 = vector.extract_strided_slice %166 {offsets = [0, 32], sizes = [2, 32], strides = [1, 1]} : vector<2x128xf32> to vector<2x32xf32>
    %179 = vector.extract_strided_slice %169 {offsets = [0, 32], sizes = [2, 32], strides = [1, 1]} : vector<2x128xf32> to vector<2x32xf32>
    %180 = arith.addf %178, %179 : vector<2x32xf32>
    %181 = arith.negf %180 : vector<2x32xf32>
    %182 = math.exp %181 : vector<2x32xf32>
    %cst_41 = arith.constant 1.000000e+00 : f32
    %183 = vector.broadcast %cst_41 : f32 to vector<2x32xf32>
    %184 = arith.addf %183, %182 : vector<2x32xf32>
    %185 = arith.divf %183, %184 : vector<2x32xf32>
    %186 = vector.extract_strided_slice %166 {offsets = [0, 64], sizes = [2, 32], strides = [1, 1]} : vector<2x128xf32> to vector<2x32xf32>
    %187 = vector.extract_strided_slice %169 {offsets = [0, 64], sizes = [2, 32], strides = [1, 1]} : vector<2x128xf32> to vector<2x32xf32>
    %188 = arith.mulf %177, %187 : vector<2x32xf32>
    %189 = arith.addf %186, %188 : vector<2x32xf32>
    %190 = math.tanh %189 : vector<2x32xf32>
    %cst_42 = arith.constant 1.000000e+00 : f32
    %191 = vector.broadcast %cst_42 : f32 to vector<2x32xf32>
    %192 = arith.subf %191, %185 : vector<2x32xf32>
    %193 = arith.mulf %192, %190 : vector<2x32xf32>
    %194 = arith.mulf %185, %163 : vector<2x32xf32>
    %195 = arith.addf %193, %194 : vector<2x32xf32>
    %196 = vector.extract_strided_slice %195 {offsets = [0, 0], sizes = [1, 32], strides = [1, 1]} : vector<2x32xf32> to vector<1x32xf32>
    %c0_43 = arith.constant 0 : index
    %c6 = arith.constant 6 : index
    %c0_44 = arith.constant 0 : index
    %197 = vector.load %arg0[%c0_43, %c6, %c0_44] : memref<2x16x128xf32, #tpu.memory_space<vmem>>, vector<2x1x128xf32>
    %198 = vector.shape_cast %197 : vector<2x1x128xf32> to vector<2x128xf32>
    %cst_45 = arith.constant dense<0.000000e+00> : vector<2x128xf32>
    %199 = tpu.matmul %195, %0, %cst_45 {dimension_numbers = #tpu.dot_dimension_numbers<[1], [0], [0], [1], [0, 0, 1, 1], [], []>} : vector<2x32xf32>, vector<32x128xf32>, vector<2x128xf32> -> vector<2x128xf32>
    %200 = vector.broadcast %1 : vector<1x128xf32> to vector<2x128xf32>
    %201 = arith.addf %199, %200 : vector<2x128xf32>
    %202 = vector.extract_strided_slice %198 {offsets = [0, 0], sizes = [2, 32], strides = [1, 1]} : vector<2x128xf32> to vector<2x32xf32>
    %203 = vector.extract_strided_slice %201 {offsets = [0, 0], sizes = [2, 32], strides = [1, 1]} : vector<2x128xf32> to vector<2x32xf32>
    %204 = arith.addf %202, %203 : vector<2x32xf32>
    %205 = arith.negf %204 : vector<2x32xf32>
    %206 = math.exp %205 : vector<2x32xf32>
    %cst_46 = arith.constant 1.000000e+00 : f32
    %207 = vector.broadcast %cst_46 : f32 to vector<2x32xf32>
    %208 = arith.addf %207, %206 : vector<2x32xf32>
    %209 = arith.divf %207, %208 : vector<2x32xf32>
    %210 = vector.extract_strided_slice %198 {offsets = [0, 32], sizes = [2, 32], strides = [1, 1]} : vector<2x128xf32> to vector<2x32xf32>
    %211 = vector.extract_strided_slice %201 {offsets = [0, 32], sizes = [2, 32], strides = [1, 1]} : vector<2x128xf32> to vector<2x32xf32>
    %212 = arith.addf %210, %211 : vector<2x32xf32>
    %213 = arith.negf %212 : vector<2x32xf32>
    %214 = math.exp %213 : vector<2x32xf32>
    %cst_47 = arith.constant 1.000000e+00 : f32
    %215 = vector.broadcast %cst_47 : f32 to vector<2x32xf32>
    %216 = arith.addf %215, %214 : vector<2x32xf32>
    %217 = arith.divf %215, %216 : vector<2x32xf32>
    %218 = vector.extract_strided_slice %198 {offsets = [0, 64], sizes = [2, 32], strides = [1, 1]} : vector<2x128xf32> to vector<2x32xf32>
    %219 = vector.extract_strided_slice %201 {offsets = [0, 64], sizes = [2, 32], strides = [1, 1]} : vector<2x128xf32> to vector<2x32xf32>
    %220 = arith.mulf %209, %219 : vector<2x32xf32>
    %221 = arith.addf %218, %220 : vector<2x32xf32>
    %222 = math.tanh %221 : vector<2x32xf32>
    %cst_48 = arith.constant 1.000000e+00 : f32
    %223 = vector.broadcast %cst_48 : f32 to vector<2x32xf32>
    %224 = arith.subf %223, %217 : vector<2x32xf32>
    %225 = arith.mulf %224, %222 : vector<2x32xf32>
    %226 = arith.mulf %217, %195 : vector<2x32xf32>
    %227 = arith.addf %225, %226 : vector<2x32xf32>
    %228 = vector.extract_strided_slice %227 {offsets = [0, 0], sizes = [1, 32], strides = [1, 1]} : vector<2x32xf32> to vector<1x32xf32>
    %c0_49 = arith.constant 0 : index
    %c7 = arith.constant 7 : index
    %c0_50 = arith.constant 0 : index
    %229 = vector.load %arg0[%c0_49, %c7, %c0_50] : memref<2x16x128xf32, #tpu.memory_space<vmem>>, vector<2x1x128xf32>
    %230 = vector.shape_cast %229 : vector<2x1x128xf32> to vector<2x128xf32>
    %cst_51 = arith.constant dense<0.000000e+00> : vector<2x128xf32>
    %231 = tpu.matmul %227, %0, %cst_51 {dimension_numbers = #tpu.dot_dimension_numbers<[1], [0], [0], [1], [0, 0, 1, 1], [], []>} : vector<2x32xf32>, vector<32x128xf32>, vector<2x128xf32> -> vector<2x128xf32>
    %232 = vector.broadcast %1 : vector<1x128xf32> to vector<2x128xf32>
    %233 = arith.addf %231, %232 : vector<2x128xf32>
    %234 = vector.extract_strided_slice %230 {offsets = [0, 0], sizes = [2, 32], strides = [1, 1]} : vector<2x128xf32> to vector<2x32xf32>
    %235 = vector.extract_strided_slice %233 {offsets = [0, 0], sizes = [2, 32], strides = [1, 1]} : vector<2x128xf32> to vector<2x32xf32>
    %236 = arith.addf %234, %235 : vector<2x32xf32>
    %237 = arith.negf %236 : vector<2x32xf32>
    %238 = math.exp %237 : vector<2x32xf32>
    %cst_52 = arith.constant 1.000000e+00 : f32
    %239 = vector.broadcast %cst_52 : f32 to vector<2x32xf32>
    %240 = arith.addf %239, %238 : vector<2x32xf32>
    %241 = arith.divf %239, %240 : vector<2x32xf32>
    %242 = vector.extract_strided_slice %230 {offsets = [0, 32], sizes = [2, 32], strides = [1, 1]} : vector<2x128xf32> to vector<2x32xf32>
    %243 = vector.extract_strided_slice %233 {offsets = [0, 32], sizes = [2, 32], strides = [1, 1]} : vector<2x128xf32> to vector<2x32xf32>
    %244 = arith.addf %242, %243 : vector<2x32xf32>
    %245 = arith.negf %244 : vector<2x32xf32>
    %246 = math.exp %245 : vector<2x32xf32>
    %cst_53 = arith.constant 1.000000e+00 : f32
    %247 = vector.broadcast %cst_53 : f32 to vector<2x32xf32>
    %248 = arith.addf %247, %246 : vector<2x32xf32>
    %249 = arith.divf %247, %248 : vector<2x32xf32>
    %250 = vector.extract_strided_slice %230 {offsets = [0, 64], sizes = [2, 32], strides = [1, 1]} : vector<2x128xf32> to vector<2x32xf32>
    %251 = vector.extract_strided_slice %233 {offsets = [0, 64], sizes = [2, 32], strides = [1, 1]} : vector<2x128xf32> to vector<2x32xf32>
    %252 = arith.mulf %241, %251 : vector<2x32xf32>
    %253 = arith.addf %250, %252 : vector<2x32xf32>
    %254 = math.tanh %253 : vector<2x32xf32>
    %cst_54 = arith.constant 1.000000e+00 : f32
    %255 = vector.broadcast %cst_54 : f32 to vector<2x32xf32>
    %256 = arith.subf %255, %249 : vector<2x32xf32>
    %257 = arith.mulf %256, %254 : vector<2x32xf32>
    %258 = arith.mulf %249, %227 : vector<2x32xf32>
    %259 = arith.addf %257, %258 : vector<2x32xf32>
    %260 = vector.extract_strided_slice %259 {offsets = [0, 0], sizes = [1, 32], strides = [1, 1]} : vector<2x32xf32> to vector<1x32xf32>
    %c0_55 = arith.constant 0 : index
    %c8 = arith.constant 8 : index
    %c0_56 = arith.constant 0 : index
    %261 = vector.load %arg0[%c0_55, %c8, %c0_56] : memref<2x16x128xf32, #tpu.memory_space<vmem>>, vector<2x1x128xf32>
    %262 = vector.shape_cast %261 : vector<2x1x128xf32> to vector<2x128xf32>
    %cst_57 = arith.constant dense<0.000000e+00> : vector<2x128xf32>
    %263 = tpu.matmul %259, %0, %cst_57 {dimension_numbers = #tpu.dot_dimension_numbers<[1], [0], [0], [1], [0, 0, 1, 1], [], []>} : vector<2x32xf32>, vector<32x128xf32>, vector<2x128xf32> -> vector<2x128xf32>
    %264 = vector.broadcast %1 : vector<1x128xf32> to vector<2x128xf32>
    %265 = arith.addf %263, %264 : vector<2x128xf32>
    %266 = vector.extract_strided_slice %262 {offsets = [0, 0], sizes = [2, 32], strides = [1, 1]} : vector<2x128xf32> to vector<2x32xf32>
    %267 = vector.extract_strided_slice %265 {offsets = [0, 0], sizes = [2, 32], strides = [1, 1]} : vector<2x128xf32> to vector<2x32xf32>
    %268 = arith.addf %266, %267 : vector<2x32xf32>
    %269 = arith.negf %268 : vector<2x32xf32>
    %270 = math.exp %269 : vector<2x32xf32>
    %cst_58 = arith.constant 1.000000e+00 : f32
    %271 = vector.broadcast %cst_58 : f32 to vector<2x32xf32>
    %272 = arith.addf %271, %270 : vector<2x32xf32>
    %273 = arith.divf %271, %272 : vector<2x32xf32>
    %274 = vector.extract_strided_slice %262 {offsets = [0, 32], sizes = [2, 32], strides = [1, 1]} : vector<2x128xf32> to vector<2x32xf32>
    %275 = vector.extract_strided_slice %265 {offsets = [0, 32], sizes = [2, 32], strides = [1, 1]} : vector<2x128xf32> to vector<2x32xf32>
    %276 = arith.addf %274, %275 : vector<2x32xf32>
    %277 = arith.negf %276 : vector<2x32xf32>
    %278 = math.exp %277 : vector<2x32xf32>
    %cst_59 = arith.constant 1.000000e+00 : f32
    %279 = vector.broadcast %cst_59 : f32 to vector<2x32xf32>
    %280 = arith.addf %279, %278 : vector<2x32xf32>
    %281 = arith.divf %279, %280 : vector<2x32xf32>
    %282 = vector.extract_strided_slice %262 {offsets = [0, 64], sizes = [2, 32], strides = [1, 1]} : vector<2x128xf32> to vector<2x32xf32>
    %283 = vector.extract_strided_slice %265 {offsets = [0, 64], sizes = [2, 32], strides = [1, 1]} : vector<2x128xf32> to vector<2x32xf32>
    %284 = arith.mulf %273, %283 : vector<2x32xf32>
    %285 = arith.addf %282, %284 : vector<2x32xf32>
    %286 = math.tanh %285 : vector<2x32xf32>
    %cst_60 = arith.constant 1.000000e+00 : f32
    %287 = vector.broadcast %cst_60 : f32 to vector<2x32xf32>
    %288 = arith.subf %287, %281 : vector<2x32xf32>
    %289 = arith.mulf %288, %286 : vector<2x32xf32>
    %290 = arith.mulf %281, %259 : vector<2x32xf32>
    %291 = arith.addf %289, %290 : vector<2x32xf32>
    %292 = vector.extract_strided_slice %291 {offsets = [0, 0], sizes = [1, 32], strides = [1, 1]} : vector<2x32xf32> to vector<1x32xf32>
    %c0_61 = arith.constant 0 : index
    %c9 = arith.constant 9 : index
    %c0_62 = arith.constant 0 : index
    %293 = vector.load %arg0[%c0_61, %c9, %c0_62] : memref<2x16x128xf32, #tpu.memory_space<vmem>>, vector<2x1x128xf32>
    %294 = vector.shape_cast %293 : vector<2x1x128xf32> to vector<2x128xf32>
    %cst_63 = arith.constant dense<0.000000e+00> : vector<2x128xf32>
    %295 = tpu.matmul %291, %0, %cst_63 {dimension_numbers = #tpu.dot_dimension_numbers<[1], [0], [0], [1], [0, 0, 1, 1], [], []>} : vector<2x32xf32>, vector<32x128xf32>, vector<2x128xf32> -> vector<2x128xf32>
    %296 = vector.broadcast %1 : vector<1x128xf32> to vector<2x128xf32>
    %297 = arith.addf %295, %296 : vector<2x128xf32>
    %298 = vector.extract_strided_slice %294 {offsets = [0, 0], sizes = [2, 32], strides = [1, 1]} : vector<2x128xf32> to vector<2x32xf32>
    %299 = vector.extract_strided_slice %297 {offsets = [0, 0], sizes = [2, 32], strides = [1, 1]} : vector<2x128xf32> to vector<2x32xf32>
    %300 = arith.addf %298, %299 : vector<2x32xf32>
    %301 = arith.negf %300 : vector<2x32xf32>
    %302 = math.exp %301 : vector<2x32xf32>
    %cst_64 = arith.constant 1.000000e+00 : f32
    %303 = vector.broadcast %cst_64 : f32 to vector<2x32xf32>
    %304 = arith.addf %303, %302 : vector<2x32xf32>
    %305 = arith.divf %303, %304 : vector<2x32xf32>
    %306 = vector.extract_strided_slice %294 {offsets = [0, 32], sizes = [2, 32], strides = [1, 1]} : vector<2x128xf32> to vector<2x32xf32>
    %307 = vector.extract_strided_slice %297 {offsets = [0, 32], sizes = [2, 32], strides = [1, 1]} : vector<2x128xf32> to vector<2x32xf32>
    %308 = arith.addf %306, %307 : vector<2x32xf32>
    %309 = arith.negf %308 : vector<2x32xf32>
    %310 = math.exp %309 : vector<2x32xf32>
    %cst_65 = arith.constant 1.000000e+00 : f32
    %311 = vector.broadcast %cst_65 : f32 to vector<2x32xf32>
    %312 = arith.addf %311, %310 : vector<2x32xf32>
    %313 = arith.divf %311, %312 : vector<2x32xf32>
    %314 = vector.extract_strided_slice %294 {offsets = [0, 64], sizes = [2, 32], strides = [1, 1]} : vector<2x128xf32> to vector<2x32xf32>
    %315 = vector.extract_strided_slice %297 {offsets = [0, 64], sizes = [2, 32], strides = [1, 1]} : vector<2x128xf32> to vector<2x32xf32>
    %316 = arith.mulf %305, %315 : vector<2x32xf32>
    %317 = arith.addf %314, %316 : vector<2x32xf32>
    %318 = math.tanh %317 : vector<2x32xf32>
    %cst_66 = arith.constant 1.000000e+00 : f32
    %319 = vector.broadcast %cst_66 : f32 to vector<2x32xf32>
    %320 = arith.subf %319, %313 : vector<2x32xf32>
    %321 = arith.mulf %320, %318 : vector<2x32xf32>
    %322 = arith.mulf %313, %291 : vector<2x32xf32>
    %323 = arith.addf %321, %322 : vector<2x32xf32>
    %324 = vector.extract_strided_slice %323 {offsets = [0, 0], sizes = [1, 32], strides = [1, 1]} : vector<2x32xf32> to vector<1x32xf32>
    %c0_67 = arith.constant 0 : index
    %c10 = arith.constant 10 : index
    %c0_68 = arith.constant 0 : index
    %325 = vector.load %arg0[%c0_67, %c10, %c0_68] : memref<2x16x128xf32, #tpu.memory_space<vmem>>, vector<2x1x128xf32>
    %326 = vector.shape_cast %325 : vector<2x1x128xf32> to vector<2x128xf32>
    %cst_69 = arith.constant dense<0.000000e+00> : vector<2x128xf32>
    %327 = tpu.matmul %323, %0, %cst_69 {dimension_numbers = #tpu.dot_dimension_numbers<[1], [0], [0], [1], [0, 0, 1, 1], [], []>} : vector<2x32xf32>, vector<32x128xf32>, vector<2x128xf32> -> vector<2x128xf32>
    %328 = vector.broadcast %1 : vector<1x128xf32> to vector<2x128xf32>
    %329 = arith.addf %327, %328 : vector<2x128xf32>
    %330 = vector.extract_strided_slice %326 {offsets = [0, 0], sizes = [2, 32], strides = [1, 1]} : vector<2x128xf32> to vector<2x32xf32>
    %331 = vector.extract_strided_slice %329 {offsets = [0, 0], sizes = [2, 32], strides = [1, 1]} : vector<2x128xf32> to vector<2x32xf32>
    %332 = arith.addf %330, %331 : vector<2x32xf32>
    %333 = arith.negf %332 : vector<2x32xf32>
    %334 = math.exp %333 : vector<2x32xf32>
    %cst_70 = arith.constant 1.000000e+00 : f32
    %335 = vector.broadcast %cst_70 : f32 to vector<2x32xf32>
    %336 = arith.addf %335, %334 : vector<2x32xf32>
    %337 = arith.divf %335, %336 : vector<2x32xf32>
    %338 = vector.extract_strided_slice %326 {offsets = [0, 32], sizes = [2, 32], strides = [1, 1]} : vector<2x128xf32> to vector<2x32xf32>
    %339 = vector.extract_strided_slice %329 {offsets = [0, 32], sizes = [2, 32], strides = [1, 1]} : vector<2x128xf32> to vector<2x32xf32>
    %340 = arith.addf %338, %339 : vector<2x32xf32>
    %341 = arith.negf %340 : vector<2x32xf32>
    %342 = math.exp %341 : vector<2x32xf32>
    %cst_71 = arith.constant 1.000000e+00 : f32
    %343 = vector.broadcast %cst_71 : f32 to vector<2x32xf32>
    %344 = arith.addf %343, %342 : vector<2x32xf32>
    %345 = arith.divf %343, %344 : vector<2x32xf32>
    %346 = vector.extract_strided_slice %326 {offsets = [0, 64], sizes = [2, 32], strides = [1, 1]} : vector<2x128xf32> to vector<2x32xf32>
    %347 = vector.extract_strided_slice %329 {offsets = [0, 64], sizes = [2, 32], strides = [1, 1]} : vector<2x128xf32> to vector<2x32xf32>
    %348 = arith.mulf %337, %347 : vector<2x32xf32>
    %349 = arith.addf %346, %348 : vector<2x32xf32>
    %350 = math.tanh %349 : vector<2x32xf32>
    %cst_72 = arith.constant 1.000000e+00 : f32
    %351 = vector.broadcast %cst_72 : f32 to vector<2x32xf32>
    %352 = arith.subf %351, %345 : vector<2x32xf32>
    %353 = arith.mulf %352, %350 : vector<2x32xf32>
    %354 = arith.mulf %345, %323 : vector<2x32xf32>
    %355 = arith.addf %353, %354 : vector<2x32xf32>
    %356 = vector.extract_strided_slice %355 {offsets = [0, 0], sizes = [1, 32], strides = [1, 1]} : vector<2x32xf32> to vector<1x32xf32>
    %c0_73 = arith.constant 0 : index
    %c11 = arith.constant 11 : index
    %c0_74 = arith.constant 0 : index
    %357 = vector.load %arg0[%c0_73, %c11, %c0_74] : memref<2x16x128xf32, #tpu.memory_space<vmem>>, vector<2x1x128xf32>
    %358 = vector.shape_cast %357 : vector<2x1x128xf32> to vector<2x128xf32>
    %cst_75 = arith.constant dense<0.000000e+00> : vector<2x128xf32>
    %359 = tpu.matmul %355, %0, %cst_75 {dimension_numbers = #tpu.dot_dimension_numbers<[1], [0], [0], [1], [0, 0, 1, 1], [], []>} : vector<2x32xf32>, vector<32x128xf32>, vector<2x128xf32> -> vector<2x128xf32>
    %360 = vector.broadcast %1 : vector<1x128xf32> to vector<2x128xf32>
    %361 = arith.addf %359, %360 : vector<2x128xf32>
    %362 = vector.extract_strided_slice %358 {offsets = [0, 0], sizes = [2, 32], strides = [1, 1]} : vector<2x128xf32> to vector<2x32xf32>
    %363 = vector.extract_strided_slice %361 {offsets = [0, 0], sizes = [2, 32], strides = [1, 1]} : vector<2x128xf32> to vector<2x32xf32>
    %364 = arith.addf %362, %363 : vector<2x32xf32>
    %365 = arith.negf %364 : vector<2x32xf32>
    %366 = math.exp %365 : vector<2x32xf32>
    %cst_76 = arith.constant 1.000000e+00 : f32
    %367 = vector.broadcast %cst_76 : f32 to vector<2x32xf32>
    %368 = arith.addf %367, %366 : vector<2x32xf32>
    %369 = arith.divf %367, %368 : vector<2x32xf32>
    %370 = vector.extract_strided_slice %358 {offsets = [0, 32], sizes = [2, 32], strides = [1, 1]} : vector<2x128xf32> to vector<2x32xf32>
    %371 = vector.extract_strided_slice %361 {offsets = [0, 32], sizes = [2, 32], strides = [1, 1]} : vector<2x128xf32> to vector<2x32xf32>
    %372 = arith.addf %370, %371 : vector<2x32xf32>
    %373 = arith.negf %372 : vector<2x32xf32>
    %374 = math.exp %373 : vector<2x32xf32>
    %cst_77 = arith.constant 1.000000e+00 : f32
    %375 = vector.broadcast %cst_77 : f32 to vector<2x32xf32>
    %376 = arith.addf %375, %374 : vector<2x32xf32>
    %377 = arith.divf %375, %376 : vector<2x32xf32>
    %378 = vector.extract_strided_slice %358 {offsets = [0, 64], sizes = [2, 32], strides = [1, 1]} : vector<2x128xf32> to vector<2x32xf32>
    %379 = vector.extract_strided_slice %361 {offsets = [0, 64], sizes = [2, 32], strides = [1, 1]} : vector<2x128xf32> to vector<2x32xf32>
    %380 = arith.mulf %369, %379 : vector<2x32xf32>
    %381 = arith.addf %378, %380 : vector<2x32xf32>
    %382 = math.tanh %381 : vector<2x32xf32>
    %cst_78 = arith.constant 1.000000e+00 : f32
    %383 = vector.broadcast %cst_78 : f32 to vector<2x32xf32>
    %384 = arith.subf %383, %377 : vector<2x32xf32>
    %385 = arith.mulf %384, %382 : vector<2x32xf32>
    %386 = arith.mulf %377, %355 : vector<2x32xf32>
    %387 = arith.addf %385, %386 : vector<2x32xf32>
    %388 = vector.extract_strided_slice %387 {offsets = [0, 0], sizes = [1, 32], strides = [1, 1]} : vector<2x32xf32> to vector<1x32xf32>
    %c0_79 = arith.constant 0 : index
    %c12 = arith.constant 12 : index
    %c0_80 = arith.constant 0 : index
    %389 = vector.load %arg0[%c0_79, %c12, %c0_80] : memref<2x16x128xf32, #tpu.memory_space<vmem>>, vector<2x1x128xf32>
    %390 = vector.shape_cast %389 : vector<2x1x128xf32> to vector<2x128xf32>
    %cst_81 = arith.constant dense<0.000000e+00> : vector<2x128xf32>
    %391 = tpu.matmul %387, %0, %cst_81 {dimension_numbers = #tpu.dot_dimension_numbers<[1], [0], [0], [1], [0, 0, 1, 1], [], []>} : vector<2x32xf32>, vector<32x128xf32>, vector<2x128xf32> -> vector<2x128xf32>
    %392 = vector.broadcast %1 : vector<1x128xf32> to vector<2x128xf32>
    %393 = arith.addf %391, %392 : vector<2x128xf32>
    %394 = vector.extract_strided_slice %390 {offsets = [0, 0], sizes = [2, 32], strides = [1, 1]} : vector<2x128xf32> to vector<2x32xf32>
    %395 = vector.extract_strided_slice %393 {offsets = [0, 0], sizes = [2, 32], strides = [1, 1]} : vector<2x128xf32> to vector<2x32xf32>
    %396 = arith.addf %394, %395 : vector<2x32xf32>
    %397 = arith.negf %396 : vector<2x32xf32>
    %398 = math.exp %397 : vector<2x32xf32>
    %cst_82 = arith.constant 1.000000e+00 : f32
    %399 = vector.broadcast %cst_82 : f32 to vector<2x32xf32>
    %400 = arith.addf %399, %398 : vector<2x32xf32>
    %401 = arith.divf %399, %400 : vector<2x32xf32>
    %402 = vector.extract_strided_slice %390 {offsets = [0, 32], sizes = [2, 32], strides = [1, 1]} : vector<2x128xf32> to vector<2x32xf32>
    %403 = vector.extract_strided_slice %393 {offsets = [0, 32], sizes = [2, 32], strides = [1, 1]} : vector<2x128xf32> to vector<2x32xf32>
    %404 = arith.addf %402, %403 : vector<2x32xf32>
    %405 = arith.negf %404 : vector<2x32xf32>
    %406 = math.exp %405 : vector<2x32xf32>
    %cst_83 = arith.constant 1.000000e+00 : f32
    %407 = vector.broadcast %cst_83 : f32 to vector<2x32xf32>
    %408 = arith.addf %407, %406 : vector<2x32xf32>
    %409 = arith.divf %407, %408 : vector<2x32xf32>
    %410 = vector.extract_strided_slice %390 {offsets = [0, 64], sizes = [2, 32], strides = [1, 1]} : vector<2x128xf32> to vector<2x32xf32>
    %411 = vector.extract_strided_slice %393 {offsets = [0, 64], sizes = [2, 32], strides = [1, 1]} : vector<2x128xf32> to vector<2x32xf32>
    %412 = arith.mulf %401, %411 : vector<2x32xf32>
    %413 = arith.addf %410, %412 : vector<2x32xf32>
    %414 = math.tanh %413 : vector<2x32xf32>
    %cst_84 = arith.constant 1.000000e+00 : f32
    %415 = vector.broadcast %cst_84 : f32 to vector<2x32xf32>
    %416 = arith.subf %415, %409 : vector<2x32xf32>
    %417 = arith.mulf %416, %414 : vector<2x32xf32>
    %418 = arith.mulf %409, %387 : vector<2x32xf32>
    %419 = arith.addf %417, %418 : vector<2x32xf32>
    %420 = vector.extract_strided_slice %419 {offsets = [0, 0], sizes = [1, 32], strides = [1, 1]} : vector<2x32xf32> to vector<1x32xf32>
    %c0_85 = arith.constant 0 : index
    %c13 = arith.constant 13 : index
    %c0_86 = arith.constant 0 : index
    %421 = vector.load %arg0[%c0_85, %c13, %c0_86] : memref<2x16x128xf32, #tpu.memory_space<vmem>>, vector<2x1x128xf32>
    %422 = vector.shape_cast %421 : vector<2x1x128xf32> to vector<2x128xf32>
    %cst_87 = arith.constant dense<0.000000e+00> : vector<2x128xf32>
    %423 = tpu.matmul %419, %0, %cst_87 {dimension_numbers = #tpu.dot_dimension_numbers<[1], [0], [0], [1], [0, 0, 1, 1], [], []>} : vector<2x32xf32>, vector<32x128xf32>, vector<2x128xf32> -> vector<2x128xf32>
    %424 = vector.broadcast %1 : vector<1x128xf32> to vector<2x128xf32>
    %425 = arith.addf %423, %424 : vector<2x128xf32>
    %426 = vector.extract_strided_slice %422 {offsets = [0, 0], sizes = [2, 32], strides = [1, 1]} : vector<2x128xf32> to vector<2x32xf32>
    %427 = vector.extract_strided_slice %425 {offsets = [0, 0], sizes = [2, 32], strides = [1, 1]} : vector<2x128xf32> to vector<2x32xf32>
    %428 = arith.addf %426, %427 : vector<2x32xf32>
    %429 = arith.negf %428 : vector<2x32xf32>
    %430 = math.exp %429 : vector<2x32xf32>
    %cst_88 = arith.constant 1.000000e+00 : f32
    %431 = vector.broadcast %cst_88 : f32 to vector<2x32xf32>
    %432 = arith.addf %431, %430 : vector<2x32xf32>
    %433 = arith.divf %431, %432 : vector<2x32xf32>
    %434 = vector.extract_strided_slice %422 {offsets = [0, 32], sizes = [2, 32], strides = [1, 1]} : vector<2x128xf32> to vector<2x32xf32>
    %435 = vector.extract_strided_slice %425 {offsets = [0, 32], sizes = [2, 32], strides = [1, 1]} : vector<2x128xf32> to vector<2x32xf32>
    %436 = arith.addf %434, %435 : vector<2x32xf32>
    %437 = arith.negf %436 : vector<2x32xf32>
    %438 = math.exp %437 : vector<2x32xf32>
    %cst_89 = arith.constant 1.000000e+00 : f32
    %439 = vector.broadcast %cst_89 : f32 to vector<2x32xf32>
    %440 = arith.addf %439, %438 : vector<2x32xf32>
    %441 = arith.divf %439, %440 : vector<2x32xf32>
    %442 = vector.extract_strided_slice %422 {offsets = [0, 64], sizes = [2, 32], strides = [1, 1]} : vector<2x128xf32> to vector<2x32xf32>
    %443 = vector.extract_strided_slice %425 {offsets = [0, 64], sizes = [2, 32], strides = [1, 1]} : vector<2x128xf32> to vector<2x32xf32>
    %444 = arith.mulf %433, %443 : vector<2x32xf32>
    %445 = arith.addf %442, %444 : vector<2x32xf32>
    %446 = math.tanh %445 : vector<2x32xf32>
    %cst_90 = arith.constant 1.000000e+00 : f32
    %447 = vector.broadcast %cst_90 : f32 to vector<2x32xf32>
    %448 = arith.subf %447, %441 : vector<2x32xf32>
    %449 = arith.mulf %448, %446 : vector<2x32xf32>
    %450 = arith.mulf %441, %419 : vector<2x32xf32>
    %451 = arith.addf %449, %450 : vector<2x32xf32>
    %452 = vector.extract_strided_slice %451 {offsets = [0, 0], sizes = [1, 32], strides = [1, 1]} : vector<2x32xf32> to vector<1x32xf32>
    %c0_91 = arith.constant 0 : index
    %c14 = arith.constant 14 : index
    %c0_92 = arith.constant 0 : index
    %453 = vector.load %arg0[%c0_91, %c14, %c0_92] : memref<2x16x128xf32, #tpu.memory_space<vmem>>, vector<2x1x128xf32>
    %454 = vector.shape_cast %453 : vector<2x1x128xf32> to vector<2x128xf32>
    %cst_93 = arith.constant dense<0.000000e+00> : vector<2x128xf32>
    %455 = tpu.matmul %451, %0, %cst_93 {dimension_numbers = #tpu.dot_dimension_numbers<[1], [0], [0], [1], [0, 0, 1, 1], [], []>} : vector<2x32xf32>, vector<32x128xf32>, vector<2x128xf32> -> vector<2x128xf32>
    %456 = vector.broadcast %1 : vector<1x128xf32> to vector<2x128xf32>
    %457 = arith.addf %455, %456 : vector<2x128xf32>
    %458 = vector.extract_strided_slice %454 {offsets = [0, 0], sizes = [2, 32], strides = [1, 1]} : vector<2x128xf32> to vector<2x32xf32>
    %459 = vector.extract_strided_slice %457 {offsets = [0, 0], sizes = [2, 32], strides = [1, 1]} : vector<2x128xf32> to vector<2x32xf32>
    %460 = arith.addf %458, %459 : vector<2x32xf32>
    %461 = arith.negf %460 : vector<2x32xf32>
    %462 = math.exp %461 : vector<2x32xf32>
    %cst_94 = arith.constant 1.000000e+00 : f32
    %463 = vector.broadcast %cst_94 : f32 to vector<2x32xf32>
    %464 = arith.addf %463, %462 : vector<2x32xf32>
    %465 = arith.divf %463, %464 : vector<2x32xf32>
    %466 = vector.extract_strided_slice %454 {offsets = [0, 32], sizes = [2, 32], strides = [1, 1]} : vector<2x128xf32> to vector<2x32xf32>
    %467 = vector.extract_strided_slice %457 {offsets = [0, 32], sizes = [2, 32], strides = [1, 1]} : vector<2x128xf32> to vector<2x32xf32>
    %468 = arith.addf %466, %467 : vector<2x32xf32>
    %469 = arith.negf %468 : vector<2x32xf32>
    %470 = math.exp %469 : vector<2x32xf32>
    %cst_95 = arith.constant 1.000000e+00 : f32
    %471 = vector.broadcast %cst_95 : f32 to vector<2x32xf32>
    %472 = arith.addf %471, %470 : vector<2x32xf32>
    %473 = arith.divf %471, %472 : vector<2x32xf32>
    %474 = vector.extract_strided_slice %454 {offsets = [0, 64], sizes = [2, 32], strides = [1, 1]} : vector<2x128xf32> to vector<2x32xf32>
    %475 = vector.extract_strided_slice %457 {offsets = [0, 64], sizes = [2, 32], strides = [1, 1]} : vector<2x128xf32> to vector<2x32xf32>
    %476 = arith.mulf %465, %475 : vector<2x32xf32>
    %477 = arith.addf %474, %476 : vector<2x32xf32>
    %478 = math.tanh %477 : vector<2x32xf32>
    %cst_96 = arith.constant 1.000000e+00 : f32
    %479 = vector.broadcast %cst_96 : f32 to vector<2x32xf32>
    %480 = arith.subf %479, %473 : vector<2x32xf32>
    %481 = arith.mulf %480, %478 : vector<2x32xf32>
    %482 = arith.mulf %473, %451 : vector<2x32xf32>
    %483 = arith.addf %481, %482 : vector<2x32xf32>
    %484 = vector.extract_strided_slice %483 {offsets = [0, 0], sizes = [1, 32], strides = [1, 1]} : vector<2x32xf32> to vector<1x32xf32>
    %c0_97 = arith.constant 0 : index
    %c15 = arith.constant 15 : index
    %c0_98 = arith.constant 0 : index
    %485 = vector.load %arg0[%c0_97, %c15, %c0_98] : memref<2x16x128xf32, #tpu.memory_space<vmem>>, vector<2x1x128xf32>
    %486 = vector.shape_cast %485 : vector<2x1x128xf32> to vector<2x128xf32>
    %cst_99 = arith.constant dense<0.000000e+00> : vector<2x128xf32>
    %487 = tpu.matmul %483, %0, %cst_99 {dimension_numbers = #tpu.dot_dimension_numbers<[1], [0], [0], [1], [0, 0, 1, 1], [], []>} : vector<2x32xf32>, vector<32x128xf32>, vector<2x128xf32> -> vector<2x128xf32>
    %488 = vector.broadcast %1 : vector<1x128xf32> to vector<2x128xf32>
    %489 = arith.addf %487, %488 : vector<2x128xf32>
    %490 = vector.extract_strided_slice %486 {offsets = [0, 0], sizes = [2, 32], strides = [1, 1]} : vector<2x128xf32> to vector<2x32xf32>
    %491 = vector.extract_strided_slice %489 {offsets = [0, 0], sizes = [2, 32], strides = [1, 1]} : vector<2x128xf32> to vector<2x32xf32>
    %492 = arith.addf %490, %491 : vector<2x32xf32>
    %493 = arith.negf %492 : vector<2x32xf32>
    %494 = math.exp %493 : vector<2x32xf32>
    %cst_100 = arith.constant 1.000000e+00 : f32
    %495 = vector.broadcast %cst_100 : f32 to vector<2x32xf32>
    %496 = arith.addf %495, %494 : vector<2x32xf32>
    %497 = arith.divf %495, %496 : vector<2x32xf32>
    %498 = vector.extract_strided_slice %486 {offsets = [0, 32], sizes = [2, 32], strides = [1, 1]} : vector<2x128xf32> to vector<2x32xf32>
    %499 = vector.extract_strided_slice %489 {offsets = [0, 32], sizes = [2, 32], strides = [1, 1]} : vector<2x128xf32> to vector<2x32xf32>
    %500 = arith.addf %498, %499 : vector<2x32xf32>
    %501 = arith.negf %500 : vector<2x32xf32>
    %502 = math.exp %501 : vector<2x32xf32>
    %cst_101 = arith.constant 1.000000e+00 : f32
    %503 = vector.broadcast %cst_101 : f32 to vector<2x32xf32>
    %504 = arith.addf %503, %502 : vector<2x32xf32>
    %505 = arith.divf %503, %504 : vector<2x32xf32>
    %506 = vector.extract_strided_slice %486 {offsets = [0, 64], sizes = [2, 32], strides = [1, 1]} : vector<2x128xf32> to vector<2x32xf32>
    %507 = vector.extract_strided_slice %489 {offsets = [0, 64], sizes = [2, 32], strides = [1, 1]} : vector<2x128xf32> to vector<2x32xf32>
    %508 = arith.mulf %497, %507 : vector<2x32xf32>
    %509 = arith.addf %506, %508 : vector<2x32xf32>
    %510 = math.tanh %509 : vector<2x32xf32>
    %cst_102 = arith.constant 1.000000e+00 : f32
    %511 = vector.broadcast %cst_102 : f32 to vector<2x32xf32>
    %512 = arith.subf %511, %505 : vector<2x32xf32>
    %513 = arith.mulf %512, %510 : vector<2x32xf32>
    %514 = arith.mulf %505, %483 : vector<2x32xf32>
    %515 = arith.addf %513, %514 : vector<2x32xf32>
    %516 = vector.extract_strided_slice %515 {offsets = [0, 0], sizes = [1, 32], strides = [1, 1]} : vector<2x32xf32> to vector<1x32xf32>
    %517 = tpu.concatenate %36, %68, %100, %132, %164, %196, %228, %260, %292, %324, %356, %388, %420, %452, %484, %516 in 0 : vector<1x32xf32>, vector<1x32xf32>, vector<1x32xf32>, vector<1x32xf32>, vector<1x32xf32>, vector<1x32xf32>, vector<1x32xf32>, vector<1x32xf32>, vector<1x32xf32>, vector<1x32xf32>, vector<1x32xf32>, vector<1x32xf32>, vector<1x32xf32>, vector<1x32xf32>, vector<1x32xf32>, vector<1x32xf32> -> vector<16x32xf32>
    %518 = vector.broadcast %2 : vector<1x32xf32> to vector<16x32xf32>
    %519 = arith.mulf %517, %518 : vector<16x32xf32>
    %cst_103 = arith.constant dense<0.000000e+00> : vector<16xf32>
    %520 = vector.multi_reduction <add>, %519, %cst_103 [1] : vector<16x32xf32> to vector<16xf32>
    %521 = vector.shape_cast %520 : vector<16xf32> to vector<16x1xf32>
    %522 = vector.broadcast %3 : f32 to vector<16x1xf32>
    %523 = arith.addf %521, %522 : vector<16x1xf32>
    %524 = tpu.iota {dimensions = array<i32: 0>} : vector<16x16xi32>
    %525 = tpu.iota {dimensions = array<i32: 1>} : vector<16x16xi32>
    %cst_104 = arith.constant 0.000000e+00 : f32
    %526 = vector.broadcast %cst_104 : f32 to vector<16x1xf32>
    %527 = arith.subf %526, %523 : vector<16x1xf32>
    %528 = math.exp %527 : vector<16x1xf32>
    %529 = vector.shape_cast %523 : vector<16x1xf32> to vector<16x1xf32>
    %530 = vector.broadcast %529 : vector<16x1xf32> to vector<16x16xf32>
    %531 = vector.shape_cast %528 : vector<16x1xf32> to vector<16x1xf32>
    %532 = vector.broadcast %531 : vector<16x1xf32> to vector<16x16xf32>
    %533 = arith.mulf %523, %528 : vector<16x1xf32>
    %534 = vector.shape_cast %533 : vector<16x1xf32> to vector<16x1xf32>
    %535 = vector.broadcast %534 : vector<16x1xf32> to vector<16x16xf32>
    %536 = arith.cmpi sle, %524, %525 : vector<16x16xi32>
    %c11_i32 = arith.constant 11 : i32
    %537 = vector.broadcast %c11_i32 : i32 to vector<16x16xi32>
    %538 = arith.subi %525, %537 : vector<16x16xi32>
    %539 = arith.cmpi sge, %524, %538 : vector<16x16xi32>
    %540 = arith.andi %536, %539 : vector<16x16xi1>
    %cst_105 = arith.constant 0x7F800000 : f32
    %541 = vector.broadcast %cst_105 : f32 to vector<16x16xf32>
    %542 = arith.select %540, %530, %541 : vector<16x16xi1>, vector<16x16xf32>
    %cst_106 = arith.constant dense<0x7F800000> : vector<16xf32>
    %543 = vector.multi_reduction <minimumf>, %542, %cst_106 [0] : vector<16x16xf32> to vector<16xf32>
    %544 = vector.shape_cast %543 : vector<16xf32> to vector<1x16xf32>
    %545 = arith.cmpi sge, %524, %525 : vector<16x16xi32>
    %c11_i32_107 = arith.constant 11 : i32
    %546 = vector.broadcast %c11_i32_107 : i32 to vector<16x16xi32>
    %547 = arith.addi %525, %546 : vector<16x16xi32>
    %548 = arith.cmpi sle, %524, %547 : vector<16x16xi32>
    %549 = arith.andi %545, %548 : vector<16x16xi1>
    %cst_108 = arith.constant 0.000000e+00 : f32
    %550 = vector.broadcast %cst_108 : f32 to vector<16x16xf32>
    %551 = arith.select %549, %535, %550 : vector<16x16xi1>, vector<16x16xf32>
    %cst_109 = arith.constant dense<0.000000e+00> : vector<16xf32>
    %552 = vector.multi_reduction <add>, %551, %cst_109 [0] : vector<16x16xf32> to vector<16xf32>
    %553 = vector.shape_cast %552 : vector<16xf32> to vector<1x16xf32>
    %cst_110 = arith.constant 0.000000e+00 : f32
    %554 = vector.broadcast %cst_110 : f32 to vector<16x16xf32>
    %555 = arith.select %549, %532, %554 : vector<16x16xi1>, vector<16x16xf32>
    %cst_111 = arith.constant dense<0.000000e+00> : vector<16xf32>
    %556 = vector.multi_reduction <add>, %555, %cst_111 [0] : vector<16x16xf32> to vector<16xf32>
    %557 = vector.shape_cast %556 : vector<16xf32> to vector<1x16xf32>
    %558 = arith.divf %553, %557 : vector<1x16xf32>
    %cst_112 = arith.constant 5.000000e-01 : f32
    %559 = vector.broadcast %cst_112 : f32 to vector<1x16xf32>
    %560 = arith.mulf %559, %558 : vector<1x16xf32>
    %cst_113 = arith.constant 5.000000e-01 : f32
    %561 = vector.broadcast %cst_113 : f32 to vector<1x16xf32>
    %562 = arith.mulf %561, %544 : vector<1x16xf32>
    %563 = arith.addf %560, %562 : vector<1x16xf32>
    %cst_114 = arith.constant dense<0.000000e+00> : vector<1xf32>
    %564 = vector.multi_reduction <add>, %563, %cst_114 [1] : vector<1x16xf32> to vector<1xf32>
    %565 = vector.shape_cast %564 : vector<1xf32> to vector<1x1xf32>
    %cst_115 = arith.constant 6.250000e-02 : f32
    %566 = vector.broadcast %cst_115 : f32 to vector<1x1xf32>
    %567 = arith.mulf %565, %566 : vector<1x1xf32>
    %568 = arith.negf %567 : vector<1x1xf32>
    %569 = math.exp %568 : vector<1x1xf32>
    %cst_116 = arith.constant 1.000000e+00 : f32
    %570 = vector.broadcast %cst_116 : f32 to vector<1x1xf32>
    %571 = arith.addf %570, %569 : vector<1x1xf32>
    %572 = arith.divf %570, %571 : vector<1x1xf32>
    %c0_117 = arith.constant 0 : index
    %573 = memref.load %arg5[%c0_117] : memref<4xf32, #tpu.memory_space<smem>>
    %c1_118 = arith.constant 1 : index
    %574 = memref.load %arg5[%c1_118] : memref<4xf32, #tpu.memory_space<smem>>
    %c2_119 = arith.constant 2 : index
    %575 = memref.load %arg5[%c2_119] : memref<4xf32, #tpu.memory_space<smem>>
    %c3_120 = arith.constant 3 : index
    %576 = memref.load %arg5[%c3_120] : memref<4xf32, #tpu.memory_space<smem>>
    %577 = vector.broadcast %573 : f32 to vector<1x1xf32>
    %578 = arith.mulf %577, %572 : vector<1x1xf32>
    %579 = vector.broadcast %574 : f32 to vector<1x1xf32>
    %580 = arith.addf %578, %579 : vector<1x1xf32>
    %581 = arith.negf %580 : vector<1x1xf32>
    %582 = math.exp %581 : vector<1x1xf32>
    %cst_121 = arith.constant 1.000000e+00 : f32
    %583 = vector.broadcast %cst_121 : f32 to vector<1x1xf32>
    %584 = arith.addf %583, %582 : vector<1x1xf32>
    %585 = arith.divf %583, %584 : vector<1x1xf32>
    %586 = vector.broadcast %575 : f32 to vector<1x1xf32>
    %587 = arith.mulf %586, %585 : vector<1x1xf32>
    %588 = vector.broadcast %576 : f32 to vector<1x1xf32>
    %589 = arith.addf %587, %588 : vector<1x1xf32>
    %c0_122 = arith.constant 0 : index
    %c0_123 = arith.constant 0 : index
    %590 = vector.load %arg6[%c0_122, %c0_123] : memref<1x1xf32, #tpu.memory_space<vmem>>, vector<1x1xf32>
    tpu.vector_store %arg6[%c0_122, %c0_123], %572 {strides = array<i32>} : memref<1x1xf32, #tpu.memory_space<vmem>>, vector<1x1xf32>,
    %c0_124 = arith.constant 0 : index
    %c0_125 = arith.constant 0 : index
    %591 = vector.load %arg7[%c0_124, %c0_125] : memref<1x1xf32, #tpu.memory_space<vmem>>, vector<1x1xf32>
    tpu.vector_store %arg7[%c0_124, %c0_125], %589 {strides = array<i32>} : memref<1x1xf32, #tpu.memory_space<vmem>>, vector<1x1xf32>,
    return
  }
}

</mosaic_0001>

<bundles_post_ra>
// kernel: vqa_forward.2
= control target key start
LH: loop header
LB: loop body
LE: loop exit
PB: predicated region body
PF: predicated region fallthrough
CT: control target
= control target key end

     0   :  { %s799_s18 = smov 0   ;;  %s1086_s0 = inlined_call_operand.vmem [shape: f32[2,16,512], index: 0, kind: input, shape index: {}]   ;;  %s1087_s1 = inlined_call_operand.vmem [shape: f32[512,128], index: 1, kind: input, shape index: {}]   ;;  %s1088_s2 = inlined_call_operand.vmem [shape: f32[1,128], index: 2, kind: input, shape index: {}]   ;;  %s1089_s3 = inlined_call_operand.vmem [shape: f32[128,128], index: 3, kind: input, shape index: {}]   ;;  %s1090_s4 = inlined_call_operand.vmem [shape: f32[1,128], index: 4, kind: input, shape index: {}]   ;;  %s1091_s5 = inlined_call_operand.vmem [shape: f32[2,16,128], index: 5, kind: output, shape index: {}]  }
   0x1 LB: > { %s609_s19 = sadd.s32 4294967295, %s767_s18   ;;  %p613_p0 = scmp.ge.s32.totalorder %s767_s18, 1  ;;  %s767_s18 = sphi %s799_s18, %s15_s18  }
   0x2   : > { %p187_p1 = scmp.lt.s32.totalorder %s767_s18, 3 }
   0x4   : > { %p188_p2 = pnand %p613_p0, %p187_p1 }
   0x5   : > { %p917_p3 = scmp.lt.s32.totalorder (!%p188_p2), %s609_s19, 1 }
   0x6   : > { %191 = sbr.rel (%p188_p2) target bundleno = 449 (0x1c1), region = 40 }
   0xb   : > { %v264_v0 = vld [vmem:[%s1087_s1 + $0xf8] sm:$0xff]  ;;  %v263_v4 = vld [vmem:[%s1087_s1 + $0xf0] sm:$0xff]  ;;  %v262_v8 = vld [vmem:[%s1087_s1 + $0xe8] sm:$0xff]  ;;  %s1094_s19 = smov (!%p917_p3, %s609_s19), 1 }
   0xc   : > { %v296_v1 = vld [vmem:[%s1087_s1 + $0x1f8] sm:$0xff]  ;;  %624 = vmatprep.subr.mxu0 %v264_v0  ;;  %v295_v5 = vld [vmem:[%s1087_s1 + $0x1f0] sm:$0xff]  ;;  %v294_v9 = vld [vmem:[%s1087_s1 + $0x1e8] sm:$0xff]  ;;  %s622_s8 = sshll.u32 %s1094_s19, 6  ;;  %s623_s26 = sshll.u32 %s1094_s19, 4 }
   0xd   : > { %v248_v2 = vld [vmem:[%s1087_s1 + $0x78] sm:$0xff]  ;;  %662 = vmatprep.subr.mxu1 %v296_v1  ;;  %v247_v6 = vld [vmem:[%s1087_s1 + $0x70] sm:$0xff]  ;;  %v246_v10 = vld [vmem:[%s1087_s1 + $0x68] sm:$0xff]  ;;  %s997_s25 = scalar_lea.vmem %s1086_s0, %s622_s8  ;;  %s224_s6 = scalar_lea.vmem %s1091_s5, %s623_s26 }
   0xe   : > { %v280_v3 = vld [vmem:[%s1087_s1 + $0x178] sm:$0xff]  ;;  %625 = vmatpush3.msra.mxu0 %v248_v2  ;;  %v279_v7 = vld [vmem:[%s1087_s1 + $0x170] sm:$0xff]  ;;  %v278_v11 = vld [vmem:[%s1087_s1 + $0x168] sm:$0xff] }
   0xf   : > { %663 = vmatpush3.msra.mxu1 %v280_v3  ;;  %626 = vmatprep.subr.mxu0 %v263_v4  ;;  %v261_v12 = vld [vmem:[%s1087_s1 + $0xe0] sm:$0xff]  ;;  %v260_v16 = vld [vmem:[%s1087_s1 + $0xd8] sm:$0xff]  ;;  %v259_v20 = vld [vmem:[%s1087_s1 + $0xd0] sm:$0xff] }
  0x10   : > { %664 = vmatprep.subr.mxu1 %v295_v5  ;;  %627 = vmatpush3.msra.mxu0 %v247_v6  ;;  %v293_v13 = vld [vmem:[%s1087_s1 + $0x1e0] sm:$0xff]  ;;  %v292_v17 = vld [vmem:[%s1087_s1 + $0x1d8] sm:$0xff]  ;;  %v291_v21 = vld [vmem:[%s1087_s1 + $0x1d0] sm:$0xff] }
  0x11   : > { %665 = vmatpush3.msra.mxu1 %v279_v7  ;;  %628 = vmatprep.subr.mxu0 %v262_v8  ;;  %v245_v14 = vld [vmem:[%s1087_s1 + $0x60] sm:$0xff]  ;;  %v244_v18 = vld [vmem:[%s1087_s1 + $0x58] sm:$0xff]  ;;  %v243_v22 = vld [vmem:[%s1087_s1 + $0x50] sm:$0xff] }
  0x12   : > { %666 = vmatprep.subr.mxu1 %v294_v9  ;;  %v277_v15 = vld [vmem:[%s1087_s1 + $0x160] sm:$0xff]  ;;  %629 = vmatpush3.msra.mxu0 %v246_v10  ;;  %v276_v19 = vld [vmem:[%s1087_s1 + $0x158] sm:$0xff]  ;;  %v275_v23 = vld [vmem:[%s1087_s1 + $0x150] sm:$0xff] }
  0x13   : > { %667 = vmatpush3.msra.mxu1 %v278_v11  ;;  %630 = vmatprep.subr.mxu0 %v261_v12  ;;  %v258_v24 = vld [vmem:[%s1087_s1 + $0xc8] sm:$0xff]  ;;  %v257_v28 = vld [vmem:[%s1087_s1 + $0xc0] sm:$0xff]  ;;  %v256_v32 = vld [vmem:[%s1087_s1 + $0xb8] sm:$0xff] }
  0x14   : > { %668 = vmatprep.subr.mxu1 %v293_v13  ;;  %631 = vmatpush3.msra.mxu0 %v245_v14  ;;  %v290_v25 = vld [vmem:[%s1087_s1 + $0x1c8] sm:$0xff]  ;;  %v289_v29 = vld [vmem:[%s1087_s1 + $0x1c0] sm:$0xff]  ;;  %v288_v33 = vld [vmem:[%s1087_s1 + $0x1b8] sm:$0xff] }
  0x15   : > { %669 = vmatpush3.msra.mxu1 %v277_v15  ;;  %632 = vmatprep.subr.mxu0 %v260_v16  ;;  %v242_v26 = vld [vmem:[%s1087_s1 + $0x48] sm:$0xff]  ;;  %v241_v30 = vld [vmem:[%s1087_s1 + $0x40] sm:$0xff]  ;;  %v240_v34 = vld [vmem:[%s1087_s1 + $0x38] sm:$0xff] }
  0x16   : > { %670 = vmatprep.subr.mxu1 %v292_v17  ;;  %633 = vmatpush3.msra.mxu0 %v244_v18  ;;  %v274_v27 = vld [vmem:[%s1087_s1 + $0x148] sm:$0xff]  ;;  %v273_v31 = vld [vmem:[%s1087_s1 + $0x140] sm:$0xff]  ;;  %v272_v35 = vld [vmem:[%s1087_s1 + $0x138] sm:$0xff] }
  0x17   : > { %671 = vmatpush3.msra.mxu1 %v276_v19  ;;  %634 = vmatprep.subr.mxu0 %v259_v20  ;;  %v255_v36 = vld [vmem:[%s1087_s1 + $0xb0] sm:$0xff]  ;;  %v254_v40 = vld [vmem:[%s1087_s1 + $0xa8] sm:$0xff]  ;;  %v253_v44 = vld [vmem:[%s1087_s1 + $0xa0] sm:$0xff] }
  0x18   : > { %672 = vmatprep.subr.mxu1 %v291_v21  ;;  %635 = vmatpush3.msra.mxu0 %v243_v22  ;;  %v287_v37 = vld [vmem:[%s1087_s1 + $0x1b0] sm:$0xff]  ;;  %v286_v41 = vld [vmem:[%s1087_s1 + $0x1a8] sm:$0xff]  ;;  %v285_v45 = vld [vmem:[%s1087_s1 + $0x1a0] sm:$0xff] }
  0x19   : > { %673 = vmatpush3.msra.mxu1 %v275_v23  ;;  %636 = vmatprep.subr.mxu0 %v258_v24  ;;  %v239_v38 = vld [vmem:[%s1087_s1 + $0x30] sm:$0xff]  ;;  %v238_v42 = vld [vmem:[%s1087_s1 + $0x28] sm:$0xff]  ;;  %v237_v46 = vld [vmem:[%s1087_s1 + $0x20] sm:$0xff] }
  0x1a   : > { %674 = vmatprep.subr.mxu1 %v290_v25  ;;  %637 = vmatpush3.msra.mxu0 %v242_v26  ;;  %v271_v39 = vld [vmem:[%s1087_s1 + $0x130] sm:$0xff]  ;;  %v270_v43 = vld [vmem:[%s1087_s1 + $0x128] sm:$0xff]  ;;  %v269_v47 = vld [vmem:[%s1087_s1 + $0x120] sm:$0xff] }
  0x1b   : > { %675 = vmatpush3.msra.mxu1 %v274_v27  ;;  %638 = vmatprep.subr.mxu0 %v257_v28  ;;  %v252_v48 = vld [vmem:[%s1087_s1 + $0x98] sm:$0xff]  ;;  %v251_v52 = vld [vmem:[%s1087_s1 + $0x90] sm:$0xff]  ;;  %v250_v56 = vld [vmem:[%s1087_s1 + $0x88] sm:$0xff] }
  0x1c   : > { %676 = vmatprep.subr.mxu1 %v289_v29  ;;  %639 = vmatpush3.msra.mxu0 %v241_v30  ;;  %v284_v49 = vld [vmem:[%s1087_s1 + $0x198] sm:$0xff]  ;;  %v283_v53 = vld [vmem:[%s1087_s1 + $0x190] sm:$0xff]  ;;  %v282_v57 = vld [vmem:[%s1087_s1 + $0x188] sm:$0xff] }
  0x1d   : > { %677 = vmatpush3.msra.mxu1 %v273_v31  ;;  %640 = vmatprep.subr.mxu0 %v256_v32  ;;  %v236_v50 = vld [vmem:[%s1087_s1 + $0x18] sm:$0xff]  ;;  %v235_v54 = vld [vmem:[%s1087_s1 + $0x10] sm:$0xff]  ;;  %v234_v58 = vld [vmem:[%s1087_s1 + $0x8] sm:$0xff] }
  0x1e   : > { %678 = vmatprep.subr.mxu1 %v288_v33  ;;  %641 = vmatpush3.msra.mxu0 %v240_v34  ;;  %v268_v51 = vld [vmem:[%s1087_s1 + $0x118] sm:$0xff]  ;;  %v267_v55 = vld [vmem:[%s1087_s1 + $0x110] sm:$0xff]  ;;  %v266_v59 = vld [vmem:[%s1087_s1 + $0x108] sm:$0xff] }
  0x1f   : > { %679 = vmatpush3.msra.mxu1 %v272_v35  ;;  %642 = vmatprep.subr.mxu0 %v255_v36  ;;  %v249_v60 = vld [vmem:[%s1087_s1 + $0x80] sm:$0xff]  ;;  %v226_v63 = vld [vmem:[%s997_s25 + $0x8] sm:$0xff]  ;;  %v228_v1 = vld [vmem:[%s997_s25 + $0x18] sm:$0xff] }
  0x20   : > { %680 = vmatprep.subr.mxu1 %v287_v37  ;;  %643 = vmatpush3.msra.mxu0 %v239_v38  ;;  %v281_v61 = vld [vmem:[%s1087_s1 + $0x180] sm:$0xff]  ;;  %v227_v3 = vld [vmem:[%s997_s25 + $0x10] sm:$0xff]  ;;  %v230_v4 = vld [vmem:[%s997_s25 + $0x28] sm:$0xff] }
  0x21   : > { %681 = vmatpush3.msra.mxu1 %v271_v39  ;;  %644 = vmatprep.subr.mxu0 %v254_v40  ;;  %v233_v62 = vld [vmem:[%s1087_s1] sm:$0xff]  ;;  %v232_v5 = vld [vmem:[%s997_s25 + $0x38] sm:$0xff]  ;;  %v231_v8 = vld [vmem:[%s997_s25 + $0x30] sm:$0xff] }
  0x22   : > { %682 = vmatprep.subr.mxu1 %v286_v41  ;;  %645 = vmatpush3.msra.mxu0 %v238_v42  ;;  %v265_v0 = vld [vmem:[%s1087_s1 + $0x100] sm:$0xff]  ;;  %v469_v6 = vld [vmem:[%s1089_s3 + $0x78] sm:$0xff]  ;;  %v468_v9 = vld [vmem:[%s1089_s3 + $0x70] sm:$0xff] }
  0x23   : > { %683 = vmatpush3.msra.mxu1 %v270_v43  ;;  %646 = vmatprep.subr.mxu0 %v253_v44  ;;  %v225_v2 = vld [vmem:[%s997_s25] sm:$0xff]  ;;  %v467_v10 = vld [vmem:[%s1089_s3 + $0x68] sm:$0xff]  ;;  %v465_v12 = vld [vmem:[%s1089_s3 + $0x58] sm:$0xff] }
  0x24   : > { %684 = vmatprep.subr.mxu1 %v285_v45  ;;  %647 = vmatpush3.msra.mxu0 %v237_v46  ;;  %v229_v7 = vld [vmem:[%s997_s25 + $0x20] sm:$0xff]  ;;  %v464_v13 = vld [vmem:[%s1089_s3 + $0x50] sm:$0xff]  ;;  %v463_v14 = vld [vmem:[%s1089_s3 + $0x48] sm:$0xff] }
  0x25   : > { %685 = vmatpush3.msra.mxu1 %v269_v47  ;;  %648 = vmatprep.subr.mxu0 %v252_v48  ;;  %v466_v11 = vld [vmem:[%s1089_s3 + $0x60] sm:$0xff]  ;;  %v461_v16 = vld [vmem:[%s1089_s3 + $0x38] sm:$0xff]  ;;  %v460_v17 = vld [vmem:[%s1089_s3 + $0x30] sm:$0xff] }
  0x26   : > { %686 = vmatprep.subr.mxu1 %v284_v49  ;;  %649 = vmatpush3.msra.mxu0 %v236_v50  ;;  %v462_v15 = vld [vmem:[%s1089_s3 + $0x40] sm:$0xff]  ;;  %v459_v18 = vld [vmem:[%s1089_s3 + $0x28] sm:$0xff]  ;;  %v457_v20 = vld [vmem:[%s1089_s3 + $0x18] sm:$0xff] }
  0x27   : > { %687 = vmatpush3.msra.mxu1 %v268_v51  ;;  %650 = vmatprep.subr.mxu0 %v251_v52  ;;  %v458_v19 = vld [vmem:[%s1089_s3 + $0x20] sm:$0xff]  ;;  %v456_v21 = vld [vmem:[%s1089_s3 + $0x10] sm:$0xff]  ;;  %v455_v22 = vld [vmem:[%s1089_s3 + $0x8] sm:$0xff] }
  0x28   : > { %688 = vmatprep.subr.mxu1 %v283_v53  ;;  %651 = vmatpush3.msra.mxu0 %v235_v54  ;;  %v454_v23 = vld [vmem:[%s1089_s3] sm:$0xff] }
  0x29   : > { %689 = vmatpush3.msra.mxu1 %v267_v55  ;;  %652 = vmatprep.subr.mxu0 %v250_v56  ;;  %v618_v26 = vld [vmem:[%s1088_s2] ss:$0 sm:$0xff] }
  0x2a   : > { %690 = vmatprep.subr.mxu1 %v282_v57  ;;  %653 = vmatpush3.msra.mxu0 %v234_v58  ;;  %v619_v41 = vld [vmem:[%s1090_s4] ss:$0 sm:$0xff] }
  0x2b   : > { %691 = vmatpush3.msra.mxu1 %v266_v59  ;;  %654 = vmatprep.subr.mxu0 %v249_v60 }
  0x2c   : > { %692 = vmatprep.subr.mxu1 %v281_v61  ;;  %655 = vmatpush3.msra.mxu0 %v233_v62 }
  0x2d   : > { %368 = vmatprep.mubr.f32.mxu0 %v226_v63  ;;  %693 = vmatpush3.msra.mxu1 %v265_v0 }
  0x2e   : > { %443 = vmatprep.mubr.f32.mxu1 %v228_v1  ;;  %369 = vmatmul.mubr.f32.vlgmr.msra.gmra.mxu0 %v225_v2 }
  0x2f   : > { %444 = vmatmul.mubr.f32.vlgmr.msra.gmra.mxu1 %v227_v3  ;;  %373 = vmatprep.mubr.f32.mxu0 %v230_v4 }
  0x30   : > { %448 = vmatprep.mubr.f32.mxu1 %v232_v5  ;;  %718 = vmatprep.subr.mxu0 %v469_v6 }
  0x31   : > { %719 = vmatpush3.msra.mxu0 %v469_v6 }
  0x32   : > { %374 = vmatmul.mubr.f32.gmra.mxu0 %v229_v7  ;;  %720 = vmatprep.subr.mxu0 %v468_v9 }
  0x33   : > { %449 = vmatmul.mubr.f32.gmra.mxu1 %v231_v8  ;;  %721 = vmatpush3.msra.mxu0 %v468_v9 }
  0x34   : > { %722 = vmatprep.subr.mxu0 %v467_v10 }
  0x35   : > { %723 = vmatpush3.msra.mxu0 %v467_v10 }
  0x36   : > { %724 = vmatprep.subr.mxu0 %v466_v11 }
  0x37   : > { %725 = vmatpush3.msra.mxu0 %v466_v11 }
  0x38   : > { %726 = vmatprep.subr.mxu0 %v465_v12 }
  0x39   : > { %727 = vmatpush3.msra.mxu0 %v465_v12 }
  0x3a   : > { %728 = vmatprep.subr.mxu0 %v464_v13 }
  0x3b   : > { %729 = vmatpush3.msra.mxu0 %v464_v13 }
  0x3c   : > { %730 = vmatprep.subr.mxu0 %v463_v14 }
  0x3d   : > { %731 = vmatpush3.msra.mxu0 %v463_v14 }
  0x3e   : > { %732 = vmatprep.subr.mxu0 %v462_v15 }
  0x3f   : > { %733 = vmatpush3.msra.mxu0 %v462_v15 }
  0x40   : > { %734 = vmatprep.subr.mxu0 %v461_v16 }
  0x41   : > { %735 = vmatpush3.msra.mxu0 %v461_v16 }
  0x42   : > { %736 = vmatprep.subr.mxu0 %v460_v17 }
  0x43   : > { %737 = vmatpush3.msra.mxu0 %v460_v17 }
  0x44   : > { %738 = vmatprep.subr.mxu0 %v459_v18 }
  0x45   : > { %739 = vmatpush3.msra.mxu0 %v459_v18 }
  0x46   : > { %740 = vmatprep.subr.mxu0 %v458_v19 }
  0x47   : > { %741 = vmatpush3.msra.mxu0 %v458_v19 }
  0x48   : > { %742 = vmatprep.subr.mxu0 %v457_v20 }
  0x49   : > { %743 = vmatpush3.msra.mxu0 %v457_v20 }
  0x4a   : > { %744 = vmatprep.subr.mxu0 %v456_v21 }
  0x4b   : > { %745 = vmatpush3.msra.mxu0 %v456_v21 }
  0x4c   : > { %746 = vmatprep.subr.mxu0 %v455_v22 }
  0x4d   : > { %747 = vmatpush3.msra.mxu0 %v455_v22 }
  0x4e   : > { %748 = vmatprep.subr.mxu0 %v454_v23 }
  0x4f   : > { %749 = vmatpush3.msra.mxu0 %v454_v23 }
  0xee   : > { %v656_v24 = vpop.f32.mrf.mxu0 }
  0xef   : > { %v694_v25 = vpop.f32.mrf.mxu1 }
  0xf0   : > { %v657_v27 = vpop.f32.mrf.mxu0 }
  0xf1   : > { %v695_v28 = vpop.f32.mrf.mxu1  ;;  %v658_v29 = vadd.f32 %v657_v27, %v656_v24 }
  0xf2   : > { %v659_v30 = vpop.f32.mrf.mxu0  ;;  %v696_v33 = vadd.f32 %v695_v28, %v694_v25 }
  0xf3   : > { %v697_v31 = vpop.f32.mrf.mxu1  ;;  %v371_v32 = vadd.f32 %v658_v29, %v618_v26 }
  0xf4   : > { %v660_v34 = vpop.f32.mrf.mxu0 }
  0xf5   : > { %v698_v35 = vpop.f32.mrf.mxu1  ;;  %v446_v36 = vadd.f32 %v696_v33, %v371_v32  ;;  %v661_v37 = vadd.f32 %v660_v34, %v659_v30 }
  0xf6   : > { %v699_v39 = vadd.f32 %v698_v35, %v697_v31 }
  0xf7   : > { %v376_v38 = vadd.f32 %v661_v37, %v618_v26  ;;  %750 = vmatprep.mubr.f32.mxu0 %v446_v36 }
  0xf9   : > { %v451_v40 = vadd.f32 %v699_v39, %v376_v38 }
  0xfb   : > { %751 = vmatmul.mubr.f32.vlgmr.msra.gmra.mxu0 %v451_v40 }
 0x1bb   : > { %v752_v42 = vpop.f32.mrf.mxu0 }
 0x1bc   : > { %v549_v43 = vadd.f32 %v752_v42, %v619_v41 }
 0x1bd   : > { %v543_v44 = vpop.f32.mrf.mxu0 }
 0x1be   : > { %553 = vst [vmem:[%s224_s6 + $0x8] sm:$0xff] %v549_v43  ;;  %v544_v45 = vadd.f32 %v619_v41, %v543_v44 }
 0x1c0   : > { %552 = vst [vmem:[%s224_s6] sm:$0xff] %v544_v45 }
 0x1c1 PF: > { %s15_s18 = sadd.s32 1, %s767_s18  }
 0x1c2   : > { %p12_p4 = scmp.ge.s32.totalorder %s15_s18, 4  }
 0x1c4   :  { %14 = sbr.rel (!%p12_p4) target bundleno = 1 (0x1), region = 70 }

// kernel: vqa_forward.3
= control target key start
LH: loop header
LB: loop body
LE: loop exit
PB: predicated region body
PF: predicated region fallthrough
CT: control target
= control target key end

     0   :  { %14 = vsyncpa [#allocation5], 0  ;;  %s3596_s0 = inlined_call_operand.vmem [shape: f32[2,16,128], index: 0, kind: input, shape index: {}]   ;;  %s3597_s1 = inlined_call_operand.vmem [shape: f32[32,128], index: 1, kind: input, shape index: {}]   ;;  %s3598_s2 = inlined_call_operand.vmem [shape: f32[1,128], index: 2, kind: input, shape index: {}]   ;;  %s3599_s3 = inlined_call_operand.vmem [shape: f32[1,32], index: 3, kind: input, shape index: {}]   ;;  %s3600_s4 = inlined_call_operand.<no memory space> [shape: f32[1], index: 4, kind: input, shape index: {}]   ;;  %s3601_s5 = inlined_call_operand.vmem [shape: f32[4], index: 5, kind: input, shape index: {}]   ;;  %s3602_s6 = inlined_call_operand.hbm [shape: f32[1,1], index: 6, kind: output, shape index: {0}]   ;;  %s3603_s7 = inlined_call_operand.hbm [shape: f32[1,1], index: 7, kind: output, shape index: {1}]  }
   0x1   :  { %15 = vsyncpa [#allocation4], 0 }
   0x2   :  { %16 = vsyncpa [#allocation8], 0  ;;  %s33_s26 = sshll.u32 %s3601_s5, 4  ;;  %s34_s26 = int_to_ptr.vmem [resolvable:$true] %s33_s26 }
   0x3   :  { %s2893_s27 = scalar_lea.vmem %s34_s26, 16  ;;  %p2898_p1 = scmp.lt.s32.totalorder %s34_s26, %s34_s26 }
   0x4   :  { %p2894_p0 = scmp.ne.s32.totalorder %s34_s26, %s2893_s27  ;;  %p2899_p2 = scmp.lt.s32.totalorder %s2893_s27, %s2893_s27 }
   0x6   :  { %p2900_p3 = por %p2899_p2, %p2898_p1 }
   0x8   :  { %p2901_p4 = pnand %p2900_p3, %p2894_p0 }
   0xa   :  { %2904 = shalt.err (!%p2901_p4)
}
   0xb   :  { %s2951_s28 = smov [#allocation3]  }
   0xc   :  { %36 = dma.vmem_to_smem %s34_s26, 16, %s2951_s28, [#allocation5]  }
   0xd   :  { %2945 = dma.done.wait [#allocation5], 16  }
   0xe   :  { %2946 = vsyncadd [#allocation5], 4294967280 }
   0xf   :  { %40 = sfence }
  0x10   :  { %v3005_v0 = vld [vmem:[%s3597_s1 + $0x18] sm:$0xff]  ;;  %v2952_v1 = vmov 0.0   ;;  %v3011_v2 = vld [vmem:[%s3597_s1 + $0x10] sm:$0xff]  ;;  %vm2953_vm0 = vmmov 0   ;;  %v3021_v3 = vld [vmem:[%s3597_s1 + $0x8] sm:$0xff]  ;;  %s2954_s15 = smov 64  }
  0x11   :  { %2504 = vmatprep.subr.mxu0 %v2952_v1  ;;  %2512 = vmatprep.mubr.msk.f32.mxu0 %vm2953_vm0, %v2952_v1  ;;  %v3030_v4 = vld [vmem:[%s3597_s1] sm:$0xff]  ;;  %v49_v10 = vld [vmem:[%s3596_s0 + $0x10] sm:$0x1]  ;;  %s2955_s20 = smov 96   ;;  %vm189_vm1 = vcmask 1041409   ;;  %vm56_vm2 = vcmask 261120  }
  0x12   :  { %2505 = vmatpush3.msra.mxu0 %v3005_v0  ;;  %2515 = vmatprep.subr.mxu1 %v2952_v1  ;;  %v3058_v5 = vld [vmem:[%s3598_s2] ss:$0 sm:$0xff]  ;;  %v184_v49 = vld [vmem:[%s3596_s0 + $0x1] sm:$0x1]  ;;  %v185_v50 = vld [vmem:[%s3596_s0 + $0x11] sm:$0x1] }
  0x13   :  { %2506 = vmatprep.subr.mxu0 %v2952_v1  ;;  %2516 = vmatpush3.msra.mxu1 %v3005_v0  ;;  %v48_v12 = vld [vmem:[%s3596_s0] sm:$0x1]  ;;  %vm2196_vm3 = vcmask 1040384   ;;  %vm2198_vm4 = vcmask 1041408   ;;  %vm2200_vm5 = vcmask 1042432   ;;  %vm2202_vm6 = vcmask 1043456  }
  0x14   :  { %2507 = vmatpush3.msra.mxu0 %v3011_v2  ;;  %2517 = vmatprep.subr.mxu1 %v2952_v1  ;;  %vm2204_vm7 = vcmask 1044480   ;;  %vm2206_vm8 = vcmask 1045504   ;;  %vm2208_vm9 = vcmask 1046528  }
  0x15   :  { %2508 = vmatprep.subr.mxu0 %v2952_v1  ;;  %2518 = vmatpush3.msra.mxu1 %v3011_v2 }
  0x16   :  { %2509 = vmatpush3.msra.mxu0 %v3021_v3  ;;  %2519 = vmatprep.subr.mxu1 %v2952_v1 }
  0x17   :  { %2510 = vmatprep.subr.mxu0 %v2952_v1  ;;  %2520 = vmatpush3.msra.mxu1 %v3021_v3 }
  0x18   :  { %2511 = vmatpush3.msra.mxu0 %v3030_v4  ;;  %2521 = vmatprep.subr.mxu1 %v2952_v1 }
  0x19   :  { %2513 = vmatmul.mubr.f32.vlgmr.msra.gmra.mxu0 %v2952_v1  ;;  %2522 = vmatpush3.msra.mxu1 %v3030_v4 }
  0x1a   :  { %2523 = vmatprep.mubr.msk.f32.mxu1 %vm2953_vm0, %v2952_v1  ;;  %2526 = vmatprep.subr.mxu0 %v2952_v1 }
  0x1b   :  { %2527 = vmatpush3.msra.mxu0 %v3005_v0  ;;  %2534 = vmatprep.mubr.msk.f32.mxu0 %vm2953_vm0, %v2952_v1 }
  0x1c   :  { %2528 = vmatprep.subr.mxu0 %v2952_v1  ;;  %2537 = vmatprep.subr.mxu1 %v2952_v1 }
  0x1d   :  { %2529 = vmatpush3.msra.mxu0 %v3011_v2 }
  0x1e   :  { %2530 = vmatprep.subr.mxu0 %v2952_v1 }
  0x1f   :  { %2531 = vmatpush3.msra.mxu0 %v3021_v3 }
  0x20   :  { %2532 = vmatprep.subr.mxu0 %v2952_v1 }
  0x21   :  { %2533 = vmatpush3.msra.mxu0 %v3030_v4 }
  0x22   :  { %2548 = vmatprep.subr.mxu0 %v2952_v1 }
  0xd9   :  { %v126_v6 = vpop.f32.mrf.mxu0 }
  0xda   :  { %v127_v7 = vadd.f32 %v3058_v5, %v126_v6 }
  0xdb   :  { %v2514_v8 = vpop.f32.mrf.mxu0 }
  0xdc   :  { %v131_v9 = vrot.slane %v127_v7, 1  ;;  %v134_v13 = vadd.f32 %v127_v7, %v48_v12 }
  0xde   :  { %150 = vrot.lane.b32.xlu0 %v131_v9, %s2954_s15  ;;  %v135_v11 = vadd.f32 %v131_v9, %v49_v10  ;;  %v2371_v15 = vmul.f32 -1.442695, %v134_v13 }
  0xe0   :  { %v2372_v14 = vmul.f32 -1.442695, %v135_v11 }
  0xe2   :  { %148 = vrot.lane.b32.xlu0 %v127_v7, %s2954_s15  ;;  %2688 = vpow2.f32 %v2372_v14 }
  0xe3   :  { %2690 = vpow2.f32 %v2371_v15 }
  0xef   :  { %v2689_v16 = vpop.eup %2688 }
  0xf0   :  { %v143_v17 = vadd.f32 1.0, %v2689_v16  ;;  %v2691_v18 = vpop.eup %2690 }
  0xf1   :  { %v142_v19 = vadd.f32 1.0, %v2691_v18 }
  0xf2   :  { %2692 = vrcp.f32 %v143_v17 }
  0xf3   :  { %2694 = vrcp.f32 %v142_v19 }
  0xff   :  { %v2693_v20 = vpop.eup %2692 }
 0x100   :  { %v2695_v23 = vpop.eup %2694  ;;  %v169_v32 = vsub.f32 1.0, %v2693_v20  ;;  %v181_v34 = vmul.f32 0.0, %v2693_v20 }
 0x101   :  { %v168_v37 = vsub.f32 1.0, %v2695_v23  ;;  %v180_v39 = vmul.f32 0.0, %v2695_v23 }
 0x150   :  { %v151_v21 = vpop.permute.xlu0 %150 }
 0x151   :  { %v155_v22 = vmul.f32 %v2693_v20, %v151_v21 }
 0x153   :  { %160 = vrot.lane.b32.xlu1 %v155_v22, %s2954_s15 }
 0x154   :  { %v149_v24 = vpop.permute.xlu0 %148 }
 0x155   :  { %v154_v25 = vmul.f32 %v2695_v23, %v149_v24 }
 0x157   :  { %158 = vrot.lane.b32.xlu1 %v154_v25, %s2954_s15 }
 0x1c5   :  { %v161_v26 = vpop.permute.xlu1 %160 }
 0x1c6   :  { %v165_v27 = vadd.f32 %v161_v26, %v49_v10 }
 0x1c8   :  { %2696 = vtanh.f32 %v165_v27 }
 0x1c9   :  { %v159_v28 = vpop.permute.xlu1 %158 }
 0x1ca   :  { %v164_v29 = vadd.f32 %v159_v28, %v48_v12 }
 0x1cc   :  { %2698 = vtanh.f32 %v164_v29 }
 0x1d5   :  { %v2697_v30 = vpop.eup %2696 }
 0x1d6   :  { %174 = vrot.lane.b32.xlu0 %v2697_v30, %s2955_s20  ;;  %v319_v30 = vld [vmem:[%s3596_s0 + $0x2] sm:$0x1] }
 0x1d9   :  { %v2699_v31 = vpop.eup %2698 }
 0x1da   :  { %172 = vrot.lane.b32.xlu1 %v2699_v31, %s2955_s20  ;;  %v320_v31 = vld [vmem:[%s3596_s0 + $0x12] sm:$0x1] }
 0x248   :  { %v175_v33 = vpop.permute.xlu0 %174 }
 0x249   :  { %v179_v35 = vmul.f32 %v175_v33, %v169_v32 }
 0x24b   :  { %v3073_v36 = vadd.f32 %v181_v34, %v179_v35 }
 0x24c   :  { %v173_v38 = vpop.permute.xlu1 %172 }
 0x24d   :  { %v178_v40 = vmul.f32 %v173_v38, %v168_v37  ;;  %v188_v41 = vrot.slane %v3073_v36, 7 }
 0x24f   :  { %v3076_v42 = vadd.f32 %v180_v39, %v178_v40 }
 0x251   :  { %v190_v43 = vsel %vm189_vm1, %v188_v41, %v3076_v42 }
 0x252   :  { %191 = vrot.lane.b32.xlu0 %v190_v43, %s2955_s20 }
 0x2c4   :  { %v192_v44 = vpop.permute.xlu0 %191 }
 0x2c5   :  { %2524 = vmatmul.mubr.msk.f32.vlgmr.msra.gmra.mxu1 %vm56_vm2, %v192_v44 }
 0x2c6   :  { %2538 = vmatpush3.msra.mxu1 %v3005_v0  ;;  %2545 = vmatprep.mubr.msk.f32.mxu1 %vm2953_vm0, %v2952_v1 }
 0x2c7   :  { %2539 = vmatprep.subr.mxu1 %v2952_v1 }
 0x2c8   :  { %2540 = vmatpush3.msra.mxu1 %v3011_v2 }
 0x2c9   :  { %2541 = vmatprep.subr.mxu1 %v2952_v1 }
 0x2ca   :  { %2542 = vmatpush3.msra.mxu1 %v3021_v3 }
 0x2cb   :  { %2543 = vmatprep.subr.mxu1 %v2952_v1 }
 0x2cc   :  { %2544 = vmatpush3.msra.mxu1 %v3030_v4 }
 0x2cd   :  { %2559 = vmatprep.subr.mxu1 %v2952_v1 }
 0x385   :  { %v261_v45 = vpop.f32.mrf.mxu1 }
 0x386   :  { %v262_v46 = vadd.f32 %v3058_v5, %v261_v45 }
 0x387   :  { %v2525_v47 = vpop.f32.mrf.mxu1 }
 0x388   :  { %283 = vrot.lane.b32.xlu0 %v262_v46, %s2954_s15  ;;  %v266_v48 = vrot.slane %v262_v46, 1  ;;  %v269_v51 = vadd.f32 %v262_v46, %v184_v49 }
 0x38a   :  { %285 = vrot.lane.b32.xlu1 %v266_v48, %s2954_s15  ;;  %v270_v52 = vadd.f32 %v266_v48, %v185_v50  ;;  %v2374_v53 = vmul.f32 -1.442695, %v269_v51 }
 0x38c   :  { %v2375_v54 = vmul.f32 -1.442695, %v270_v52  ;;  %2700 = vpow2.f32 %v2374_v53 }
 0x38e   :  { %2702 = vpow2.f32 %v2375_v54 }
 0x399   :  { %v2701_v55 = vpop.eup %2700 }
 0x39a   :  { %v277_v57 = vadd.f32 1.0, %v2701_v55 }
 0x39b   :  { %v2703_v56 = vpop.eup %2702 }
 0x39c   :  { %v278_v58 = vadd.f32 1.0, %v2703_v56  ;;  %2704 = vrcp.f32 %v277_v57 }
 0x39e   :  { %2706 = vrcp.f32 %v278_v58 }
 0x3a9   :  { %v2705_v59 = vpop.eup %2704 }
 0x3aa   :  { %v303_v14 = vsub.f32 1.0, %v2705_v59  ;;  %v315_v20 = vmul.f32 %v2705_v59, %v3076_v42 }
 0x3ab   :  { %v2707_v62 = vpop.eup %2706 }
 0x3ac   :  { %v304_v15 = vsub.f32 1.0, %v2707_v62  ;;  %v316_v18 = vmul.f32 %v2707_v62, %v3073_v36 }
 0x3fa   :  { %v284_v60 = vpop.permute.xlu0 %283 }
 0x3fb   :  { %v289_v61 = vmul.f32 %v2705_v59, %v284_v60 }
 0x3fc   :  { %v286_v63 = vpop.permute.xlu1 %285 }
 0x3fd   :  { %v290_v6 = vmul.f32 %v2707_v62, %v286_v63  ;;  %293 = vrot.lane.b32.xlu0 %v289_v61, %s2954_s15 }
 0x3ff   :  { %295 = vrot.lane.b32.xlu1 %v290_v6, %s2954_s15 }
 0x46f   :  { %v294_v7 = vpop.permute.xlu0 %293 }
 0x470   :  { %v299_v8 = vadd.f32 %v294_v7, %v184_v49 }
 0x471   :  { %v296_v9 = vpop.permute.xlu1 %295 }
 0x472   :  { %2708 = vtanh.f32 %v299_v8  ;;  %v300_v10 = vadd.f32 %v296_v9, %v185_v50 }
 0x474   :  { %2710 = vtanh.f32 %v300_v10 }
 0x47f   :  { %v2709_v11 = vpop.eup %2708 }
 0x480   :  { %307 = vrot.lane.b32.xlu0 %v2709_v11, %s2955_s20 }
 0x481   :  { %v2711_v12 = vpop.eup %2710 }
 0x482   :  { %309 = vrot.lane.b32.xlu1 %v2711_v12, %s2955_s20  ;;  %v453_v12 = vld [vmem:[%s3596_s0 + $0x3] sm:$0x1] }
 0x4f2   :  { %v308_v13 = vpop.permute.xlu0 %307 }
 0x4f3   :  { %v313_v17 = vmul.f32 %v308_v13, %v303_v14  ;;  %v454_v13 = vld [vmem:[%s3596_s0 + $0x13] sm:$0x1] }
 0x4f4   :  { %v310_v16 = vpop.permute.xlu1 %309 }
 0x4f5   :  { %v314_v19 = vmul.f32 %v310_v16, %v304_v15  ;;  %v3107_v22 = vadd.f32 %v315_v20, %v313_v17 }
 0x4f7   :  { %v318_v21 = vadd.f32 %v316_v18, %v314_v19 }
 0x4f9   :  { %v323_v23 = vrot.slane %v318_v21, 7 }
 0x4fb   :  { %v324_v24 = vsel %vm189_vm1, %v323_v23, %v3107_v22 }
 0x4fc   :  { %325 = vrot.lane.b32.xlu1 %v324_v24, %s2955_s20 }
 0x56e   :  { %v326_v25 = vpop.permute.xlu1 %325 }
 0x56f   :  { %2535 = vmatmul.mubr.msk.f32.vlgmr.msra.gmra.mxu0 %vm56_vm2, %v326_v25 }
 0x570   :  { %2549 = vmatpush3.msra.mxu0 %v3005_v0  ;;  %2556 = vmatprep.mubr.msk.f32.mxu0 %vm2953_vm0, %v2952_v1 }
 0x571   :  { %2550 = vmatprep.subr.mxu0 %v2952_v1 }
 0x572   :  { %2551 = vmatpush3.msra.mxu0 %v3011_v2 }
 0x573   :  { %2552 = vmatprep.subr.mxu0 %v2952_v1 }
 0x574   :  { %2553 = vmatpush3.msra.mxu0 %v3021_v3 }
 0x575   :  { %2554 = vmatprep.subr.mxu0 %v2952_v1 }
 0x576   :  { %2555 = vmatpush3.msra.mxu0 %v3030_v4 }
 0x577   :  { %2570 = vmatprep.subr.mxu0 %v2952_v1 }
 0x62f   :  { %v395_v26 = vpop.f32.mrf.mxu0 }
 0x630   :  { %v396_v27 = vadd.f32 %v3058_v5, %v395_v26 }
 0x631   :  { %v2536_v28 = vpop.f32.mrf.mxu0 }
 0x632   :  { %417 = vrot.lane.b32.xlu1 %v396_v27, %s2954_s15  ;;  %v400_v29 = vrot.slane %v396_v27, 1  ;;  %v403_v32 = vadd.f32 %v396_v27, %v319_v30 }
 0x634   :  { %419 = vrot.lane.b32.xlu0 %v400_v29, %s2954_s15  ;;  %v404_v33 = vadd.f32 %v400_v29, %v320_v31  ;;  %v2377_v34 = vmul.f32 -1.442695, %v403_v32 }
 0x636   :  { %v2378_v35 = vmul.f32 -1.442695, %v404_v33  ;;  %2712 = vpow2.f32 %v2377_v34 }
 0x638   :  { %2714 = vpow2.f32 %v2378_v35 }
 0x643   :  { %v2713_v36 = vpop.eup %2712 }
 0x644   :  { %v411_v38 = vadd.f32 1.0, %v2713_v36 }
 0x645   :  { %v2715_v37 = vpop.eup %2714 }
 0x646   :  { %v412_v39 = vadd.f32 1.0, %v2715_v37  ;;  %2716 = vrcp.f32 %v411_v38 }
 0x648   :  { %2718 = vrcp.f32 %v412_v39 }
 0x653   :  { %v2717_v40 = vpop.eup %2716 }
 0x654   :  { %v437_v54 = vsub.f32 1.0, %v2717_v40  ;;  %v449_v60 = vmul.f32 %v2717_v40, %v3107_v22 }
 0x655   :  { %v2719_v44 = vpop.eup %2718 }
 0x656   :  { %v438_v55 = vsub.f32 1.0, %v2719_v44  ;;  %v450_v58 = vmul.f32 %v2719_v44, %v318_v21 }
 0x6a4   :  { %v418_v41 = vpop.permute.xlu1 %417 }
 0x6a5   :  { %v423_v43 = vmul.f32 %v2717_v40, %v418_v41 }
 0x6a6   :  { %v420_v45 = vpop.permute.xlu0 %419 }
 0x6a7   :  { %v424_v46 = vmul.f32 %v2719_v44, %v420_v45  ;;  %427 = vrot.lane.b32.xlu1 %v423_v43, %s2954_s15 }
 0x6a9   :  { %429 = vrot.lane.b32.xlu0 %v424_v46, %s2954_s15 }
 0x719   :  { %v428_v47 = vpop.permute.xlu1 %427 }
 0x71a   :  { %v433_v48 = vadd.f32 %v428_v47, %v319_v30 }
 0x71b   :  { %v430_v49 = vpop.permute.xlu0 %429 }
 0x71c   :  { %2720 = vtanh.f32 %v433_v48  ;;  %v434_v50 = vadd.f32 %v430_v49, %v320_v31 }
 0x71e   :  { %2722 = vtanh.f32 %v434_v50 }
 0x729   :  { %v2721_v51 = vpop.eup %2720 }
 0x72a   :  { %441 = vrot.lane.b32.xlu1 %v2721_v51, %s2955_s20 }
 0x72b   :  { %v2723_v52 = vpop.eup %2722 }
 0x72c   :  { %443 = vrot.lane.b32.xlu0 %v2723_v52, %s2955_s20 }
 0x79c   :  { %v442_v53 = vpop.permute.xlu1 %441 }
 0x79d   :  { %v447_v57 = vmul.f32 %v442_v53, %v437_v54  ;;  %v587_v53 = vld [vmem:[%s3596_s0 + $0x4] sm:$0x1]  ;;  %v588_v54 = vld [vmem:[%s3596_s0 + $0x14] sm:$0x1] }
 0x79e   :  { %v444_v56 = vpop.permute.xlu0 %443 }
 0x79f   :  { %v448_v59 = vmul.f32 %v444_v56, %v438_v55  ;;  %v3137_v62 = vadd.f32 %v449_v60, %v447_v57 }
 0x7a1   :  { %v452_v61 = vadd.f32 %v450_v58, %v448_v59 }
 0x7a3   :  { %v457_v63 = vrot.slane %v452_v61, 7 }
 0x7a5   :  { %v458_v6 = vsel %vm189_vm1, %v457_v63, %v3137_v62 }
 0x7a6   :  { %459 = vrot.lane.b32.xlu0 %v458_v6, %s2955_s20 }
 0x818   :  { %v460_v7 = vpop.permute.xlu0 %459 }
 0x819   :  { %2546 = vmatmul.mubr.msk.f32.vlgmr.msra.gmra.mxu1 %vm56_vm2, %v460_v7 }
 0x81a   :  { %2560 = vmatpush3.msra.mxu1 %v3005_v0  ;;  %2567 = vmatprep.mubr.msk.f32.mxu1 %vm2953_vm0, %v2952_v1 }
 0x81b   :  { %2561 = vmatprep.subr.mxu1 %v2952_v1 }
 0x81c   :  { %2562 = vmatpush3.msra.mxu1 %v3011_v2 }
 0x81d   :  { %2563 = vmatprep.subr.mxu1 %v2952_v1 }
 0x81e   :  { %2564 = vmatpush3.msra.mxu1 %v3021_v3 }
 0x81f   :  { %2565 = vmatprep.subr.mxu1 %v2952_v1 }
 0x820   :  { %2566 = vmatpush3.msra.mxu1 %v3030_v4 }
 0x821   :  { %2581 = vmatprep.subr.mxu1 %v2952_v1 }
 0x8d9   :  { %v529_v8 = vpop.f32.mrf.mxu1 }
 0x8da   :  { %v530_v9 = vadd.f32 %v3058_v5, %v529_v8 }
 0x8db   :  { %v2547_v10 = vpop.f32.mrf.mxu1 }
 0x8dc   :  { %551 = vrot.lane.b32.xlu0 %v530_v9, %s2954_s15  ;;  %v534_v11 = vrot.slane %v530_v9, 1  ;;  %v537_v14 = vadd.f32 %v530_v9, %v453_v12 }
 0x8de   :  { %553 = vrot.lane.b32.xlu1 %v534_v11, %s2954_s15  ;;  %v538_v15 = vadd.f32 %v534_v11, %v454_v13  ;;  %v2380_v16 = vmul.f32 -1.442695, %v537_v14 }
 0x8e0   :  { %v2381_v17 = vmul.f32 -1.442695, %v538_v15  ;;  %2724 = vpow2.f32 %v2380_v16 }
 0x8e2   :  { %2726 = vpow2.f32 %v2381_v17 }
 0x8ed   :  { %v2725_v18 = vpop.eup %2724 }
 0x8ee   :  { %v545_v20 = vadd.f32 1.0, %v2725_v18 }
 0x8ef   :  { %v2727_v19 = vpop.eup %2726 }
 0x8f0   :  { %v546_v21 = vadd.f32 1.0, %v2727_v19  ;;  %2728 = vrcp.f32 %v545_v20 }
 0x8f2   :  { %2730 = vrcp.f32 %v546_v21 }
 0x8fd   :  { %v2729_v23 = vpop.eup %2728 }
 0x8fe   :  { %v571_v36 = vsub.f32 1.0, %v2729_v23  ;;  %v583_v43 = vmul.f32 %v2729_v23, %v3137_v62 }
 0x8ff   :  { %v2731_v26 = vpop.eup %2730 }
 0x900   :  { %v572_v37 = vsub.f32 1.0, %v2731_v26  ;;  %v584_v40 = vmul.f32 %v2731_v26, %v452_v61 }
 0x94e   :  { %v552_v24 = vpop.permute.xlu0 %551 }
 0x94f   :  { %v557_v25 = vmul.f32 %v2729_v23, %v552_v24 }
 0x950   :  { %v554_v27 = vpop.permute.xlu1 %553 }
 0x951   :  { %v558_v28 = vmul.f32 %v2731_v26, %v554_v27  ;;  %561 = vrot.lane.b32.xlu0 %v557_v25, %s2954_s15 }
 0x953   :  { %563 = vrot.lane.b32.xlu1 %v558_v28, %s2954_s15 }
 0x9c3   :  { %v562_v29 = vpop.permute.xlu0 %561 }
 0x9c4   :  { %v567_v30 = vadd.f32 %v562_v29, %v453_v12 }
 0x9c5   :  { %v564_v31 = vpop.permute.xlu1 %563 }
 0x9c6   :  { %2732 = vtanh.f32 %v567_v30  ;;  %v568_v32 = vadd.f32 %v564_v31, %v454_v13 }
 0x9c8   :  { %2734 = vtanh.f32 %v568_v32 }
 0x9d3   :  { %v2733_v33 = vpop.eup %2732 }
 0x9d4   :  { %575 = vrot.lane.b32.xlu0 %v2733_v33, %s2955_s20 }
 0x9d5   :  { %v2735_v34 = vpop.eup %2734 }
 0x9d6   :  { %577 = vrot.lane.b32.xlu1 %v2735_v34, %s2955_s20 }
 0xa46   :  { %v576_v35 = vpop.permute.xlu0 %575 }
 0xa47   :  { %v581_v39 = vmul.f32 %v576_v35, %v571_v36  ;;  %v721_v36 = vld [vmem:[%s3596_s0 + $0x5] sm:$0x1] }
 0xa48   :  { %v578_v38 = vpop.permute.xlu1 %577 }
 0xa49   :  { %v582_v41 = vmul.f32 %v578_v38, %v572_v37  ;;  %v3167_v45 = vadd.f32 %v583_v43, %v581_v39  ;;  %v722_v37 = vld [vmem:[%s3596_s0 + $0x15] sm:$0x1] }
 0xa4b   :  { %v586_v44 = vadd.f32 %v584_v40, %v582_v41 }
 0xa4d   :  { %v591_v46 = vrot.slane %v586_v44, 7 }
 0xa4f   :  { %v592_v47 = vsel %vm189_vm1, %v591_v46, %v3167_v45 }
 0xa50   :  { %593 = vrot.lane.b32.xlu1 %v592_v47, %s2955_s20 }
 0xac2   :  { %v594_v48 = vpop.permute.xlu1 %593 }
 0xac3   :  { %2557 = vmatmul.mubr.msk.f32.vlgmr.msra.gmra.mxu0 %vm56_vm2, %v594_v48 }
 0xac4   :  { %2571 = vmatpush3.msra.mxu0 %v3005_v0  ;;  %2578 = vmatprep.mubr.msk.f32.mxu0 %vm2953_vm0, %v2952_v1 }
 0xac5   :  { %2572 = vmatprep.subr.mxu0 %v2952_v1 }
 0xac6   :  { %2573 = vmatpush3.msra.mxu0 %v3011_v2 }
 0xac7   :  { %2574 = vmatprep.subr.mxu0 %v2952_v1 }
 0xac8   :  { %2575 = vmatpush3.msra.mxu0 %v3021_v3 }
 0xac9   :  { %2576 = vmatprep.subr.mxu0 %v2952_v1 }
 0xaca   :  { %2577 = vmatpush3.msra.mxu0 %v3030_v4 }
 0xacb   :  { %2592 = vmatprep.subr.mxu0 %v2952_v1 }
 0xb83   :  { %v663_v49 = vpop.f32.mrf.mxu0 }
 0xb84   :  { %v664_v50 = vadd.f32 %v3058_v5, %v663_v49 }
 0xb85   :  { %v2558_v51 = vpop.f32.mrf.mxu0 }
 0xb86   :  { %685 = vrot.lane.b32.xlu1 %v664_v50, %s2954_s15  ;;  %v668_v52 = vrot.slane %v664_v50, 1  ;;  %v671_v55 = vadd.f32 %v664_v50, %v587_v53 }
 0xb88   :  { %687 = vrot.lane.b32.xlu0 %v668_v52, %s2954_s15  ;;  %v672_v56 = vadd.f32 %v668_v52, %v588_v54  ;;  %v2383_v57 = vmul.f32 -1.442695, %v671_v55 }
 0xb8a   :  { %v2384_v58 = vmul.f32 -1.442695, %v672_v56  ;;  %2736 = vpow2.f32 %v2383_v57 }
 0xb8c   :  { %2738 = vpow2.f32 %v2384_v58 }
 0xb97   :  { %v2737_v59 = vpop.eup %2736 }
 0xb98   :  { %v679_v61 = vadd.f32 1.0, %v2737_v59 }
 0xb99   :  { %v2739_v60 = vpop.eup %2738 }
 0xb9a   :  { %v680_v63 = vadd.f32 1.0, %v2739_v60  ;;  %2740 = vrcp.f32 %v679_v61 }
 0xb9c   :  { %2742 = vrcp.f32 %v680_v63 }
 0xba7   :  { %v2741_v6 = vpop.eup %2740 }
 0xba8   :  { %v705_v19 = vsub.f32 1.0, %v2741_v6  ;;  %v717_v26 = vmul.f32 %v2741_v6, %v3167_v45 }
 0xba9   :  { %v2743_v9 = vpop.eup %2742 }
 0xbaa   :  { %v706_v20 = vsub.f32 1.0, %v2743_v9  ;;  %v718_v24 = vmul.f32 %v2743_v9, %v586_v44 }
 0xbf8   :  { %v686_v7 = vpop.permute.xlu1 %685 }
 0xbf9   :  { %v691_v8 = vmul.f32 %v2741_v6, %v686_v7 }
 0xbfa   :  { %v688_v10 = vpop.permute.xlu0 %687 }
 0xbfb   :  { %v692_v11 = vmul.f32 %v2743_v9, %v688_v10  ;;  %695 = vrot.lane.b32.xlu1 %v691_v8, %s2954_s15 }
 0xbfd   :  { %697 = vrot.lane.b32.xlu0 %v692_v11, %s2954_s15 }
 0xc6d   :  { %v696_v12 = vpop.permute.xlu1 %695 }
 0xc6e   :  { %v701_v13 = vadd.f32 %v696_v12, %v587_v53 }
 0xc6f   :  { %v698_v14 = vpop.permute.xlu0 %697 }
 0xc70   :  { %2744 = vtanh.f32 %v701_v13  ;;  %v702_v15 = vadd.f32 %v698_v14, %v588_v54 }
 0xc72   :  { %2746 = vtanh.f32 %v702_v15 }
 0xc7d   :  { %v2745_v16 = vpop.eup %2744 }
 0xc7e   :  { %709 = vrot.lane.b32.xlu1 %v2745_v16, %s2955_s20 }
 0xc7f   :  { %v2747_v17 = vpop.eup %2746 }
 0xc80   :  { %711 = vrot.lane.b32.xlu0 %v2747_v17, %s2955_s20 }
 0xcf0   :  { %v710_v18 = vpop.permute.xlu1 %709 }
 0xcf1   :  { %v715_v23 = vmul.f32 %v710_v18, %v705_v19 }
 0xcf2   :  { %v712_v21 = vpop.permute.xlu0 %711 }
 0xcf3   :  { %v716_v25 = vmul.f32 %v712_v21, %v706_v20  ;;  %v3197_v28 = vadd.f32 %v717_v26, %v715_v23  ;;  %v855_v20 = vld [vmem:[%s3596_s0 + $0x6] sm:$0x1]  ;;  %v856_v21 = vld [vmem:[%s3596_s0 + $0x16] sm:$0x1] }
 0xcf5   :  { %v720_v27 = vadd.f32 %v718_v24, %v716_v25 }
 0xcf7   :  { %v725_v29 = vrot.slane %v720_v27, 7 }
 0xcf9   :  { %v726_v30 = vsel %vm189_vm1, %v725_v29, %v3197_v28 }
 0xcfa   :  { %727 = vrot.lane.b32.xlu0 %v726_v30, %s2955_s20 }
 0xd6c   :  { %v728_v31 = vpop.permute.xlu0 %727 }
 0xd6d   :  { %2568 = vmatmul.mubr.msk.f32.vlgmr.msra.gmra.mxu1 %vm56_vm2, %v728_v31 }
 0xd6e   :  { %2582 = vmatpush3.msra.mxu1 %v3005_v0  ;;  %2589 = vmatprep.mubr.msk.f32.mxu1 %vm2953_vm0, %v2952_v1 }
 0xd6f   :  { %2583 = vmatprep.subr.mxu1 %v2952_v1 }
 0xd70   :  { %2584 = vmatpush3.msra.mxu1 %v3011_v2 }
 0xd71   :  { %2585 = vmatprep.subr.mxu1 %v2952_v1 }
 0xd72   :  { %2586 = vmatpush3.msra.mxu1 %v3021_v3 }
 0xd73   :  { %2587 = vmatprep.subr.mxu1 %v2952_v1 }
 0xd74   :  { %2588 = vmatpush3.msra.mxu1 %v3030_v4 }
 0xd75   :  { %2603 = vmatprep.subr.mxu1 %v2952_v1 }
 0xe2d   :  { %v797_v32 = vpop.f32.mrf.mxu1 }
 0xe2e   :  { %v798_v33 = vadd.f32 %v3058_v5, %v797_v32 }
 0xe2f   :  { %v2569_v34 = vpop.f32.mrf.mxu1 }
 0xe30   :  { %819 = vrot.lane.b32.xlu0 %v798_v33, %s2954_s15  ;;  %v802_v35 = vrot.slane %v798_v33, 1  ;;  %v805_v38 = vadd.f32 %v798_v33, %v721_v36 }
 0xe32   :  { %821 = vrot.lane.b32.xlu1 %v802_v35, %s2954_s15  ;;  %v806_v39 = vadd.f32 %v802_v35, %v722_v37  ;;  %v2386_v40 = vmul.f32 -1.442695, %v805_v38 }
 0xe34   :  { %v2387_v41 = vmul.f32 -1.442695, %v806_v39  ;;  %2748 = vpow2.f32 %v2386_v40 }
 0xe36   :  { %2750 = vpow2.f32 %v2387_v41 }
 0xe41   :  { %v2749_v43 = vpop.eup %2748 }
 0xe42   :  { %v813_v46 = vadd.f32 1.0, %v2749_v43 }
 0xe43   :  { %v2751_v44 = vpop.eup %2750 }
 0xe44   :  { %v814_v47 = vadd.f32 1.0, %v2751_v44  ;;  %2752 = vrcp.f32 %v813_v46 }
 0xe46   :  { %2754 = vrcp.f32 %v814_v47 }
 0xe51   :  { %v2753_v48 = vpop.eup %2752 }
 0xe52   :  { %v839_v61 = vsub.f32 1.0, %v2753_v48  ;;  %v851_v10 = vmul.f32 %v2753_v48, %v3197_v28 }
 0xe53   :  { %v2755_v51 = vpop.eup %2754 }
 0xe54   :  { %v840_v63 = vsub.f32 1.0, %v2755_v51  ;;  %v852_v8 = vmul.f32 %v2755_v51, %v720_v27 }
 0xea2   :  { %v820_v49 = vpop.permute.xlu0 %819 }
 0xea3   :  { %v825_v50 = vmul.f32 %v2753_v48, %v820_v49 }
 0xea4   :  { %v822_v52 = vpop.permute.xlu1 %821 }
 0xea5   :  { %v826_v53 = vmul.f32 %v2755_v51, %v822_v52  ;;  %829 = vrot.lane.b32.xlu0 %v825_v50, %s2954_s15 }
 0xea7   :  { %831 = vrot.lane.b32.xlu1 %v826_v53, %s2954_s15 }
 0xf17   :  { %v830_v54 = vpop.permute.xlu0 %829 }
 0xf18   :  { %v835_v55 = vadd.f32 %v830_v54, %v721_v36 }
 0xf19   :  { %v832_v56 = vpop.permute.xlu1 %831 }
 0xf1a   :  { %2756 = vtanh.f32 %v835_v55  ;;  %v836_v57 = vadd.f32 %v832_v56, %v722_v37 }
 0xf1c   :  { %2758 = vtanh.f32 %v836_v57 }
 0xf27   :  { %v2757_v58 = vpop.eup %2756 }
 0xf28   :  { %843 = vrot.lane.b32.xlu0 %v2757_v58, %s2955_s20 }
 0xf29   :  { %v2759_v59 = vpop.eup %2758 }
 0xf2a   :  { %845 = vrot.lane.b32.xlu1 %v2759_v59, %s2955_s20 }
 0xf9a   :  { %v844_v60 = vpop.permute.xlu0 %843 }
 0xf9b   :  { %v849_v7 = vmul.f32 %v844_v60, %v839_v61 }
 0xf9c   :  { %v846_v6 = vpop.permute.xlu1 %845 }
 0xf9d   :  { %v850_v9 = vmul.f32 %v846_v6, %v840_v63  ;;  %v3227_v12 = vadd.f32 %v851_v10, %v849_v7 }
 0xf9f   :  { %v854_v11 = vadd.f32 %v852_v8, %v850_v9 }
 0xfa1   :  { %v859_v13 = vrot.slane %v854_v11, 7 }
 0xfa3   :  { %v860_v14 = vsel %vm189_vm1, %v859_v13, %v3227_v12 }
 0xfa4   :  { %861 = vrot.lane.b32.xlu1 %v860_v14, %s2955_s20 }
0x1016   :  { %v862_v15 = vpop.permute.xlu1 %861 }
0x1017   :  { %2579 = vmatmul.mubr.msk.f32.vlgmr.msra.gmra.mxu0 %vm56_vm2, %v862_v15 }
0x1018   :  { %2593 = vmatpush3.msra.mxu0 %v3005_v0  ;;  %2600 = vmatprep.mubr.msk.f32.mxu0 %vm2953_vm0, %v2952_v1 }
0x1019   :  { %2594 = vmatprep.subr.mxu0 %v2952_v1 }
0x101a   :  { %2595 = vmatpush3.msra.mxu0 %v3011_v2 }
0x101b   :  { %2596 = vmatprep.subr.mxu0 %v2952_v1 }
0x101c   :  { %2597 = vmatpush3.msra.mxu0 %v3021_v3 }
0x101d   :  { %2598 = vmatprep.subr.mxu0 %v2952_v1 }
0x101e   :  { %2599 = vmatpush3.msra.mxu0 %v3030_v4 }
0x101f   :  { %2614 = vmatprep.subr.mxu0 %v2952_v1 }
0x10d7   :  { %v931_v16 = vpop.f32.mrf.mxu0 }
0x10d8   :  { %v932_v17 = vadd.f32 %v3058_v5, %v931_v16 }
0x10d9   :  { %v2580_v18 = vpop.f32.mrf.mxu0 }
0x10da   :  { %953 = vrot.lane.b32.xlu1 %v932_v17, %s2954_s15  ;;  %v936_v19 = vrot.slane %v932_v17, 1  ;;  %v939_v23 = vadd.f32 %v932_v17, %v855_v20 }
0x10dc   :  { %955 = vrot.lane.b32.xlu0 %v936_v19, %s2954_s15  ;;  %v940_v24 = vadd.f32 %v936_v19, %v856_v21  ;;  %v2389_v25 = vmul.f32 -1.442695, %v939_v23 }
0x10de   :  { %v2390_v26 = vmul.f32 -1.442695, %v940_v24  ;;  %2760 = vpow2.f32 %v2389_v25 }
0x10e0   :  { %2762 = vpow2.f32 %v2390_v26 }
0x10eb   :  { %v2761_v27 = vpop.eup %2760 }
0x10ec   :  { %v947_v30 = vadd.f32 1.0, %v2761_v27 }
0x10ed   :  { %v2763_v29 = vpop.eup %2762 }
0x10ee   :  { %v948_v31 = vadd.f32 1.0, %v2763_v29  ;;  %2764 = vrcp.f32 %v947_v30 }
0x10f0   :  { %2766 = vrcp.f32 %v948_v31 }
0x10fb   :  { %v2765_v32 = vpop.eup %2764 }
0x10fc   :  { %v973_v47 = vsub.f32 1.0, %v2765_v32  ;;  %v985_v53 = vmul.f32 %v2765_v32, %v3227_v12 }
0x10fd   :  { %v2767_v35 = vpop.eup %2766 }
0x10fe   :  { %v974_v48 = vsub.f32 1.0, %v2767_v35  ;;  %v986_v51 = vmul.f32 %v2767_v35, %v854_v11 }
0x114c   :  { %v954_v33 = vpop.permute.xlu1 %953 }
0x114d   :  { %v959_v34 = vmul.f32 %v2765_v32, %v954_v33 }
0x114e   :  { %v956_v36 = vpop.permute.xlu0 %955 }
0x114f   :  { %v960_v37 = vmul.f32 %v2767_v35, %v956_v36  ;;  %963 = vrot.lane.b32.xlu1 %v959_v34, %s2954_s15 }
0x1151   :  { %965 = vrot.lane.b32.xlu0 %v960_v37, %s2954_s15 }
0x11c1   :  { %v964_v38 = vpop.permute.xlu1 %963 }
0x11c2   :  { %v969_v39 = vadd.f32 %v964_v38, %v855_v20 }
0x11c3   :  { %v966_v40 = vpop.permute.xlu0 %965 }
0x11c4   :  { %2768 = vtanh.f32 %v969_v39  ;;  %v970_v41 = vadd.f32 %v966_v40, %v856_v21  ;;  %v3299_v40 = vld [vmem:[%s3597_s1 + $0x18] sm:$0xff] }
0x11c6   :  { %2770 = vtanh.f32 %v970_v41  ;;  %v3308_v41 = vld [vmem:[%s3597_s1 + $0x10] sm:$0xff] }
0x11d1   :  { %v2769_v43 = vpop.eup %2768 }
0x11d2   :  { %977 = vrot.lane.b32.xlu1 %v2769_v43, %s2955_s20  ;;  %v3315_v43 = vld [vmem:[%s3597_s1 + $0x8] sm:$0xff] }
0x11d3   :  { %v2771_v44 = vpop.eup %2770 }
0x11d4   :  { %979 = vrot.lane.b32.xlu0 %v2771_v44, %s2955_s20  ;;  %v3322_v44 = vld [vmem:[%s3597_s1] sm:$0xff] }
0x1244   :  { %v978_v46 = vpop.permute.xlu1 %977 }
0x1245   :  { %v983_v50 = vmul.f32 %v978_v46, %v973_v47 }
0x1246   :  { %v980_v49 = vpop.permute.xlu0 %979 }
0x1247   :  { %v984_v52 = vmul.f32 %v980_v49, %v974_v48  ;;  %v3257_v55 = vadd.f32 %v985_v53, %v983_v50  ;;  %v1123_v50 = vld [vmem:[%s3596_s0 + $0x8] sm:$0x1] }
0x1249   :  { %v988_v54 = vadd.f32 %v986_v51, %v984_v52  ;;  %v1124_v51 = vld [vmem:[%s3596_s0 + $0x18] sm:$0x1] }
0x124b   :  { %v993_v56 = vrot.slane %v988_v54, 7 }
0x124d   :  { %v994_v57 = vsel %vm189_vm1, %v993_v56, %v3257_v55 }
0x124e   :  { %995 = vrot.lane.b32.xlu0 %v994_v57, %s2955_s20 }
0x12c0   :  { %v996_v58 = vpop.permute.xlu0 %995 }
0x12c1   :  { %2590 = vmatmul.mubr.msk.f32.vlgmr.msra.gmra.mxu1 %vm56_vm2, %v996_v58 }
0x12c2   :  { %2604 = vmatpush3.msra.mxu1 %v3005_v0  ;;  %2611 = vmatprep.mubr.msk.f32.mxu1 %vm2953_vm0, %v2952_v1 }
0x12c3   :  { %2605 = vmatprep.subr.mxu1 %v2952_v1 }
0x12c4   :  { %2606 = vmatpush3.msra.mxu1 %v3011_v2  ;;  %v989_v2 = vld [vmem:[%s3596_s0 + $0x7] sm:$0x1] }
0x12c5   :  { %2607 = vmatprep.subr.mxu1 %v2952_v1 }
0x12c6   :  { %2608 = vmatpush3.msra.mxu1 %v3021_v3  ;;  %v990_v3 = vld [vmem:[%s3596_s0 + $0x17] sm:$0x1] }
0x12c7   :  { %2609 = vmatprep.subr.mxu1 %v2952_v1 }
0x12c8   :  { %2610 = vmatpush3.msra.mxu1 %v3030_v4 }
0x12c9   :  { %2625 = vmatprep.subr.mxu1 %v2952_v1 }
0x1381   :  { %v1065_v59 = vpop.f32.mrf.mxu1 }
0x1382   :  { %v1066_v0 = vadd.f32 %v3058_v5, %v1065_v59 }
0x1383   :  { %v2591_v60 = vpop.f32.mrf.mxu1 }
0x1384   :  { %1087 = vrot.lane.b32.xlu0 %v1066_v0, %s2954_s15  ;;  %v1070_v61 = vrot.slane %v1066_v0, 1  ;;  %v1073_v4 = vadd.f32 %v1066_v0, %v989_v2 }
0x1386   :  { %1089 = vrot.lane.b32.xlu1 %v1070_v61, %s2954_s15  ;;  %v1074_v63 = vadd.f32 %v1070_v61, %v990_v3  ;;  %v2392_v6 = vmul.f32 -1.442695, %v1073_v4 }
0x1388   :  { %v2393_v7 = vmul.f32 -1.442695, %v1074_v63  ;;  %2772 = vpow2.f32 %v2392_v6 }
0x138a   :  { %2774 = vpow2.f32 %v2393_v7 }
0x1395   :  { %v2773_v8 = vpop.eup %2772 }
0x1396   :  { %v1081_v10 = vadd.f32 1.0, %v2773_v8 }
0x1397   :  { %v2775_v9 = vpop.eup %2774 }
0x1398   :  { %v1082_v11 = vadd.f32 1.0, %v2775_v9  ;;  %2776 = vrcp.f32 %v1081_v10 }
0x139a   :  { %2778 = vrcp.f32 %v1082_v11 }
0x13a5   :  { %v2777_v13 = vpop.eup %2776 }
0x13a6   :  { %v1107_v27 = vsub.f32 1.0, %v2777_v13  ;;  %v1119_v34 = vmul.f32 %v2777_v13, %v3257_v55 }
0x13a7   :  { %v2779_v16 = vpop.eup %2778 }
0x13a8   :  { %v1108_v29 = vsub.f32 1.0, %v2779_v16  ;;  %v1120_v32 = vmul.f32 %v2779_v16, %v988_v54 }
0x13f6   :  { %v1088_v14 = vpop.permute.xlu0 %1087 }
0x13f7   :  { %v1093_v15 = vmul.f32 %v2777_v13, %v1088_v14 }
0x13f8   :  { %v1090_v17 = vpop.permute.xlu1 %1089 }
0x13f9   :  { %v1094_v18 = vmul.f32 %v2779_v16, %v1090_v17  ;;  %1097 = vrot.lane.b32.xlu0 %v1093_v15, %s2954_s15 }
0x13fb   :  { %1099 = vrot.lane.b32.xlu1 %v1094_v18, %s2954_s15 }
0x146b   :  { %v1098_v19 = vpop.permute.xlu0 %1097 }
0x146c   :  { %v1103_v20 = vadd.f32 %v1098_v19, %v989_v2 }
0x146d   :  { %v1100_v21 = vpop.permute.xlu1 %1099 }
0x146e   :  { %2780 = vtanh.f32 %v1103_v20  ;;  %v1104_v23 = vadd.f32 %v1100_v21, %v990_v3 }
0x1470   :  { %2782 = vtanh.f32 %v1104_v23 }
0x147b   :  { %v2781_v24 = vpop.eup %2780 }
0x147c   :  { %1111 = vrot.lane.b32.xlu0 %v2781_v24, %s2955_s20 }
0x147d   :  { %v2783_v25 = vpop.eup %2782 }
0x147e   :  { %1113 = vrot.lane.b32.xlu1 %v2783_v25, %s2955_s20 }
0x14ee   :  { %v1112_v26 = vpop.permute.xlu0 %1111 }
0x14ef   :  { %v1117_v31 = vmul.f32 %v1112_v26, %v1107_v27  ;;  %v3360_v27 = vld [vmem:[%s3598_s2] ss:$0 sm:$0xff]  ;;  %s2956_s2 = smov 32  }
0x14f0   :  { %v1114_v30 = vpop.permute.xlu1 %1113 }
0x14f1   :  { %v1118_v33 = vmul.f32 %v1114_v30, %v1108_v29  ;;  %v3289_v36 = vadd.f32 %v1119_v34, %v1117_v31 }
0x14f3   :  { %v3287_v35 = vadd.f32 %v1120_v32, %v1118_v33  ;;  %v1257_v32 = vld [vmem:[%s3596_s0 + $0x9] sm:$0x1]  ;;  %v1258_v33 = vld [vmem:[%s3596_s0 + $0x19] sm:$0x1] }
0x14f5   :  { %v1127_v37 = vrot.slane %v3287_v35, 7 }
0x14f7   :  { %v1128_v38 = vsel %vm189_vm1, %v1127_v37, %v3289_v36 }
0x14f8   :  { %1129 = vrot.lane.b32.xlu1 %v1128_v38, %s2955_s20 }
0x156a   :  { %v1130_v39 = vpop.permute.xlu1 %1129 }
0x156b   :  { %2601 = vmatmul.mubr.msk.f32.vlgmr.msra.gmra.mxu0 %vm56_vm2, %v1130_v39 }
0x156c   :  { %2615 = vmatpush3.msra.mxu0 %v3299_v40  ;;  %2622 = vmatprep.mubr.msk.f32.mxu0 %vm2953_vm0, %v2952_v1 }
0x156d   :  { %2616 = vmatprep.subr.mxu0 %v2952_v1 }
0x156e   :  { %2617 = vmatpush3.msra.mxu0 %v3308_v41 }
0x156f   :  { %2618 = vmatprep.subr.mxu0 %v2952_v1 }
0x1570   :  { %2619 = vmatpush3.msra.mxu0 %v3315_v43 }
0x1571   :  { %2620 = vmatprep.subr.mxu0 %v2952_v1 }
0x1572   :  { %2621 = vmatpush3.msra.mxu0 %v3322_v44 }
0x1573   :  { %2636 = vmatprep.subr.mxu0 %v2952_v1 }
0x162b   :  { %v1199_v46 = vpop.f32.mrf.mxu0 }
0x162c   :  { %v1200_v47 = vadd.f32 %v3058_v5, %v1199_v46 }
0x162d   :  { %v2602_v48 = vpop.f32.mrf.mxu0 }
0x162e   :  { %1221 = vrot.lane.b32.xlu1 %v1200_v47, %s2954_s15  ;;  %v1204_v49 = vrot.slane %v1200_v47, 1  ;;  %v1207_v52 = vadd.f32 %v1200_v47, %v1123_v50 }
0x1630   :  { %1223 = vrot.lane.b32.xlu0 %v1204_v49, %s2954_s15  ;;  %v1208_v53 = vadd.f32 %v1204_v49, %v1124_v51  ;;  %v2395_v54 = vmul.f32 -1.442695, %v1207_v52 }
0x1632   :  { %v2396_v56 = vmul.f32 -1.442695, %v1208_v53  ;;  %2784 = vpow2.f32 %v2395_v54 }
0x1634   :  { %2786 = vpow2.f32 %v2396_v56 }
0x163f   :  { %v2785_v5 = vpop.eup %2784 }
0x1640   :  { %v1215_v58 = vadd.f32 1.0, %v2785_v5 }
0x1641   :  { %v2787_v57 = vpop.eup %2786 }
0x1642   :  { %v1216_v59 = vadd.f32 1.0, %v2787_v57  ;;  %2788 = vrcp.f32 %v1215_v58 }
0x1644   :  { %2790 = vrcp.f32 %v1216_v59 }
0x164f   :  { %v2789_v0 = vpop.eup %2788 }
0x1650   :  { %v1241_v13 = vsub.f32 1.0, %v2789_v0  ;;  %v1253_v19 = vmul.f32 %v2789_v0, %v3289_v36 }
0x1651   :  { %v2791_v2 = vpop.eup %2790 }
0x1652   :  { %v1242_v14 = vsub.f32 1.0, %v2791_v2  ;;  %v1254_v17 = vmul.f32 %v2791_v2, %v3287_v35 }
0x16a0   :  { %v1222_v60 = vpop.permute.xlu1 %1221 }
0x16a1   :  { %v1227_v61 = vmul.f32 %v2789_v0, %v1222_v60 }
0x16a2   :  { %v1224_v3 = vpop.permute.xlu0 %1223 }
0x16a3   :  { %v1228_v4 = vmul.f32 %v2791_v2, %v1224_v3  ;;  %1231 = vrot.lane.b32.xlu1 %v1227_v61, %s2954_s15 }
0x16a5   :  { %1233 = vrot.lane.b32.xlu0 %v1228_v4, %s2954_s15 }
0x1715   :  { %v1232_v63 = vpop.permute.xlu1 %1231 }
0x1716   :  { %v1237_v6 = vadd.f32 %v1232_v63, %v1123_v50 }
0x1717   :  { %v1234_v7 = vpop.permute.xlu0 %1233 }
0x1718   :  { %2792 = vtanh.f32 %v1237_v6  ;;  %v1238_v8 = vadd.f32 %v1234_v7, %v1124_v51 }
0x171a   :  { %2794 = vtanh.f32 %v1238_v8 }
0x1725   :  { %v2793_v9 = vpop.eup %2792 }
0x1726   :  { %1245 = vrot.lane.b32.xlu1 %v2793_v9, %s2955_s20 }
0x1727   :  { %v2795_v10 = vpop.eup %2794 }
0x1728   :  { %1247 = vrot.lane.b32.xlu0 %v2795_v10, %s2955_s20 }
0x1798   :  { %v1246_v11 = vpop.permute.xlu1 %1245 }
0x1799   :  { %v1251_v16 = vmul.f32 %v1246_v11, %v1241_v13 }
0x179a   :  { %v1248_v15 = vpop.permute.xlu0 %1247 }
0x179b   :  { %v1252_v18 = vmul.f32 %v1248_v15, %v1242_v14  ;;  %v3341_v21 = vadd.f32 %v1253_v19, %v1251_v16  ;;  %v1392_v19 = vld [vmem:[%s3596_s0 + $0x1a] sm:$0x1] }
0x179d   :  { %v1256_v20 = vadd.f32 %v1254_v17, %v1252_v18  ;;  %v1391_v18 = vld [vmem:[%s3596_s0 + $0xa] sm:$0x1] }
0x179f   :  { %v1261_v23 = vrot.slane %v1256_v20, 7 }
0x17a1   :  { %v1262_v24 = vsel %vm189_vm1, %v1261_v23, %v3341_v21 }
0x17a2   :  { %1263 = vrot.lane.b32.xlu0 %v1262_v24, %s2955_s20 }
0x1814   :  { %v1264_v25 = vpop.permute.xlu0 %1263 }
0x1815   :  { %2612 = vmatmul.mubr.msk.f32.vlgmr.msra.gmra.mxu1 %vm56_vm2, %v1264_v25 }
0x1816   :  { %2626 = vmatpush3.msra.mxu1 %v3299_v40  ;;  %2633 = vmatprep.mubr.msk.f32.mxu1 %vm2953_vm0, %v2952_v1 }
0x1817   :  { %2627 = vmatprep.subr.mxu1 %v2952_v1 }
0x1818   :  { %2628 = vmatpush3.msra.mxu1 %v3308_v41 }
0x1819   :  { %2629 = vmatprep.subr.mxu1 %v2952_v1 }
0x181a   :  { %2630 = vmatpush3.msra.mxu1 %v3315_v43 }
0x181b   :  { %2631 = vmatprep.subr.mxu1 %v2952_v1 }
0x181c   :  { %2632 = vmatpush3.msra.mxu1 %v3322_v44 }
0x181d   :  { %2647 = vmatprep.subr.mxu1 %v2952_v1 }
0x18d5   :  { %v1333_v26 = vpop.f32.mrf.mxu1 }
0x18d6   :  { %v1334_v29 = vadd.f32 %v3360_v27, %v1333_v26 }
0x18d7   :  { %v2613_v30 = vpop.f32.mrf.mxu1 }
0x18d8   :  { %1355 = vrot.lane.b32.xlu0 %v1334_v29, %s2954_s15  ;;  %v1338_v31 = vrot.slane %v1334_v29, 1  ;;  %v1341_v34 = vadd.f32 %v1334_v29, %v1257_v32 }
0x18da   :  { %1357 = vrot.lane.b32.xlu1 %v1338_v31, %s2954_s15  ;;  %v1342_v35 = vadd.f32 %v1338_v31, %v1258_v33  ;;  %v2398_v37 = vmul.f32 -1.442695, %v1341_v34 }
0x18dc   :  { %v2399_v38 = vmul.f32 -1.442695, %v1342_v35  ;;  %2796 = vpow2.f32 %v2398_v37 }
0x18de   :  { %2798 = vpow2.f32 %v2399_v38 }
0x18e9   :  { %v2797_v39 = vpop.eup %2796 }
0x18ea   :  { %v1349_v47 = vadd.f32 1.0, %v2797_v39 }
0x18eb   :  { %v2799_v46 = vpop.eup %2798 }
0x18ec   :  { %v1350_v48 = vadd.f32 1.0, %v2799_v46  ;;  %2800 = vrcp.f32 %v1349_v47 }
0x18ee   :  { %2802 = vrcp.f32 %v1350_v48 }
0x18f9   :  { %v2801_v49 = vpop.eup %2800 }
0x18fa   :  { %v1375_v61 = vsub.f32 1.0, %v2801_v49  ;;  %v1387_v7 = vmul.f32 %v2801_v49, %v3341_v21 }
0x18fb   :  { %v2803_v52 = vpop.eup %2802 }
0x18fc   :  { %v1376_v2 = vsub.f32 1.0, %v2803_v52  ;;  %v1388_v63 = vmul.f32 %v2803_v52, %v1256_v20 }
0x194a   :  { %v1356_v50 = vpop.permute.xlu0 %1355 }
0x194b   :  { %v1361_v51 = vmul.f32 %v2801_v49, %v1356_v50 }
0x194c   :  { %v1358_v53 = vpop.permute.xlu1 %1357 }
0x194d   :  { %v1362_v54 = vmul.f32 %v2803_v52, %v1358_v53  ;;  %1365 = vrot.lane.b32.xlu0 %v1361_v51, %s2954_s15 }
0x194f   :  { %1367 = vrot.lane.b32.xlu1 %v1362_v54, %s2954_s15 }
0x19bf   :  { %v1366_v56 = vpop.permute.xlu0 %1365 }
0x19c0   :  { %v1371_v5 = vadd.f32 %v1366_v56, %v1257_v32 }
0x19c1   :  { %v1368_v57 = vpop.permute.xlu1 %1367 }
0x19c2   :  { %2804 = vtanh.f32 %v1371_v5  ;;  %v1372_v58 = vadd.f32 %v1368_v57, %v1258_v33 }
0x19c4   :  { %2806 = vtanh.f32 %v1372_v58 }
0x19cf   :  { %v2805_v59 = vpop.eup %2804 }
0x19d0   :  { %1379 = vrot.lane.b32.xlu0 %v2805_v59, %s2955_s20 }
0x19d1   :  { %v2807_v0 = vpop.eup %2806 }
0x19d2   :  { %1381 = vrot.lane.b32.xlu1 %v2807_v0, %s2955_s20 }
0x1a42   :  { %v1380_v60 = vpop.permute.xlu0 %1379 }
0x1a43   :  { %v1385_v4 = vmul.f32 %v1380_v60, %v1375_v61 }
0x1a44   :  { %v1382_v3 = vpop.permute.xlu1 %1381 }
0x1a45   :  { %v1386_v6 = vmul.f32 %v1382_v3, %v1376_v2  ;;  %v3376_v9 = vadd.f32 %v1387_v7, %v1385_v4  ;;  %v1525_v7 = vld [vmem:[%s3596_s0 + $0xb] sm:$0x1] }
0x1a47   :  { %v1390_v8 = vadd.f32 %v1388_v63, %v1386_v6 }
0x1a49   :  { %v1395_v10 = vrot.slane %v1390_v8, 7 }
0x1a4b   :  { %v1396_v11 = vsel %vm189_vm1, %v1395_v10, %v3376_v9 }
0x1a4c   :  { %1397 = vrot.lane.b32.xlu1 %v1396_v11, %s2955_s20 }
0x1abe   :  { %v1398_v13 = vpop.permute.xlu1 %1397 }
0x1abf   :  { %2623 = vmatmul.mubr.msk.f32.vlgmr.msra.gmra.mxu0 %vm56_vm2, %v1398_v13 }
0x1ac0   :  { %2637 = vmatpush3.msra.mxu0 %v3299_v40  ;;  %2644 = vmatprep.mubr.msk.f32.mxu0 %vm2953_vm0, %v2952_v1 }
0x1ac1   :  { %2638 = vmatprep.subr.mxu0 %v2952_v1 }
0x1ac2   :  { %2639 = vmatpush3.msra.mxu0 %v3308_v41 }
0x1ac3   :  { %2640 = vmatprep.subr.mxu0 %v2952_v1 }
0x1ac4   :  { %2641 = vmatpush3.msra.mxu0 %v3315_v43 }
0x1ac5   :  { %2642 = vmatprep.subr.mxu0 %v2952_v1 }
0x1ac6   :  { %2643 = vmatpush3.msra.mxu0 %v3322_v44 }
0x1ac7   :  { %2658 = vmatprep.subr.mxu0 %v2952_v1 }
0x1b7f   :  { %v1467_v14 = vpop.f32.mrf.mxu0 }
0x1b80   :  { %v1468_v15 = vadd.f32 %v3360_v27, %v1467_v14 }
0x1b81   :  { %v2624_v16 = vpop.f32.mrf.mxu0 }
0x1b82   :  { %1489 = vrot.lane.b32.xlu1 %v1468_v15, %s2954_s15  ;;  %v1472_v17 = vrot.slane %v1468_v15, 1  ;;  %v1475_v20 = vadd.f32 %v1468_v15, %v1391_v18 }
0x1b84   :  { %1491 = vrot.lane.b32.xlu0 %v1472_v17, %s2954_s15  ;;  %v1476_v23 = vadd.f32 %v1472_v17, %v1392_v19  ;;  %v2401_v24 = vmul.f32 -1.442695, %v1475_v20 }
0x1b86   :  { %v2402_v25 = vmul.f32 -1.442695, %v1476_v23  ;;  %2808 = vpow2.f32 %v2401_v24 }
0x1b88   :  { %2810 = vpow2.f32 %v2402_v25 }
0x1b93   :  { %v2809_v26 = vpop.eup %2808 }
0x1b94   :  { %v1483_v30 = vadd.f32 1.0, %v2809_v26 }
0x1b95   :  { %v2811_v29 = vpop.eup %2810 }
0x1b96   :  { %v1484_v31 = vadd.f32 1.0, %v2811_v29  ;;  %2812 = vrcp.f32 %v1483_v30 }
0x1b98   :  { %2814 = vrcp.f32 %v1484_v31 }
0x1ba3   :  { %v2813_v32 = vpop.eup %2812 }
0x1ba4   :  { %v1509_v52 = vsub.f32 1.0, %v2813_v32  ;;  %v1521_v58 = vmul.f32 %v2813_v32, %v3376_v9 }
0x1ba5   :  { %v2815_v35 = vpop.eup %2814 }
0x1ba6   :  { %v1510_v53 = vsub.f32 1.0, %v2815_v35  ;;  %v1522_v5 = vmul.f32 %v2815_v35, %v1390_v8  ;;  %v1526_v8 = vld [vmem:[%s3596_s0 + $0x1b] sm:$0x1] }
0x1bf4   :  { %v1490_v33 = vpop.permute.xlu1 %1489 }
0x1bf5   :  { %v1495_v34 = vmul.f32 %v2813_v32, %v1490_v33 }
0x1bf6   :  { %v1492_v37 = vpop.permute.xlu0 %1491 }
0x1bf7   :  { %v1496_v38 = vmul.f32 %v2815_v35, %v1492_v37  ;;  %1499 = vrot.lane.b32.xlu1 %v1495_v34, %s2954_s15 }
0x1bf9   :  { %1501 = vrot.lane.b32.xlu0 %v1496_v38, %s2954_s15 }
0x1c69   :  { %v1500_v39 = vpop.permute.xlu1 %1499 }
0x1c6a   :  { %v1505_v46 = vadd.f32 %v1500_v39, %v1391_v18 }
0x1c6b   :  { %v1502_v47 = vpop.permute.xlu0 %1501 }
0x1c6c   :  { %2816 = vtanh.f32 %v1505_v46  ;;  %v1506_v48 = vadd.f32 %v1502_v47, %v1392_v19 }
0x1c6e   :  { %2818 = vtanh.f32 %v1506_v48 }
0x1c79   :  { %v2817_v49 = vpop.eup %2816 }
0x1c7a   :  { %1513 = vrot.lane.b32.xlu1 %v2817_v49, %s2955_s20 }
0x1c7b   :  { %v2819_v50 = vpop.eup %2818 }
0x1c7c   :  { %1515 = vrot.lane.b32.xlu0 %v2819_v50, %s2955_s20 }
0x1cec   :  { %v1514_v51 = vpop.permute.xlu1 %1513 }
0x1ced   :  { %v1519_v56 = vmul.f32 %v1514_v51, %v1509_v52 }
0x1cee   :  { %v1516_v54 = vpop.permute.xlu0 %1515 }
0x1cef   :  { %v1520_v57 = vmul.f32 %v1516_v54, %v1510_v53  ;;  %v3406_v0 = vadd.f32 %v1521_v58, %v1519_v56 }
0x1cf1   :  { %v1524_v59 = vadd.f32 %v1522_v5, %v1520_v57 }
0x1cf3   :  { %v1529_v60 = vrot.slane %v1524_v59, 7 }
0x1cf5   :  { %v1530_v61 = vsel %vm189_vm1, %v1529_v60, %v3406_v0  ;;  %v1660_v60 = vld [vmem:[%s3596_s0 + $0x1c] sm:$0x1] }
0x1cf6   :  { %1531 = vrot.lane.b32.xlu0 %v1530_v61, %s2955_s20 }
0x1d68   :  { %v1532_v2 = vpop.permute.xlu0 %1531 }
0x1d69   :  { %2634 = vmatmul.mubr.msk.f32.vlgmr.msra.gmra.mxu1 %vm56_vm2, %v1532_v2 }
0x1d6a   :  { %2648 = vmatpush3.msra.mxu1 %v3299_v40  ;;  %2655 = vmatprep.mubr.msk.f32.mxu1 %vm2953_vm0, %v2952_v1 }
0x1d6b   :  { %2649 = vmatprep.subr.mxu1 %v2952_v1 }
0x1d6c   :  { %2650 = vmatpush3.msra.mxu1 %v3308_v41 }
0x1d6d   :  { %2651 = vmatprep.subr.mxu1 %v2952_v1 }
0x1d6e   :  { %2652 = vmatpush3.msra.mxu1 %v3315_v43 }
0x1d6f   :  { %2653 = vmatprep.subr.mxu1 %v2952_v1 }
0x1d70   :  { %2654 = vmatpush3.msra.mxu1 %v3322_v44 }
0x1d71   :  { %2669 = vmatprep.subr.mxu1 %v2952_v1 }
0x1e29   :  { %v1601_v3 = vpop.f32.mrf.mxu1 }
0x1e2a   :  { %v1602_v4 = vadd.f32 %v3360_v27, %v1601_v3 }
0x1e2b   :  { %v2635_v63 = vpop.f32.mrf.mxu1 }
0x1e2c   :  { %1623 = vrot.lane.b32.xlu0 %v1602_v4, %s2954_s15  ;;  %v1606_v6 = vrot.slane %v1602_v4, 1  ;;  %v1609_v10 = vadd.f32 %v1602_v4, %v1525_v7 }
0x1e2e   :  { %1625 = vrot.lane.b32.xlu1 %v1606_v6, %s2954_s15  ;;  %v1610_v11 = vadd.f32 %v1606_v6, %v1526_v8  ;;  %v2404_v13 = vmul.f32 -1.442695, %v1609_v10 }
0x1e30   :  { %v2405_v14 = vmul.f32 -1.442695, %v1610_v11  ;;  %2820 = vpow2.f32 %v2404_v13 }
0x1e32   :  { %2822 = vpow2.f32 %v2405_v14 }
0x1e3d   :  { %v2821_v15 = vpop.eup %2820 }
0x1e3e   :  { %v1617_v17 = vadd.f32 1.0, %v2821_v15 }
0x1e3f   :  { %v2823_v16 = vpop.eup %2822 }
0x1e40   :  { %v1618_v18 = vadd.f32 1.0, %v2823_v16  ;;  %2824 = vrcp.f32 %v1617_v17 }
0x1e42   :  { %2826 = vrcp.f32 %v1618_v18 }
0x1e4d   :  { %v2825_v19 = vpop.eup %2824 }
0x1e4e   :  { %v1643_v37 = vsub.f32 1.0, %v2825_v19  ;;  %v1655_v49 = vmul.f32 %v2825_v19, %v3406_v0 }
0x1e4f   :  { %v2827_v24 = vpop.eup %2826 }
0x1e50   :  { %v1644_v38 = vsub.f32 1.0, %v2827_v24  ;;  %v1656_v47 = vmul.f32 %v2827_v24, %v1524_v59  ;;  %v1659_v59 = vld [vmem:[%s3596_s0 + $0xc] sm:$0x1] }
0x1e9e   :  { %v1624_v20 = vpop.permute.xlu0 %1623 }
0x1e9f   :  { %v1629_v23 = vmul.f32 %v2825_v19, %v1624_v20 }
0x1ea0   :  { %v1626_v25 = vpop.permute.xlu1 %1625 }
0x1ea1   :  { %v1630_v26 = vmul.f32 %v2827_v24, %v1626_v25  ;;  %1633 = vrot.lane.b32.xlu0 %v1629_v23, %s2954_s15 }
0x1ea3   :  { %1635 = vrot.lane.b32.xlu1 %v1630_v26, %s2954_s15 }
0x1f13   :  { %v1634_v29 = vpop.permute.xlu0 %1633 }
0x1f14   :  { %v1639_v30 = vadd.f32 %v1634_v29, %v1525_v7 }
0x1f15   :  { %v1636_v31 = vpop.permute.xlu1 %1635 }
0x1f16   :  { %2828 = vtanh.f32 %v1639_v30  ;;  %v1640_v32 = vadd.f32 %v1636_v31, %v1526_v8 }
0x1f18   :  { %2830 = vtanh.f32 %v1640_v32 }
0x1f23   :  { %v2829_v33 = vpop.eup %2828 }
0x1f24   :  { %1647 = vrot.lane.b32.xlu0 %v2829_v33, %s2955_s20 }
0x1f25   :  { %v2831_v34 = vpop.eup %2830 }
0x1f26   :  { %1649 = vrot.lane.b32.xlu1 %v2831_v34, %s2955_s20 }
0x1f96   :  { %v1648_v35 = vpop.permute.xlu0 %1647 }
0x1f97   :  { %v1653_v46 = vmul.f32 %v1648_v35, %v1643_v37 }
0x1f98   :  { %v1650_v39 = vpop.permute.xlu1 %1649 }
0x1f99   :  { %v1654_v48 = vmul.f32 %v1650_v39, %v1644_v38  ;;  %v3436_v51 = vadd.f32 %v1655_v49, %v1653_v46 }
0x1f9b   :  { %v1658_v50 = vadd.f32 %v1656_v47, %v1654_v48 }
0x1f9d   :  { %v1663_v52 = vrot.slane %v1658_v50, 7 }
0x1f9f   :  { %v1664_v53 = vsel %vm189_vm1, %v1663_v52, %v3436_v51 }
0x1fa0   :  { %1665 = vrot.lane.b32.xlu1 %v1664_v53, %s2955_s20 }
0x2012   :  { %v1666_v54 = vpop.permute.xlu1 %1665 }
0x2013   :  { %2645 = vmatmul.mubr.msk.f32.vlgmr.msra.gmra.mxu0 %vm56_vm2, %v1666_v54 }
0x2014   :  { %2659 = vmatpush3.msra.mxu0 %v3299_v40  ;;  %2666 = vmatprep.mubr.msk.f32.mxu0 %vm2953_vm0, %v2952_v1 }
0x2015   :  { %2660 = vmatprep.subr.mxu0 %v2952_v1 }
0x2016   :  { %2661 = vmatpush3.msra.mxu0 %v3308_v41 }
0x2017   :  { %2662 = vmatprep.subr.mxu0 %v2952_v1 }
0x2018   :  { %2663 = vmatpush3.msra.mxu0 %v3315_v43 }
0x2019   :  { %2664 = vmatprep.subr.mxu0 %v2952_v1 }
0x201a   :  { %2665 = vmatpush3.msra.mxu0 %v3322_v44 }
0x20d3   :  { %v1735_v56 = vpop.f32.mrf.mxu0 }
0x20d4   :  { %v1736_v5 = vadd.f32 %v3360_v27, %v1735_v56 }
0x20d5   :  { %v2646_v57 = vpop.f32.mrf.mxu0 }
0x20d6   :  { %1757 = vrot.lane.b32.xlu1 %v1736_v5, %s2954_s15  ;;  %v1740_v58 = vrot.slane %v1736_v5, 1  ;;  %v1743_v61 = vadd.f32 %v1736_v5, %v1659_v59 }
0x20d8   :  { %1759 = vrot.lane.b32.xlu0 %v1740_v58, %s2954_s15  ;;  %v1744_v2 = vadd.f32 %v1740_v58, %v1660_v60  ;;  %v2407_v3 = vmul.f32 -1.442695, %v1743_v61 }
0x20da   :  { %v2408_v4 = vmul.f32 -1.442695, %v1744_v2  ;;  %2832 = vpow2.f32 %v2407_v3 }
0x20dc   :  { %2834 = vpow2.f32 %v2408_v4 }
0x20e7   :  { %v2833_v63 = vpop.eup %2832 }
0x20e8   :  { %v1751_v7 = vadd.f32 1.0, %v2833_v63 }
0x20e9   :  { %v2835_v6 = vpop.eup %2834 }
0x20ea   :  { %v1752_v8 = vadd.f32 1.0, %v2835_v6  ;;  %2836 = vrcp.f32 %v1751_v7 }
0x20ec   :  { %2838 = vrcp.f32 %v1752_v8 }
0x20f7   :  { %v2837_v10 = vpop.eup %2836 }
0x20f8   :  { %v1777_v26 = vsub.f32 1.0, %v2837_v10  ;;  %v1789_v34 = vmul.f32 %v2837_v10, %v3436_v51 }
0x20f9   :  { %v2839_v14 = vpop.eup %2838 }
0x20fa   :  { %v1778_v29 = vsub.f32 1.0, %v2839_v14  ;;  %v1790_v32 = vmul.f32 %v2839_v14, %v1658_v50 }
0x2148   :  { %v1758_v11 = vpop.permute.xlu1 %1757 }
0x2149   :  { %v1763_v13 = vmul.f32 %v2837_v10, %v1758_v11 }
0x214a   :  { %v1760_v15 = vpop.permute.xlu0 %1759 }
0x214b   :  { %v1764_v16 = vmul.f32 %v2839_v14, %v1760_v15  ;;  %1767 = vrot.lane.b32.xlu1 %v1763_v13, %s2954_s15 }
0x214d   :  { %1769 = vrot.lane.b32.xlu0 %v1764_v16, %s2954_s15 }
0x21bd   :  { %v1768_v17 = vpop.permute.xlu1 %1767 }
0x21be   :  { %v1773_v18 = vadd.f32 %v1768_v17, %v1659_v59 }
0x21bf   :  { %v1770_v19 = vpop.permute.xlu0 %1769 }
0x21c0   :  { %2840 = vtanh.f32 %v1773_v18  ;;  %v1774_v20 = vadd.f32 %v1770_v19, %v1660_v60 }
0x21c2   :  { %2842 = vtanh.f32 %v1774_v20 }
0x21cd   :  { %v2841_v23 = vpop.eup %2840 }
0x21ce   :  { %1781 = vrot.lane.b32.xlu1 %v2841_v23, %s2955_s20 }
0x21cf   :  { %v2843_v24 = vpop.eup %2842 }
0x21d0   :  { %1783 = vrot.lane.b32.xlu0 %v2843_v24, %s2955_s20 }
0x2240   :  { %v1782_v25 = vpop.permute.xlu1 %1781 }
0x2241   :  { %v1787_v31 = vmul.f32 %v1782_v25, %v1777_v26 }
0x2242   :  { %v1784_v30 = vpop.permute.xlu0 %1783 }
0x2243   :  { %v1788_v33 = vmul.f32 %v1784_v30, %v1778_v29  ;;  %v3465_v37 = vadd.f32 %v1789_v34, %v1787_v31 }
0x2245   :  { %v1792_v35 = vadd.f32 %v1790_v32, %v1788_v33  ;;  %v1927_v32 = vld [vmem:[%s3596_s0 + $0xe] sm:$0x1]  ;;  %v1928_v33 = vld [vmem:[%s3596_s0 + $0x1e] sm:$0x1] }
0x2247   :  { %v1797_v38 = vrot.slane %v1792_v35, 7 }
0x2249   :  { %v1798_v39 = vsel %vm189_vm1, %v1797_v38, %v3465_v37 }
0x224a   :  { %1799 = vrot.lane.b32.xlu0 %v1798_v39, %s2955_s20 }
0x22bc   :  { %v1800_v46 = vpop.permute.xlu0 %1799 }
0x22bd   :  { %2656 = vmatmul.mubr.msk.f32.vlgmr.msra.gmra.mxu1 %vm56_vm2, %v1800_v46 }
0x22be   :  { %2670 = vmatpush3.msra.mxu1 %v3299_v40  ;;  %2677 = vmatprep.mubr.msk.f32.mxu1 %vm2953_vm0, %v2952_v1 }
0x22bf   :  { %2671 = vmatprep.subr.mxu1 %v2952_v1 }
0x22c0   :  { %2672 = vmatpush3.msra.mxu1 %v3308_v41  ;;  %v1793_v41 = vld [vmem:[%s3596_s0 + $0xd] sm:$0x1] }
0x22c1   :  { %2673 = vmatprep.subr.mxu1 %v2952_v1 }
0x22c2   :  { %2674 = vmatpush3.msra.mxu1 %v3315_v43  ;;  %v1794_v43 = vld [vmem:[%s3596_s0 + $0x1d] sm:$0x1] }
0x22c3   :  { %2675 = vmatprep.subr.mxu1 %v2952_v1 }
0x22c4   :  { %2676 = vmatpush3.msra.mxu1 %v3322_v44 }
0x237d   :  { %v1869_v47 = vpop.f32.mrf.mxu1 }
0x237e   :  { %v1870_v48 = vadd.f32 %v3360_v27, %v1869_v47 }
0x237f   :  { %v2657_v49 = vpop.f32.mrf.mxu1 }
0x2380   :  { %1891 = vrot.lane.b32.xlu0 %v1870_v48, %s2954_s15  ;;  %v1874_v40 = vrot.slane %v1870_v48, 1  ;;  %v1877_v1 = vadd.f32 %v1870_v48, %v1793_v41 }
0x2382   :  { %1893 = vrot.lane.b32.xlu1 %v1874_v40, %s2954_s15  ;;  %v1878_v50 = vadd.f32 %v1874_v40, %v1794_v43  ;;  %v2410_v44 = vmul.f32 -1.442695, %v1877_v1 }
0x2384   :  { %v2411_v52 = vmul.f32 -1.442695, %v1878_v50  ;;  %2844 = vpow2.f32 %v2410_v44 }
0x2386   :  { %2846 = vpow2.f32 %v2411_v52 }
0x2391   :  { %v2845_v53 = vpop.eup %2844 }
0x2392   :  { %v1885_v56 = vadd.f32 1.0, %v2845_v53 }
0x2393   :  { %v2847_v54 = vpop.eup %2846 }
0x2394   :  { %v1886_v5 = vadd.f32 1.0, %v2847_v54  ;;  %2848 = vrcp.f32 %v1885_v56 }
0x2396   :  { %2850 = vrcp.f32 %v1886_v5 }
0x23a1   :  { %v2849_v57 = vpop.eup %2848 }
0x23a2   :  { %v1911_v11 = vsub.f32 1.0, %v2849_v57  ;;  %v1923_v18 = vmul.f32 %v2849_v57, %v3465_v37 }
0x23a3   :  { %v2851_v60 = vpop.eup %2850 }
0x23a4   :  { %v1912_v13 = vsub.f32 1.0, %v2851_v60  ;;  %v1924_v16 = vmul.f32 %v2851_v60, %v1792_v35 }
0x23f2   :  { %v1892_v58 = vpop.permute.xlu0 %1891 }
0x23f3   :  { %v1897_v59 = vmul.f32 %v2849_v57, %v1892_v58 }
0x23f4   :  { %v1894_v61 = vpop.permute.xlu1 %1893 }
0x23f5   :  { %v1898_v2 = vmul.f32 %v2851_v60, %v1894_v61  ;;  %1901 = vrot.lane.b32.xlu0 %v1897_v59, %s2954_s15 }
0x23f7   :  { %1903 = vrot.lane.b32.xlu1 %v1898_v2, %s2954_s15 }
0x2467   :  { %v1902_v3 = vpop.permute.xlu0 %1901 }
0x2468   :  { %v1907_v4 = vadd.f32 %v1902_v3, %v1793_v41 }
0x2469   :  { %v1904_v63 = vpop.permute.xlu1 %1903 }
0x246a   :  { %2852 = vtanh.f32 %v1907_v4  ;;  %v1908_v6 = vadd.f32 %v1904_v63, %v1794_v43 }
0x246c   :  { %2854 = vtanh.f32 %v1908_v6 }
0x2477   :  { %v2853_v7 = vpop.eup %2852 }
0x2478   :  { %1915 = vrot.lane.b32.xlu0 %v2853_v7, %s2955_s20 }
0x2479   :  { %v2855_v8 = vpop.eup %2854 }
0x247a   :  { %1917 = vrot.lane.b32.xlu1 %v2855_v8, %s2955_s20 }
0x24ea   :  { %v1916_v10 = vpop.permute.xlu0 %1915 }
0x24eb   :  { %v1921_v15 = vmul.f32 %v1916_v10, %v1911_v11 }
0x24ec   :  { %v1918_v14 = vpop.permute.xlu1 %1917 }
0x24ed   :  { %v1922_v17 = vmul.f32 %v1918_v14, %v1912_v13  ;;  %v3494_v20 = vadd.f32 %v1923_v18, %v1921_v15 }
0x24ef   :  { %v1926_v19 = vadd.f32 %v1924_v16, %v1922_v17  ;;  %v2061_v16 = vld [vmem:[%s3596_s0 + $0xf] sm:$0x1] }
0x24f1   :  { %v1931_v23 = vrot.slane %v1926_v19, 7 }
0x24f3   :  { %v1932_v24 = vsel %vm189_vm1, %v1931_v23, %v3494_v20 }
0x24f4   :  { %1933 = vrot.lane.b32.xlu1 %v1932_v24, %s2955_s20 }
0x2566   :  { %v1934_v25 = vpop.permute.xlu1 %1933 }
0x2567   :  { %2667 = vmatmul.mubr.msk.f32.vlgmr.msra.gmra.mxu0 %vm56_vm2, %v1934_v25 }
0x2627   :  { %v2003_v26 = vpop.f32.mrf.mxu0 }
0x2628   :  { %v2004_v29 = vadd.f32 %v3360_v27, %v2003_v26 }
0x2629   :  { %v2668_v30 = vpop.f32.mrf.mxu0 }
0x262a   :  { %v2008_v31 = vrot.slane %v2004_v29, 1  ;;  %2025 = vrot.lane.b32.xlu1 %v2004_v29, %s2954_s15  ;;  %v2011_v34 = vadd.f32 %v2004_v29, %v1927_v32 }
0x262c   :  { %2027 = vrot.lane.b32.xlu0 %v2008_v31, %s2954_s15  ;;  %v2012_v35 = vadd.f32 %v2008_v31, %v1928_v33  ;;  %v2413_v38 = vmul.f32 -1.442695, %v2011_v34  ;;  %v2167_v31 = vrot.slane %v3107_v22, 7  ;;  %v2173_v34 = vrot.slane %v3197_v28, 4 }
0x262e   :  { %v2414_v39 = vmul.f32 -1.442695, %v2012_v35  ;;  %2856 = vpow2.f32 %v2413_v38  ;;  %v2197_v35 = vsel %vm2196_vm3, %v3076_v42, %v2167_v31  ;;  %v2175_v38 = vrot.slane %v3227_v12, 3 }
0x2630   :  { %2858 = vpow2.f32 %v2414_v39 }
0x263b   :  { %v2857_v46 = vpop.eup %2856 }
0x263c   :  { %v2019_v48 = vadd.f32 1.0, %v2857_v46  ;;  %v2177_v46 = vrot.slane %v3257_v55, 2 }
0x263d   :  { %v2859_v47 = vpop.eup %2858 }
0x263e   :  { %v2020_v49 = vadd.f32 1.0, %v2859_v47  ;;  %2860 = vrcp.f32 %v2019_v48 }
0x2640   :  { %2862 = vrcp.f32 %v2020_v49  ;;  %v2181_v49 = vrot.slane %v3376_v9, 7 }
0x264b   :  { %v2861_v40 = vpop.eup %2860 }
0x264c   :  { %v2045_v59 = vsub.f32 1.0, %v2861_v40  ;;  %v2057_v63 = vmul.f32 %v2861_v40, %v3494_v20 }
0x264d   :  { %v2863_v1 = vpop.eup %2862 }
0x264e   :  { %v2046_v60 = vsub.f32 1.0, %v2863_v1  ;;  %v2058_v3 = vmul.f32 %v2863_v1, %v1926_v19 }
0x269c   :  { %v2026_v41 = vpop.permute.xlu1 %2025 }
0x269d   :  { %v2031_v43 = vmul.f32 %v2861_v40, %v2026_v41  ;;  %v2185_v40 = vrot.slane %v3436_v51, 5 }
0x269e   :  { %v2028_v50 = vpop.permute.xlu0 %2027 }
0x269f   :  { %v2032_v44 = vmul.f32 %v2863_v1, %v2028_v50  ;;  %2035 = vrot.lane.b32.xlu1 %v2031_v43, %s2954_s15  ;;  %v2187_v43 = vrot.slane %v3465_v37, 4  ;;  %v2210_v50 = vsel %vm2196_vm3, %v3341_v21, %v2181_v49 }
0x26a1   :  { %2037 = vrot.lane.b32.xlu0 %v2032_v44, %s2954_s15  ;;  %v2189_v44 = vrot.slane %v3494_v20, 3 }
0x2711   :  { %v2036_v52 = vpop.permute.xlu1 %2035 }
0x2712   :  { %v2041_v53 = vadd.f32 %v2036_v52, %v1927_v32  ;;  %v2169_v32 = vrot.slane %v3137_v62, 6  ;;  %v2179_v62 = vrot.slane %v3289_v36, 1  ;;  %v2183_v36 = vrot.slane %v3406_v0, 6 }
0x2713   :  { %v2038_v54 = vpop.permute.xlu0 %2037 }
0x2714   :  { %2864 = vtanh.f32 %v2041_v53  ;;  %v2042_v56 = vadd.f32 %v2038_v54, %v1928_v33  ;;  %v2171_v33 = vrot.slane %v3167_v45, 5  ;;  %v2199_v39 = vsel %vm2198_vm4, %v2197_v35, %v2169_v32 }
0x2715   :  { %v2211_v54 = vsel %vm2198_vm4, %v2210_v50, %v2183_v36  ;;  %vm2266_vm4 = vcmask 130048  }
0x2716   :  { %2866 = vtanh.f32 %v2042_v56  ;;  %v2201_v22 = vsel %vm2200_vm5, %v2199_v39, %v2171_v33  ;;  %v2212_v0 = vsel %vm2200_vm5, %v2211_v54, %v2185_v40  ;;  %vm2338_vm5 = vcmask 0  }
0x2717   :  { %v2203_v45 = vsel %vm2202_vm6, %v2201_v22, %v2173_v34  ;;  %v2213_v51 = vsel %vm2202_vm6, %v2212_v0, %v2187_v43 }
0x2718   :  { %v2205_v47 = vsel %vm2204_vm7, %v2203_v45, %v2175_v38  ;;  %v2214_v37 = vsel %vm2204_vm7, %v2213_v51, %v2189_v44 }
0x2719   :  { %v2207_v12 = vsel %vm2206_vm8, %v2205_v47, %v2177_v46 }
0x271a   :  { %v2209_v48 = vsel %vm2208_vm9, %v2207_v12, %v2179_v62 }
0x2721   :  { %v2865_v5 = vpop.eup %2864 }
0x2722   :  { %2049 = vrot.lane.b32.xlu1 %v2865_v5, %s2955_s20 }
0x2723   :  { %v2867_v57 = vpop.eup %2866 }
0x2724   :  { %2051 = vrot.lane.b32.xlu0 %v2867_v57, %s2955_s20 }
0x2794   :  { %v2050_v58 = vpop.permute.xlu1 %2049 }
0x2795   :  { %v2055_v2 = vmul.f32 %v2050_v58, %v2045_v59 }
0x2796   :  { %v2052_v61 = vpop.permute.xlu0 %2051 }
0x2797   :  { %v2056_v4 = vmul.f32 %v2052_v61, %v2046_v60  ;;  %v3514_v7 = vadd.f32 %v2057_v63, %v2055_v2  ;;  %v2241_v2 = vstv %s3600_s4  ;;  %s2320_s4 = sld [smem:[#allocation3]] }
0x2799   :  { %v2060_v6 = vadd.f32 %v2058_v3, %v2056_v4  ;;  %v2191_v9 = vrot.slane %v3514_v7, 2 }
0x279b   :  { %v2064_v8 = vrot.slane %v2060_v6, 7  ;;  %v2215_v20 = vsel %vm2206_vm8, %v2214_v37, %v2191_v9 }
0x279d   :  { %v2065_v10 = vsel %vm189_vm1, %v2064_v8, %v3514_v7 }
0x279e   :  { %2066 = vrot.lane.b32.xlu0 %v2065_v10, %s2955_s20  ;;  %v2244_v10 = vlaneseq }
0x2810   :  { %v2067_v11 = vpop.permute.xlu0 %2066 }
0x2811   :  { %2678 = vmatmul.mubr.msk.f32.vlgmr.msra.gmra.mxu1 %vm56_vm2, %v2067_v11 }
0x28d1   :  { %v2136_v13 = vpop.f32.mrf.mxu1 }
0x28d2   :  { %v2137_v14 = vadd.f32 %v3360_v27, %v2136_v13  ;;  %v2417_v27 = vld [vmem:[%s3599_s3] ss:$0 sm:$0xff] }
0x28d3   :  { %v2679_v15 = vpop.f32.mrf.mxu1 }
0x28d4   :  { %2149 = vrot.lane.b32.xlu1 %v2137_v14, %s2954_s15  ;;  %v2142_v17 = vadd.f32 %v2137_v14, %v2061_v16  ;;  %v2248_v14 = vand.u32 127, %v2244_v10  ;;  %v2245_v15 = vshrl.u32 %v2244_v10, 7 }
0x28d6   :  { %v2416_v18 = vmul.f32 -1.442695, %v2142_v17  ;;  %v2418_v17 = vadd.s32 4294967285, %v2248_v14  ;;  %vm2257_vm12 = vcmp.le.s32.totalorder %v2245_v15, %v2248_v14  ;;  %vm2276_vm0 = vcmp.ge.s32.totalorder %v2245_v15, %v2248_v14 }
0x28d8   :  { %2868 = vpow2.f32 %v2416_v18  ;;  %v2278_v18 = vadd.s32 11, %v2248_v14  ;;  %vm2260_vm13 = vcmp.ge.s32.totalorder %v2245_v15, %v2418_v17 }
0x28e5   :  { %v2869_v19 = vpop.eup %2868 }
0x28e6   :  { %v2146_v23 = vadd.f32 1.0, %v2869_v19 }
0x28e8   :  { %2870 = vrcp.f32 %v2146_v23 }
0x28f5   :  { %v2871_v24 = vpop.eup %2870 }
0x28f6   :  { %v2159_v41 = vsub.f32 1.0, %v2871_v24  ;;  %v2165_v52 = vmul.f32 %v2871_v24, %v3514_v7 }
0x2946   :  { %v2150_v25 = vpop.permute.xlu1 %2149 }
0x2947   :  { %v2152_v26 = vmul.f32 %v2871_v24, %v2150_v25 }
0x2949   :  { %2154 = vrot.lane.b32.xlu0 %v2152_v26, %s2954_s15  ;;  %s2420_s15 = sld [smem:[#allocation3 + $0x1]] }
0x294d   :  { %2222 = vrot.lane.b32.xlu0 %v2417_v27, %s2956_s2 }
0x29bb   :  { %v2155_v29 = vpop.permute.xlu0 %2154 }
0x29bc   :  { %v2157_v30 = vadd.f32 %v2155_v29, %v2061_v16  ;;  %v2246_v16 = vadd.s32 8, %v2245_v15 }
0x29be   :  { %2872 = vtanh.f32 %v2157_v30  ;;  %vm2258_vm10 = vcmp.le.s32.totalorder %v2246_v16, %v2248_v14  ;;  %vm2261_vm11 = vcmp.ge.s32.totalorder %v2246_v16, %v2418_v17  ;;  %vm2277_vm14 = vcmp.ge.s32.totalorder %v2246_v16, %v2248_v14 }
0x29bf   :  { %v2223_v42 = vpop.permute.xlu0 %2222  ;;  %vm2280_vm15 = vcmp.le.s32.totalorder %v2246_v16, %v2278_v18  ;;  %vm2263_vm1 = vmand %vm2258_vm10, %vm2261_vm11 }
0x29c0   :  { %v2225_v55 = vmul.f32 %v2223_v42, %v2209_v48  ;;  %vm3571_vm3 = vmand %vm2277_vm14, %vm2280_vm15 }
0x29cb   :  { %v2873_v28 = vpop.eup %2872 }
0x29cc   :  { %2161 = vrot.lane.b32.xlu1 %v2873_v28, %s2955_s20 }
0x29d0   :  { %2229 = vrot.lane.b32.xlu1 %v2225_v55, %s2955_s20 }
0x2a3e   :  { %v2162_v1 = vpop.permute.xlu1 %2161 }
0x2a3f   :  { %v2164_v53 = vmul.f32 %v2162_v1, %v2159_v41 }
0x2a41   :  { %v2166_v56 = vadd.f32 %v2165_v52, %v2164_v53 }
0x2a42   :  { %v2230_v5 = vpop.permute.xlu1 %2229 }
0x2a43   :  { %v2194_v57 = vrot.slane %v2166_v56, 1  ;;  %v2235_v21 = vsel %vm56_vm2, %v2230_v5, 0.0 }
0x2a44   :  { %2236 = vadd.xlane.f32.xlu1 %v2235_v21 }
0x2a45   :  { %v2216_v58 = vsel %vm2208_vm9, %v2215_v20, %v2194_v57 }
0x2a46   :  { %v2226_v59 = vmul.f32 %v2223_v42, %v2216_v58 }
0x2a48   :  { %2231 = vrot.lane.b32.xlu0 %v2226_v59, %s2955_s20  ;;  %s2957_s20 = smov [#allocation6]  }
0x2a49   :  { %s2347_s22 = sshll.u32 %s2957_s20, 4  ;;  %s2348_s22 = int_to_ptr.vmem [resolvable:$true] %s2347_s22 }
0x2a4a   :  { %s2905_s23 = scalar_lea.vmem %s2348_s22, 16  ;;  %s2909_s24 = scalar_lea.vmem %s2348_s22, 32 }
0x2a4b   :  { %p2906_p5 = scmp.ne.s32.totalorder %s2348_s22, %s2905_s23  ;;  %p2910_p6 = scmp.lt.s32.totalorder %s2348_s22, %s2348_s22 }
0x2a4c   :  { %p2911_p7 = scmp.lt.s32.totalorder %s2909_s24, %s2905_s23 }
0x2a4e   :  { %p2912_p8 = por %p2911_p7, %p2910_p6 }
0x2a50   :  { %p2913_p9 = pnand %p2912_p8, %p2906_p5 }
0x2aba   :  { %v2232_v60 = vpop.permute.xlu0 %2231 }
0x2abb   :  { %v2238_v61 = vsel %vm56_vm2, %v2232_v60, 0.0  ;;  %vm3567_vm2 = vmand %vm2257_vm12, %vm2260_vm13 }
0x2abc   :  { %2239 = vadd.xlane.f32.xlu0 %v2238_v61 }
0x2acd   :  { %v2237_v3 = vpop.xlane.xlu1 %2236 }
0x2ace   :  { %v2242_v4 = vadd.f32 %v2241_v2, %v2237_v3  ;;  %v2324_v3 = vstv %s2320_s4 }
0x2ad0   :  { %v2249_v63 = vsub.f32 0.0, %v2242_v4  ;;  %v2264_v30 = vsel %vm3567_vm2, %v2242_v4, inf }
0x2ad1   :  { %v2267_v22 = vsel %vm2266_vm4, %v2264_v30, inf }
0x2ad2   :  { %v2251_v6 = vmul.f32 1.442695, %v2249_v63  ;;  %v2326_v63 = vstv %s2420_s15 }
0x2ad4   :  { %2874 = vpow2.f32 %v2251_v6 }
0x2ae1   :  { %v2875_v19 = vpop.eup %2874 }
0x2ae2   :  { %v2255_v24 = vmul.f32 %v2875_v19, %v2242_v4  ;;  %v2294_v26 = vsel %vm2276_vm0, %v2875_v19, 0.0 }
0x2ae3   :  { %v2296_v34 = vsel %vm2266_vm4, %v2294_v26, 0.0 }
0x2ae4   :  { %v2283_v31 = vsel %vm2276_vm0, %v2255_v24, 0.0 }
0x2ae5   :  { %v2285_v62 = vsel %vm2266_vm4, %v2283_v31, 0.0 }
0x2b45   :  { %v2240_v7 = vpop.xlane.xlu0 %2239 }
0x2b46   :  { %v2243_v8 = vadd.f32 %v2241_v2, %v2240_v7 }
0x2b48   :  { %v2250_v11 = vsub.f32 0.0, %v2243_v8  ;;  %v2265_v27 = vsel %vm2263_vm1, %v2243_v8, inf }
0x2b49   :  { %v2268_v35 = vsel %vm2266_vm4, %v2265_v27, inf }
0x2b4a   :  { %v2253_v13 = vmul.f32 1.442695, %v2250_v11  ;;  %v2269_v28 = vmin.f32 %v2267_v22, %v2268_v35 }
0x2b4c   :  { %2876 = vpow2.f32 %v2253_v13  ;;  %v2270_v48 = vrot.slane %v2269_v28, 4 }
0x2b4e   :  { %v2271_v40 = vmin.f32 %v2269_v28, %v2270_v48 }
0x2b50   :  { %v2272_v50 = vrot.slane %v2271_v40, 2 }
0x2b52   :  { %v2273_v52 = vmin.f32 %v2271_v40, %v2272_v50 }
0x2b54   :  { %v2274_v54 = vrot.slane %v2273_v52, 1 }
0x2b56   :  { %v2275_v0 = vmin.f32 %v2273_v52, %v2274_v54 }
0x2b58   :  { %v2308_v57 = vmul.f32 0.5, %v2275_v0 }
0x2b59   :  { %v2877_v29 = vpop.eup %2876 }
0x2b5a   :  { %v2256_v32 = vmul.f32 %v2877_v29, %v2243_v8  ;;  %v2295_v33 = vsel %vm3571_vm3, %v2877_v29, 0.0 }
0x2b5b   :  { %v2297_v38 = vsel %vm2266_vm4, %v2295_v33, 0.0 }
0x2b5c   :  { %v2284_v39 = vsel %vm3571_vm3, %v2256_v32, 0.0  ;;  %v2298_v46 = vadd.f32 %v2297_v38, %v2296_v34 }
0x2b5d   :  { %v2286_v45 = vsel %vm2266_vm4, %v2284_v39, 0.0 }
0x2b5e   :  { %v2287_v47 = vadd.f32 %v2286_v45, %v2285_v62  ;;  %v2299_v42 = vrot.slane %v2298_v46, 4 }
0x2b60   :  { %v2300_v12 = vadd.f32 %v2299_v42, %v2298_v46  ;;  %v2288_v55 = vrot.slane %v2287_v47, 4 }
0x2b62   :  { %v2301_v49 = vrot.slane %v2300_v12, 2  ;;  %v2289_v41 = vadd.f32 %v2288_v55, %v2287_v47 }
0x2b64   :  { %v2302_v36 = vadd.f32 %v2301_v49, %v2300_v12  ;;  %v2290_v44 = vrot.slane %v2289_v41, 2 }
0x2b66   :  { %v2303_v43 = vrot.slane %v2302_v36, 1  ;;  %v2291_v53 = vadd.f32 %v2290_v44, %v2289_v41 }
0x2b68   :  { %v2304_v1 = vadd.f32 %v2303_v43, %v2302_v36  ;;  %v2292_v9 = vrot.slane %v2291_v53, 1 }
0x2b6a   :  { %2878 = vrcp.f32 %v2304_v1  ;;  %v2293_v56 = vadd.f32 %v2292_v9, %v2291_v53 }
0x2b77   :  { %v2879_v51 = vpop.eup %2878 }
0x2b78   :  { %v2306_v5 = vmul.f32 %v2879_v51, %v2293_v56 }
0x2b7a   :  { %v2307_v37 = vmul.f32 0.5, %v2306_v5 }
0x2b7c   :  { %v2309_v21 = vadd.f32 %v2308_v57, %v2307_v37 }
0x2b7e   :  { %v2310_v20 = vsel %vm2266_vm4, %v2309_v21, 0.0 }
0x2b7f   :  { %2311 = vadd.xlane.f32.xlu0 %v2310_v20 }
0x2c08   :  { %v2312_v58 = vpop.xlane.xlu0 %2311 }
0x2c09   :  { %v2419_v59 = vmul.f32 -0.0625, %v2312_v58 }
0x2c0b   :  { %v2315_v60 = vmul.f32 1.442695, %v2419_v59 }
0x2c0d   :  { %2880 = vpow2.f32 %v2315_v60 }
0x2c1a   :  { %v2881_v61 = vpop.eup %2880 }
0x2c1b   :  { %v2317_v2 = vadd.f32 1.0, %v2881_v61 }
0x2c1d   :  { %2882 = vrcp.f32 %v2317_v2 }
0x2c2a   :  { %v2883_v4 = vpop.eup %2882 }
0x2c2b   :  { %v2325_v6 = vmul.f32 %v2883_v4, %v2324_v3  ;;  %2339 = vst.msk [vmem:[#allocation6] sm:$0x1] %vm2338_vm5, %v2883_v4 }
0x2c2c   :  { %2916 = shalt.err (!%p2913_p9)
}
0x2c2d   :  { %2350 = dma.vmem_to_hbm [thread:$0]  %s2348_s22, 16, %s3602_s6, [#allocation4]   ;;  %v2327_v7 = vadd.f32 %v2326_v63, %v2325_v6 }
0x2c2e   :  { %s2421_s27 = sld [smem:[#allocation3 + $0x2]]  ;;  %s2958_s29 = smov [#allocation7]  }
0x2c2f   :  { %v2423_v8 = vmul.f32 -1.442695, %v2327_v7  ;;  %s2422_s28 = sld [smem:[#allocation3 + $0x3]]  ;;  %s2357_s30 = sshll.u32 %s2958_s29, 4  ;;  %s2358_s30 = int_to_ptr.vmem [resolvable:$true] %s2357_s30 }
0x2c30   :  { %s2925_s5 = scalar_lea.vmem %s2358_s30, 16  ;;  %s2929_s6 = scalar_lea.vmem %s2358_s30, 32 }
0x2c31   :  { %2884 = vpow2.f32 %v2423_v8  ;;  %p2926_p10 = scmp.ne.s32.totalorder %s2358_s30, %s2925_s5  ;;  %p2930_p11 = scmp.lt.s32.totalorder %s2358_s30, %s2358_s30 }
0x2c32   :  { %p2931_p12 = scmp.lt.s32.totalorder %s2929_s6, %s2925_s5 }
0x2c34   :  { %v2334_v13 = vstv %s2421_s27  ;;  %p2932_p13 = por %p2931_p12, %p2930_p11 }
0x2c35   :  { %v2336_v15 = vstv %s2422_s28 }
0x2c36   :  { %p2933_p0 = pnand %p2932_p13, %p2926_p10 }
0x2c3e   :  { %v2885_v10 = vpop.eup %2884 }
0x2c3f   :  { %v2331_v11 = vadd.f32 1.0, %v2885_v10 }
0x2c41   :  { %2886 = vrcp.f32 %v2331_v11 }
0x2c4e   :  { %v2887_v14 = vpop.eup %2886 }
0x2c4f   :  { %v2335_v16 = vmul.f32 %v2887_v14, %v2334_v13 }
0x2c51   :  { %v2337_v17 = vadd.f32 %v2336_v15, %v2335_v16 }
0x2c53   :  { %2340 = vst.msk [vmem:[#allocation7] sm:$0x1] %vm2338_vm5, %v2337_v17 }
0x2c54   :  { %2936 = shalt.err (!%p2933_p0)
}
0x2c55   :  { %2360 = dma.vmem_to_hbm [thread:$0]  %s2358_s30, 16, %s3603_s7, [#allocation8]  }
0x2c56   :  { %2947 = dma.done.wait [#allocation4], 16  }
0x2c57   :  { %2948 = vsyncadd [#allocation4], 4294967280 }
0x2c58   :  { %2949 = dma.done.wait [#allocation8], 16  }
0x2c59   :  { %2950 = vsyncadd [#allocation8], 4294967280 }
0x2c5a   :  { %2367 = vsyncpa [#allocation4], 1 }
0x2c5b   :  { %2368 = vsyncpa [#allocation8], 1 }
0x2c5c   :  { %2369 = vsyncpa [#allocation5], 1 }

</bundles_post_ra>
